<compile_context>
chip_gen: v7x
topology: tpu7x:2x2x1
jax: 0.10.0
libtpu: 0.0.40
codegen_flags: <defaults>
</compile_context>

<pallas_src>
import jax
import jax.numpy as jnp
from jax.experimental import pallas as pl
from jax.experimental.pallas import tpu as pltpu

FEAT_DIM = 2048   # base_model output width (ImageModel.fc.in_features)
OUT_DIM = 768     # ImageModel.fc.out_features


def fused_head_kernel(pooled_ref, pw_ref, pb_ref, fw_ref, fb_ref, o_ref):
    """One output-column tile of  y = relu(pooled @ Pw + Pb) @ Fw + Fb.

    pooled_ref: [B, C]        f32   (full, resident across grid)
    pw_ref:     [C, 2048]     f32   (full backbone-stub projection weight)
    pb_ref:     [1, 2048]     f32
    fw_ref:     [2048, tn]    bf16  (fc weight column tile -- the big stream)
    fb_ref:     [1, tn]       f32
    o_ref:      [B, tn]       f32
    """
    # backbone-stub projection -> features, f32 accumulation on the MXU
    feats = jnp.dot(pooled_ref[...], pw_ref[...],
                    preferred_element_type=jnp.float32) + pb_ref[...]
    # ReLU (VPU), then drop to bf16 so the big matmul consumes bf16 x bf16
    x = jnp.maximum(feats, 0.0).astype(fw_ref.dtype)
    # fc: bf16 x bf16 -> f32 accumulate (MXU), bias added in f32
    acc = jnp.dot(x, fw_ref[...], preferred_element_type=jnp.float32)
    o_ref[...] = (acc + fb_ref[...]).astype(o_ref.dtype)


def image_head(pooled, proj_w, proj_b, fc_w_bf16, fc_b, *, tn=OUT_DIM):
    """pooled: [B, C] f32; proj_w: [C, 2048] f32; fc_w_bf16: [2048, 768] bf16.

    Default tn=768 -> grid=(1,) (single weight block).  Use tn=384 for an even
    2-way split across v7x's two TensorCores.
    """
    B, C = pooled.shape
    Kp, F = proj_w.shape
    Kf, N = fc_w_bf16.shape
    assert Kp == C and F == FEAT_DIM and Kf == FEAT_DIM and N == OUT_DIM
    assert N % tn == 0 and tn % 128 == 0
    assert fc_w_bf16.dtype == jnp.bfloat16

    pb2d = proj_b.reshape(1, FEAT_DIM).astype(jnp.float32)
    fb2d = fc_b.reshape(1, N).astype(jnp.float32)

    # Advisory cost for XLA scheduling around the custom call.
    flops = 2 * B * C * FEAT_DIM + 2 * B * FEAT_DIM * N
    bytes_accessed = (pooled.size * 4 + proj_w.size * 4 + pb2d.size * 4
                      + fc_w_bf16.size * 2 + fb2d.size * 4 + B * N * 4)
    cost = pl.CostEstimate(flops=flops, transcendentals=0,
                           bytes_accessed=bytes_accessed)

    return pl.pallas_call(
        fused_head_kernel,
        out_shape=jax.ShapeDtypeStruct((B, N), jnp.float32),
        grid_spec=pltpu.PrefetchScalarGridSpec(
            num_scalar_prefetch=0,
            grid=(N // tn,),
            in_specs=[
                pl.BlockSpec((B, C), lambda j: (0, 0)),           # pooled (full)
                pl.BlockSpec((C, FEAT_DIM), lambda j: (0, 0)),    # proj weight
                pl.BlockSpec((1, FEAT_DIM), lambda j: (0, 0)),    # proj bias
                pl.BlockSpec((FEAT_DIM, tn), lambda j: (0, j)),   # fc weight tile (bf16)
                pl.BlockSpec((1, tn), lambda j: (0, j)),          # fc bias tile
            ],
            out_specs=pl.BlockSpec((B, tn), lambda j: (0, j)),
        ),
        compiler_params=pltpu.CompilerParams(
            dimension_semantics=("parallel",),
            vmem_limit_bytes=32 * 1024 * 1024,   # explicit: fits v5e/v6e/v7x scoped limits
        ),
        cost_estimate=cost,
    )(pooled, proj_w, pb2d, fc_w_bf16, fb2d)


def image_model_forward(x_nchw, params):
    # TODO(synk): the reference `ImageNet` backbone definition was not provided;
    # global-average-pool + dense C->2048 only reproduces the [B, 2048] contract.
    pooled = jnp.mean(x_nchw, axis=(2, 3)).astype(jnp.float32)   # [B, C] (tiny, plain JAX)
    return image_head(pooled, params["proj_w"], params["proj_b"],
                      params["fc_w"], params["fc_b"])


def init_params(key, in_channels):
    k1, k2, k3, k4 = jax.random.split(key, 4)
    return {
        # backbone stand-in: C -> 2048 (small, kept f32)
        "proj_w": jax.random.normal(k1, (in_channels, FEAT_DIM), jnp.float32) * 0.02,
        "proj_b": jax.random.normal(k2, (FEAT_DIM,), jnp.float32) * 0.02,
        # fc: [2048, 768] (transpose of nn.Linear(2048, 768).weight), stored bf16
        # so the bandwidth-bound weight stream moves half the bytes.
        "fc_w": (jax.random.normal(k3, (FEAT_DIM, OUT_DIM), jnp.float32) * 0.02
                 ).astype(jnp.bfloat16),
        "fc_b": jax.random.normal(k4, (OUT_DIM,), jnp.float32) * 0.02,
    }


if __name__ == "__main__":
    key = jax.random.PRNGKey(0)
    kx, kp = jax.random.split(key)

    B, C, H, W = 2, 4, 16, 16
    x = jax.random.normal(kx, (B, C, H, W), jnp.float32)      # NCHW like PyTorch
    params = init_params(kp, C)

    out = image_model_forward(x, params)
    jax.block_until_ready(out)
    assert out.shape == (B, OUT_DIM), out.shape

    # reference check against plain-JAX forward that mirrors the bf16 path
    pooled_ref = jnp.mean(x, axis=(2, 3))
    feats_ref = pooled_ref @ params["proj_w"] + params["proj_b"]
    act_ref = jnp.maximum(feats_ref, 0.0).astype(jnp.bfloat16).astype(jnp.float32)
    ref = act_ref @ params["fc_w"].astype(jnp.float32) + params["fc_b"]
    assert jnp.allclose(out, ref, atol=1e-2, rtol=1e-2), \
        float(jnp.max(jnp.abs(out - ref)))

    print("KERNEL_OK")
</pallas_src>

<mosaic_0001>
module attributes {stable_mosaic.version = 11 : i64} {
  func.func @fused_head_kernel(%arg0: i32, %arg1: memref<2x4xf32, #tpu.memory_space<vmem>>, %arg2: memref<4x2048xf32, #tpu.memory_space<vmem>>, %arg3: memref<1x2048xf32, #tpu.memory_space<vmem>>, %arg4: memref<2048x768xbf16, #tpu.memory_space<vmem>>, %arg5: memref<1x768xf32, #tpu.memory_space<vmem>>, %arg6: memref<2x768xf32, #tpu.memory_space<vmem>>) attributes {dimension_semantics = [#tpu.dimension_semantics<parallel>], iteration_bounds = array<i64: 1>, scalar_prefetch = 0 : i64, scratch_operands = 0 : i64, tpu.core_type = #tpu.core_type<tc>, window_params = [{pipeline_mode = #tpu.pipeline_mode<synchronous>, transform_indices = @transform_0, window_bounds = array<i64: 2, 4>}, {pipeline_mode = #tpu.pipeline_mode<synchronous>, transform_indices = @transform_1, window_bounds = array<i64: 4, 2048>}, {pipeline_mode = #tpu.pipeline_mode<synchronous>, transform_indices = @transform_2, window_bounds = array<i64: 1, 2048>}, {transform_indices = @transform_3, window_bounds = array<i64: 2048, 768>}, {transform_indices = @transform_4, window_bounds = array<i64: 1, 768>}, {transform_indices = @transform_5, window_bounds = array<i64: 2, 768>}]} {
    %c0 = arith.constant 0 : index
    %c0_0 = arith.constant 0 : index
    %0 = vector.load %arg1[%c0, %c0_0] : memref<2x4xf32, #tpu.memory_space<vmem>>, vector<2x4xf32>
    %c0_1 = arith.constant 0 : index
    %c0_2 = arith.constant 0 : index
    %1 = vector.load %arg2[%c0_1, %c0_2] : memref<4x2048xf32, #tpu.memory_space<vmem>>, vector<4x2048xf32>
    %cst = arith.constant dense<0.000000e+00> : vector<2x2048xf32>
    %2 = tpu.matmul %0, %1, %cst {dimension_numbers = #tpu.dot_dimension_numbers<[1], [0], [0], [1], [0, 0, 1, 1], [], []>} : vector<2x4xf32>, vector<4x2048xf32>, vector<2x2048xf32> -> vector<2x2048xf32>
    %c0_3 = arith.constant 0 : index
    %c0_4 = arith.constant 0 : index
    %3 = vector.load %arg3[%c0_3, %c0_4] : memref<1x2048xf32, #tpu.memory_space<vmem>>, vector<1x2048xf32>
    %4 = vector.broadcast %3 : vector<1x2048xf32> to vector<2x2048xf32>
    %5 = arith.addf %2, %4 : vector<2x2048xf32>
    %cst_5 = arith.constant 0.000000e+00 : f32
    %6 = vector.broadcast %cst_5 : f32 to vector<2x2048xf32>
    %7 = arith.maximumf %5, %6 : vector<2x2048xf32>
    %8 = arith.truncf %7 : vector<2x2048xf32> to vector<2x2048xbf16>
    %c0_6 = arith.constant 0 : index
    %c0_7 = arith.constant 0 : index
    %9 = vector.load %arg4[%c0_6, %c0_7] : memref<2048x768xbf16, #tpu.memory_space<vmem>>, vector<2048x768xbf16>
    %cst_8 = arith.constant dense<0.000000e+00> : vector<2x768xf32>
    %10 = tpu.matmul %8, %9, %cst_8 {dimension_numbers = #tpu.dot_dimension_numbers<[1], [0], [0], [1], [0, 0, 1, 1], [], []>} : vector<2x2048xbf16>, vector<2048x768xbf16>, vector<2x768xf32> -> vector<2x768xf32>
    %c0_9 = arith.constant 0 : index
    %c0_10 = arith.constant 0 : index
    %11 = vector.load %arg5[%c0_9, %c0_10] : memref<1x768xf32, #tpu.memory_space<vmem>>, vector<1x768xf32>
    %12 = vector.broadcast %11 : vector<1x768xf32> to vector<2x768xf32>
    %13 = arith.addf %10, %12 : vector<2x768xf32>
    %c0_11 = arith.constant 0 : index
    %c0_12 = arith.constant 0 : index
    %14 = vector.load %arg6[%c0_11, %c0_12] : memref<2x768xf32, #tpu.memory_space<vmem>>, vector<2x768xf32>
    tpu.vector_store %arg6[%c0_11, %c0_12], %13 {strides = array<i32>} : memref<2x768xf32, #tpu.memory_space<vmem>>, vector<2x768xf32>,
    return
  }
  func.func @transform_0(%arg0: i32) -> (i32, i32) {
    %c0_i32 = arith.constant 0 : i32
    %c0_i32_0 = arith.constant 0 : i32
    %c0_i32_1 = arith.constant 0 : i32
    return %c0_i32, %c0_i32_0 : i32, i32
  }
  func.func @transform_1(%arg0: i32) -> (i32, i32) {
    %c0_i32 = arith.constant 0 : i32
    %c0_i32_0 = arith.constant 0 : i32
    %c0_i32_1 = arith.constant 0 : i32
    return %c0_i32, %c0_i32_0 : i32, i32
  }
  func.func @transform_2(%arg0: i32) -> (i32, i32) {
    %c0_i32 = arith.constant 0 : i32
    %c0_i32_0 = arith.constant 0 : i32
    %c0_i32_1 = arith.constant 0 : i32
    return %c0_i32, %c0_i32_0 : i32, i32
  }
  func.func @transform_3(%arg0: i32) -> (i32, i32) {
    %c0_i32 = arith.constant 0 : i32
    %c0_i32_0 = arith.constant 0 : i32
    return %c0_i32, %arg0 : i32, i32
  }
  func.func @transform_4(%arg0: i32) -> (i32, i32) {
    %c0_i32 = arith.constant 0 : i32
    %c0_i32_0 = arith.constant 0 : i32
    return %c0_i32, %arg0 : i32, i32
  }
  func.func @transform_5(%arg0: i32) -> (i32, i32) {
    %c0_i32 = arith.constant 0 : i32
    %c0_i32_0 = arith.constant 0 : i32
    return %c0_i32, %arg0 : i32, i32
  }
}

</mosaic_0001>

<bundles_post_ra>
// kernel: tpu_custom_call.1
= control target key start
LH: loop header
LB: loop body
LE: loop exit
PB: predicated region body
PF: predicated region fallthrough
CT: control target
= control target key end

     0   :  { %10 = vsyncpa [#allocation3], 0  ;;  %s9024_s0 = inlined_call_operand.hbm [shape: f32[2,4], index: 0, kind: input, shape index: {}]   ;;  %s9025_s1 = inlined_call_operand.hbm [shape: f32[4,2048], index: 1, kind: input, shape index: {}]   ;;  %s9026_s2 = inlined_call_operand.hbm [shape: f32[1,2048], index: 2, kind: input, shape index: {}]   ;;  %s9027_s3 = inlined_call_operand.hbm [shape: bf16[2048,768], index: 3, kind: input, shape index: {}]   ;;  %s9028_s4 = inlined_call_operand.hbm [shape: f32[1,768], index: 4, kind: input, shape index: {}]   ;;  %s9029_s5 = inlined_call_operand.hbm [shape: f32[2,768], index: 5, kind: output, shape index: {}]  }
   0x1   :  { %11 = vsyncpa [#allocation6], 0 }
   0x2   :  { %12 = vsyncpa [#allocation9], 0 }
   0x3   :  { %13 = vsyncpa [#allocation4], 0  ;;  %s8697_s18 = smov [#allocation5]   ;;  %s8698_s20 = smov [#allocation8]  }
   0x4   :  { %s30_s19 = sshll.u32 %s8697_s18, 4  ;;  %s49_s21 = sshll.u32 %s8698_s20, 4  ;;  %s31_s19 = int_to_ptr.vmem [resolvable:$true] %s30_s19  ;;  %s8737_s21 = int_to_ptr.vmem [resolvable:$true] %s49_s21 }
   0x5   :  { %s8557_s24 = scalar_lea.hbm %s9025_s1, 1024 }
   0x6   :  { %p8558_p0 = scmp.ne.s32.totalorder %s9025_s1, %s8557_s24  ;;  %p8561_p1 = scmp.lt.u32.totalorder %s8557_s24, %s9025_s1 }
   0x8   :  { %p8563_p2 = pnand %p8561_p1, %p8558_p0 }
   0xa   :  { %8566 = shalt.err (!%p8563_p2)
}
   0xb   :  { %s8567_s29 = scalar_lea.vmem %s31_s19, 1024  ;;  %p8572_p4 = scmp.lt.s32.totalorder %s31_s19, %s31_s19 }
   0xc   :  { %p8568_p3 = scmp.ne.s32.totalorder %s31_s19, %s8567_s29  ;;  %p8573_p5 = scmp.lt.s32.totalorder %s8567_s29, %s8567_s29 }
   0xe   :  { %p8574_p6 = por %p8573_p5, %p8572_p4 }
  0x10   :  { %p8575_p7 = pnand %p8574_p6, %p8568_p3 }
  0x12   :  { %8578 = shalt.err (!%p8575_p7)
}
  0x13   :  { %33 = dma.hbm_to_vmem [thread:$0]  %s9025_s1, 1024, %s31_s19, [#allocation6]  }
  0x14   :  { %s8579_s9 = scalar_lea.hbm %s9027_s3, 98304 }
  0x15   :  { %p8580_p8 = scmp.ne.s32.totalorder %s9027_s3, %s8579_s9  ;;  %p8583_p9 = scmp.lt.u32.totalorder %s8579_s9, %s9027_s3 }
  0x17   :  { %p8585_p10 = pnand %p8583_p9, %p8580_p8 }
  0x19   :  { %8588 = shalt.err (!%p8585_p10)
}
  0x1a   :  { %s8589_s14 = scalar_lea.vmem %s8737_s21, 98304  ;;  %p8594_p12 = scmp.lt.s32.totalorder %s8737_s21, %s8737_s21 }
  0x1b   :  { %p8590_p11 = scmp.ne.s32.totalorder %s8737_s21, %s8589_s14  ;;  %p8595_p13 = scmp.lt.s32.totalorder %s8589_s14, %s8589_s14 }
  0x1d   :  { %p8596_p0 = por %p8595_p13, %p8594_p12 }
  0x1f   :  { %p8597_p1 = pnand %p8596_p0, %p8590_p11 }
  0x21   :  { %8600 = shalt.err (!%p8597_p1)
}
  0x22   :  { %s8699_s1 = smov 384   ;;  %s8700_s15 = smov 24  }
  0x23   :  { %55 = dma.hbm_to_vmem [thread:$0]  %s9027_s3, 98304, %s8737_s21, [#allocation9], %s8699_s1, %s8699_s1, %s8700_s15  }
  0x24   :  { %s8701_s18 = smov [#allocation2]   ;;  %s8702_s20 = smov [#allocation7]  }
  0x25   :  { %s20_s19 = sshll.u32 %s8701_s18, 4  ;;  %s40_s22 = sshll.u32 %s8702_s20, 4  ;;  %s21_s19 = int_to_ptr.vmem [resolvable:$true] %s20_s19  ;;  %s41_s22 = int_to_ptr.vmem [resolvable:$true] %s40_s22 }
  0x26   :  { %s8601_s25 = scalar_lea.hbm %s9024_s0, 32 }
  0x27   :  { %p8602_p2 = scmp.ne.s32.totalorder %s9024_s0, %s8601_s25  ;;  %p8605_p3 = scmp.lt.u32.totalorder %s8601_s25, %s9024_s0 }
  0x29   :  { %p8607_p4 = pnand %p8605_p3, %p8602_p2 }
  0x2b   :  { %8610 = shalt.err (!%p8607_p4)
}
  0x2c   :  { %s8611_s3 = scalar_lea.vmem %s21_s19, 32  ;;  %p8616_p6 = scmp.lt.s32.totalorder %s21_s19, %s21_s19 }
  0x2d   :  { %p8612_p5 = scmp.ne.s32.totalorder %s21_s19, %s8611_s3  ;;  %p8617_p7 = scmp.lt.s32.totalorder %s8611_s3, %s8611_s3 }
  0x2f   :  { %p8618_p8 = por %p8617_p7, %p8616_p6 }
  0x31   :  { %p8619_p9 = pnand %p8618_p8, %p8612_p5 }
  0x33   :  { %8622 = shalt.err (!%p8619_p9)
}
  0x34   :  { %23 = dma.hbm_to_vmem [thread:$0]  %s9024_s0, 32, %s21_s19, [#allocation3]  }
  0x35   :  { %s8623_s8 = scalar_lea.hbm %s9026_s2, 256 }
  0x36   :  { %p8624_p10 = scmp.ne.s32.totalorder %s9026_s2, %s8623_s8  ;;  %p8627_p11 = scmp.lt.u32.totalorder %s8623_s8, %s9026_s2 }
  0x38   :  { %p8629_p12 = pnand %p8627_p11, %p8624_p10 }
  0x3a   :  { %8632 = shalt.err (!%p8629_p12)
}
  0x3b   :  { %s8633_s13 = scalar_lea.vmem %s41_s22, 256  ;;  %p8638_p0 = scmp.lt.s32.totalorder %s41_s22, %s41_s22 }
  0x3c   :  { %p8634_p13 = scmp.ne.s32.totalorder %s41_s22, %s8633_s13  ;;  %p8639_p1 = scmp.lt.s32.totalorder %s8633_s13, %s8633_s13 }
  0x3e   :  { %p8640_p2 = por %p8639_p1, %p8638_p0 }
  0x40   :  { %p8641_p3 = pnand %p8640_p2, %p8634_p13 }
  0x42   :  { %8644 = shalt.err (!%p8641_p3)
}
  0x43   :  { %43 = dma.hbm_to_vmem [thread:$0]  %s9026_s2, 256, %s41_s22, [#allocation6]  }
  0x44   :  { %s8703_s1 = smov [#allocation10]   ;;  %s8645_s18 = scalar_lea.hbm %s9028_s4, 96 }
  0x45   :  { %s62_s15 = sshll.u32 %s8703_s1, 4  ;;  %p8646_p4 = scmp.ne.s32.totalorder %s9028_s4, %s8645_s18  ;;  %s63_s15 = int_to_ptr.vmem [resolvable:$true] %s62_s15 }
  0x46   :  { %p8649_p5 = scmp.lt.u32.totalorder %s8645_s18, %s9028_s4 }
  0x48   :  { %p8651_p6 = pnand %p8649_p5, %p8646_p4 }
  0x4a   :  { %8654 = shalt.err (!%p8651_p6)
}
  0x4b   :  { %s8655_s25 = scalar_lea.vmem %s63_s15, 96  ;;  %p8660_p8 = scmp.lt.s32.totalorder %s63_s15, %s63_s15 }
  0x4c   :  { %p8656_p7 = scmp.ne.s32.totalorder %s63_s15, %s8655_s25  ;;  %p8661_p9 = scmp.lt.s32.totalorder %s8655_s25, %s8655_s25 }
  0x4e   :  { %p8662_p10 = por %p8661_p9, %p8660_p8 }
  0x50   :  { %p8663_p11 = pnand %p8662_p10, %p8656_p7 }
  0x52   :  { %8666 = shalt.err (!%p8663_p11)
}
  0x53   :  { %65 = dma.hbm_to_vmem [thread:$0]  %s9028_s4, 96, %s63_s15, [#allocation9]  }
  0x54   :  { %8689 = dma.done.wait [#allocation3], 32  }
  0x55   :  { %8690 = vsyncadd [#allocation3], 4294967264 }
  0x56   :  { %8691 = dma.done.wait [#allocation6], 1280  }
  0x57   :  { %8692 = vsyncadd [#allocation6], 4294966016 }
  0x58   :  { %8693 = dma.done.wait [#allocation9], 98400  }
  0x59   :  { %8694 = vsyncadd [#allocation9], 4294868896  ;;  %v8704_v0 = vmov 0.0   ;;  %v82_v1 = vld [vmem:[#allocation5] sm:$0xff]  ;;  %vm194_vm0 = vcmask 1043456   ;;  %v84_v2 = vld [vmem:[#allocation5 + $0x10] sm:$0xff] }
  0x5a   :  { %291 = vmatprep.mubr.f32.mxu0 %v8704_v0  ;;  %362 = vmatprep.mubr.f32.mxu1 %v8704_v0  ;;  %v182_v3 = vcombine.high %v82_v1, %v82_v1  ;;  %v184_v4 = vcombine.high %v84_v2, %v84_v2  ;;  %v86_v5 = vld [vmem:[#allocation5 + $0x20] sm:$0xff]  ;;  %v83_v6 = vld [vmem:[#allocation5 + $0x8] sm:$0xff]  ;;  %v85_v7 = vld [vmem:[#allocation5 + $0x18] sm:$0xff]  ;;  %vm190_vm1 = vcmask 31744   ;;  %s8706_s4 = smov [#allocation11]  }
  0x5b   :  { %v81_v8 = vld [vmem:[#allocation2] sm:$0x3]  ;;  %v183_v9 = vcombine.high %v83_v6, %v83_v6  ;;  %v186_v10 = vcombine.high %v86_v5, %v86_v5  ;;  %v185_v11 = vcombine.high %v85_v7, %v85_v7  ;;  %v87_v12 = vld [vmem:[#allocation5 + $0x28] sm:$0xff]  ;;  %v88_v13 = vld [vmem:[#allocation5 + $0x30] sm:$0xff]  ;;  %s6492_s26 = sshll.u32 %s8706_s4, 4  ;;  %s6493_s26 = int_to_ptr.vmem [resolvable:$true] %s6492_s26 }
  0x5c   :  { %6503 = vmatprep.subr.msk.mxu0 %vm194_vm0, %v182_v3  ;;  %v187_v14 = vcombine.high %v87_v12, %v87_v12  ;;  %v188_v15 = vcombine.high %v88_v13, %v88_v13  ;;  %v89_v16 = vld [vmem:[#allocation5 + $0x38] sm:$0xff]  ;;  %v7413_v18 = vld [vmem:[#allocation8 + $0xc04] ss:$24 sps:$4 sm:$0xff]   ;;  %v7411_v20 = vld [vmem:[#allocation8 + $0xc00] ss:$24 sps:$4 sm:$0xff]   ;;  %s8667_s27 = scalar_lea.vmem %s6493_s26, 192  ;;  %p8672_p13 = scmp.lt.s32.totalorder %s6493_s26, %s6493_s26 }
  0x5d   :  { %6504 = vmatpush1.msk.msra.mxu0 %vm194_vm0, %v82_v1  ;;  %6506 = vmatprep.subr.msk.mxu1 %vm194_vm0, %v183_v9  ;;  %v189_v17 = vcombine.high %v89_v16, %v89_v16  ;;  %v7404_v19 = vld [vmem:[#allocation8 + $0x4] ss:$24 sps:$4 sm:$0xff]   ;;  %v7419_v21 = vld [vmem:[#allocation8 + $0xc34] ss:$24 sps:$4 sm:$0xff]   ;;  %v7402_v22 = vld [vmem:[#allocation8] ss:$24 sps:$4 sm:$0xff]   ;;  %p8668_p12 = scmp.ne.s32.totalorder %s6493_s26, %s8667_s27  ;;  %p8673_p0 = scmp.lt.s32.totalorder %s8667_s27, %s8667_s27 }
  0x5e   :  { %6505 = vmatmul.mubr.msk.f32.vlgmr.msra.gmra.mrb[0].mxu0 %vm190_vm1, %v81_v8  ;;  %6509 = vmatprep.subr.msk.mxu0 %vm194_vm0, %v184_v4  ;;  %v7407_v23 = vld [vmem:[#allocation8 + $0x34] ss:$24 sps:$4 sm:$0xff]   ;;  %v7417_v24 = vld [vmem:[#allocation8 + $0xc30] ss:$24 sps:$4 sm:$0xff]   ;;  %v7425_v25 = vld [vmem:[#allocation8 + $0xc64] ss:$24 sps:$4 sm:$0xff]  }
  0x5f   :  { %6510 = vmatpush1.msk.msra.mxu0 %vm194_vm0, %v84_v2  ;;  %433 = vmatprep.mubr.f32.mxu0 %v8704_v0  ;;  %v7405_v26 = vld [vmem:[#allocation8 + $0x30] ss:$24 sps:$4 sm:$0xff]   ;;  %v7410_v27 = vld [vmem:[#allocation8 + $0x64] ss:$24 sps:$4 sm:$0xff]   ;;  %v7423_v28 = vld [vmem:[#allocation8 + $0xc60] ss:$24 sps:$4 sm:$0xff]   ;;  %p8674_p1 = por %p8673_p0, %p8672_p13 }
  0x60   :  { %6515 = vmatprep.subr.msk.mxu0 %vm194_vm0, %v186_v10  ;;  %6507 = vmatpush1.msk.msra.mxu1 %vm194_vm0, %v83_v6  ;;  %v7431_v29 = vld [vmem:[#allocation8 + $0xc94] ss:$24 sps:$4 sm:$0xff]   ;;  %v7408_v30 = vld [vmem:[#allocation8 + $0x60] ss:$24 sps:$4 sm:$0xff]   ;;  %v7429_v32 = vld [vmem:[#allocation8 + $0xc90] ss:$24 sps:$4 sm:$0xff]  }
  0x61   :  { %6508 = vmatmul.mubr.msk.f32.vlgmr.msra.gmra.mrb[0].mxu1 %vm190_vm1, %v81_v8  ;;  %6512 = vmatprep.subr.msk.mxu1 %vm194_vm0, %v185_v11  ;;  %v7416_v31 = vld [vmem:[#allocation8 + $0x94] ss:$24 sps:$4 sm:$0xff]   ;;  %v7437_v33 = vld [vmem:[#allocation8 + $0xcc4] ss:$24 sps:$4 sm:$0xff]   ;;  %v7414_v34 = vld [vmem:[#allocation8 + $0x90] ss:$24 sps:$4 sm:$0xff]   ;;  %p8675_p2 = pnand %p8674_p1, %p8668_p12 }
  0x62   :  { %6511 = vmatmul.mubr.msk.f32.vlgmr.msra.gmra.mrb[2].mxu0 %vm190_vm1, %v81_v8  ;;  %6513 = vmatpush1.msk.msra.mxu1 %vm194_vm0, %v85_v7  ;;  %v7422_v35 = vld [vmem:[#allocation8 + $0xc4] ss:$24 sps:$4 sm:$0xff]   ;;  %v7435_v36 = vld [vmem:[#allocation8 + $0xcc0] ss:$24 sps:$4 sm:$0xff]   ;;  %v7443_v37 = vld [vmem:[#allocation8 + $0xcf4] ss:$24 sps:$4 sm:$0xff]  }
  0x63   :  { %6516 = vmatpush1.msk.msra.mxu0 %vm194_vm0, %v86_v5  ;;  %575 = vmatprep.mubr.f32.mxu0 %v8704_v0  ;;  %v7420_v38 = vld [vmem:[#allocation8 + $0xc0] ss:$24 sps:$4 sm:$0xff]   ;;  %v7428_v39 = vld [vmem:[#allocation8 + $0xf4] ss:$24 sps:$4 sm:$0xff]   ;;  %v7441_v40 = vld [vmem:[#allocation8 + $0xcf0] ss:$24 sps:$4 sm:$0xff]  }
  0x64   :  { %504 = vmatprep.mubr.f32.mxu1 %v8704_v0  ;;  %6518 = vmatprep.subr.msk.mxu1 %vm194_vm0, %v187_v14  ;;  %v7449_v41 = vld [vmem:[#allocation8 + $0xd24] ss:$24 sps:$4 sm:$0xff]   ;;  %v7426_v42 = vld [vmem:[#allocation8 + $0xf0] ss:$24 sps:$4 sm:$0xff]   ;;  %v7447_v44 = vld [vmem:[#allocation8 + $0xd20] ss:$24 sps:$4 sm:$0xff]  }
  0x65   :  { %6514 = vmatmul.mubr.msk.f32.vlgmr.msra.gmra.mrb[2].mxu1 %vm190_vm1, %v81_v8  ;;  %6521 = vmatprep.subr.msk.mxu0 %vm194_vm0, %v188_v15  ;;  %v7434_v43 = vld [vmem:[#allocation8 + $0x124] ss:$24 sps:$4 sm:$0xff]   ;;  %v7455_v45 = vld [vmem:[#allocation8 + $0xd54] ss:$24 sps:$4 sm:$0xff]   ;;  %v7432_v46 = vld [vmem:[#allocation8 + $0x120] ss:$24 sps:$4 sm:$0xff]  }
  0x66   :  { %6517 = vmatmul.mubr.msk.f32.vlgmr.msra.gmra.mrb[4].mxu0 %vm190_vm1, %v81_v8  ;;  %6519 = vmatpush1.msk.msra.mxu1 %vm194_vm0, %v87_v12  ;;  %v7440_v47 = vld [vmem:[#allocation8 + $0x154] ss:$24 sps:$4 sm:$0xff]   ;;  %v7453_v48 = vld [vmem:[#allocation8 + $0xd50] ss:$24 sps:$4 sm:$0xff]   ;;  %v7461_v49 = vld [vmem:[#allocation8 + $0xd84] ss:$24 sps:$4 sm:$0xff]  }
  0x67   :  { %646 = vmatprep.mubr.f32.mxu1 %v8704_v0  ;;  %6522 = vmatpush1.msk.msra.mxu0 %vm194_vm0, %v88_v13  ;;  %v7438_v50 = vld [vmem:[#allocation8 + $0x150] ss:$24 sps:$4 sm:$0xff]   ;;  %v7446_v51 = vld [vmem:[#allocation8 + $0x184] ss:$24 sps:$4 sm:$0xff]   ;;  %v7459_v52 = vld [vmem:[#allocation8 + $0xd80] ss:$24 sps:$4 sm:$0xff]  }
  0x68   :  { %717 = vmatprep.mubr.f32.mxu0 %v8704_v0  ;;  %6524 = vmatprep.subr.msk.mxu1 %vm194_vm0, %v189_v17  ;;  %v7467_v53 = vld [vmem:[#allocation8 + $0xdb4] ss:$24 sps:$4 sm:$0xff]   ;;  %v7444_v54 = vld [vmem:[#allocation8 + $0x180] ss:$24 sps:$4 sm:$0xff]   ;;  %v7465_v56 = vld [vmem:[#allocation8 + $0xdb0] ss:$24 sps:$4 sm:$0xff]  }
  0x69   :  { %6520 = vmatmul.mubr.msk.f32.vlgmr.msra.gmra.mrb[4].mxu1 %vm190_vm1, %v81_v8  ;;  %5631 = vmatprep.subr.bf16.mxu0 %v7413_v18  ;;  %v7452_v55 = vld [vmem:[#allocation8 + $0x1b4] ss:$24 sps:$4 sm:$0xff]   ;;  %v7473_v57 = vld [vmem:[#allocation8 + $0xde4] ss:$24 sps:$4 sm:$0xff]   ;;  %v7450_v58 = vld [vmem:[#allocation8 + $0x1b0] ss:$24 sps:$4 sm:$0xff]  }
  0x6a   :  { %6523 = vmatmul.mubr.msk.f32.vlgmr.msra.gmra.mrb[6].mxu0 %vm190_vm1, %v81_v8  ;;  %6525 = vmatpush1.msk.msra.mxu1 %vm194_vm0, %v89_v16  ;;  %v7458_v59 = vld [vmem:[#allocation8 + $0x1e4] ss:$24 sps:$4 sm:$0xff]   ;;  %v7471_v60 = vld [vmem:[#allocation8 + $0xde0] ss:$24 sps:$4 sm:$0xff]   ;;  %v7479_v61 = vld [vmem:[#allocation8 + $0xe14] ss:$24 sps:$4 sm:$0xff]  }
  0x6b   :  { %788 = vmatprep.mubr.f32.mxu1 %v8704_v0  ;;  %5467 = vmatprep.subr.bf16.mxu1 %v7404_v19  ;;  %v7456_v62 = vld [vmem:[#allocation8 + $0x1e0] ss:$24 sps:$4 sm:$0xff]   ;;  %v7464_v63 = vld [vmem:[#allocation8 + $0x214] ss:$24 sps:$4 sm:$0xff]   ;;  %v7477_v0 = vld [vmem:[#allocation8 + $0xe10] ss:$24 sps:$4 sm:$0xff]  }
  0x6c   :  { %5632 = vmatpush1.bf16.msra.mxu0 %v7411_v20  ;;  %v7462_v1 = vld [vmem:[#allocation8 + $0x210] ss:$24 sps:$4 sm:$0xff]   ;;  %v7470_v2 = vld [vmem:[#allocation8 + $0x244] ss:$24 sps:$4 sm:$0xff]   ;;  %v7468_v3 = vld [vmem:[#allocation8 + $0x240] ss:$24 sps:$4 sm:$0xff]   ;;  %v94_v20 = vlaneseq }
  0x6d   :  { %6526 = vmatmul.mubr.msk.f32.vlgmr.msra.gmra.mrb[6].mxu1 %vm190_vm1, %v81_v8  ;;  %5633 = vmatprep.subr.bf16.mxu0 %v7419_v21  ;;  %v7476_v4 = vld [vmem:[#allocation8 + $0x274] ss:$24 sps:$4 sm:$0xff]   ;;  %v7474_v5 = vld [vmem:[#allocation8 + $0x270] ss:$24 sps:$4 sm:$0xff]   ;;  %v7482_v6 = vld [vmem:[#allocation8 + $0x2a4] ss:$24 sps:$4 sm:$0xff]  }
  0x6e   :  { %5468 = vmatpush1.bf16.msra.mxu1 %v7402_v22  ;;  %v7485_v7 = vld [vmem:[#allocation8 + $0xe44] ss:$24 sps:$4 sm:$0xff]   ;;  %v7480_v8 = vld [vmem:[#allocation8 + $0x2a0] ss:$24 sps:$4 sm:$0xff]   ;;  %v7488_v10 = vld [vmem:[#allocation8 + $0x2d4] ss:$24 sps:$4 sm:$0xff]  }
  0x6f   :  { %5469 = vmatprep.subr.bf16.mxu1 %v7407_v23  ;;  %v7483_v9 = vld [vmem:[#allocation8 + $0xe40] ss:$24 sps:$4 sm:$0xff]   ;;  %v7491_v11 = vld [vmem:[#allocation8 + $0xe74] ss:$24 sps:$4 sm:$0xff]   ;;  %v7486_v12 = vld [vmem:[#allocation8 + $0x2d0] ss:$24 sps:$4 sm:$0xff]  }
  0x70   :  { %5634 = vmatpush1.bf16.msra.mxu0 %v7417_v24  ;;  %v7489_v13 = vld [vmem:[#allocation8 + $0xe70] ss:$24 sps:$4 sm:$0xff]   ;;  %v7494_v14 = vld [vmem:[#allocation8 + $0x304] ss:$24 sps:$4 sm:$0xff]   ;;  %v7495_v16 = vld [vmem:[#allocation8 + $0xea0] ss:$24 sps:$4 sm:$0xff]  }
  0x71   :  { %5635 = vmatprep.subr.bf16.mxu0 %v7425_v25  ;;  %v7497_v15 = vld [vmem:[#allocation8 + $0xea4] ss:$24 sps:$4 sm:$0xff]   ;;  %v7503_v17 = vld [vmem:[#allocation8 + $0xed4] ss:$24 sps:$4 sm:$0xff]   ;;  %v7501_v18 = vld [vmem:[#allocation8 + $0xed0] ss:$24 sps:$4 sm:$0xff]  }
  0x72   :  { %5470 = vmatpush1.bf16.msra.mxu1 %v7405_v26  ;;  %v7509_v19 = vld [vmem:[#allocation8 + $0xf04] ss:$24 sps:$4 sm:$0xff]   ;;  %v8828_v21 = vshrl.u32 %v94_v20, 7  ;;  %v8830_v22 = vld [vmem:[#allocation7] sm:$0xff] }
  0x73   :  { %5471 = vmatprep.subr.bf16.mxu1 %v7410_v27  ;;  %v7533_v20 = vld [vmem:[#allocation8 + $0xfc4] ss:$24 sps:$4 sm:$0xff]  }
  0x74   :  { %5636 = vmatpush1.bf16.msra.mxu0 %v7423_v28  ;;  %v8833_v23 = vsub.s32 0, %v8828_v21  ;;  %v8836_v24 = vsub.s32 1, %v8828_v21  ;;  %v8841_v26 = vsub.s32 3, %v8828_v21 }
  0x75   :  { %5637 = vmatprep.subr.bf16.mxu0 %v7431_v29  ;;  %v8845_v29 = vld [vmem:[#allocation7 + $0x8] sm:$0xff] }
  0x76   :  { %5472 = vmatpush1.bf16.msra.mxu1 %v7408_v30  ;;  %v97_v25 = vrot.slane %v8830_v22, %v8833_v23  ;;  %v101_v27 = vrot.slane %v8830_v22, %v8836_v24 }
  0x77   :  { %5473 = vmatprep.subr.bf16.mxu1 %v7416_v31 }
  0x78   :  { %5638 = vmatpush1.bf16.msra.mxu0 %v7429_v32  ;;  %v109_v32 = vrot.slane %v8830_v22, %v8841_v26 }
  0x79   :  { %5639 = vmatprep.subr.bf16.mxu0 %v7437_v33 }
  0x7a   :  { %5474 = vmatpush1.bf16.msra.mxu1 %v7414_v34 }
  0x7b   :  { %5475 = vmatprep.subr.bf16.mxu1 %v7422_v35 }
  0x7c   :  { %5640 = vmatpush1.bf16.msra.mxu0 %v7435_v36 }
  0x7d   :  { %5641 = vmatprep.subr.bf16.mxu0 %v7443_v37 }
  0x7e   :  { %5476 = vmatpush1.bf16.msra.mxu1 %v7420_v38  ;;  %v7492_v38 = vld [vmem:[#allocation8 + $0x300] ss:$24 sps:$4 sm:$0xff]  }
  0x7f   :  { %5477 = vmatprep.subr.bf16.mxu1 %v7428_v39 }
  0x80   :  { %5642 = vmatpush1.bf16.msra.mxu0 %v7441_v40 }
  0x81   :  { %5643 = vmatprep.subr.bf16.mxu0 %v7449_v41  ;;  %v129_v41 = vrot.slane %v8845_v29, %v8833_v23 }
  0x82   :  { %5478 = vmatpush1.bf16.msra.mxu1 %v7426_v42  ;;  %v7500_v42 = vld [vmem:[#allocation8 + $0x334] ss:$24 sps:$4 sm:$0xff]  }
  0x83   :  { %5479 = vmatprep.subr.bf16.mxu1 %v7434_v43 }
  0x84   :  { %5644 = vmatpush1.bf16.msra.mxu0 %v7447_v44 }
  0x85   :  { %5645 = vmatprep.subr.bf16.mxu0 %v7455_v45  ;;  %v133_v45 = vrot.slane %v8845_v29, %v8836_v24 }
  0x86   :  { %5480 = vmatpush1.bf16.msra.mxu1 %v7432_v46 }
  0x87   :  { %5481 = vmatprep.subr.bf16.mxu1 %v7440_v47 }
  0x88   :  { %5646 = vmatpush1.bf16.msra.mxu0 %v7453_v48 }
  0x89   :  { %5647 = vmatprep.subr.bf16.mxu0 %v7461_v49 }
  0x8a   :  { %5482 = vmatpush1.bf16.msra.mxu1 %v7438_v50 }
  0x8b   :  { %5483 = vmatprep.subr.bf16.mxu1 %v7446_v51 }
  0x8c   :  { %5648 = vmatpush1.bf16.msra.mxu0 %v7459_v52 }
  0x8d   :  { %5649 = vmatprep.subr.bf16.mxu0 %v7467_v53 }
  0x8e   :  { %5484 = vmatpush1.bf16.msra.mxu1 %v7444_v54  ;;  %v141_v54 = vrot.slane %v8845_v29, %v8841_v26 }
  0x8f   :  { %5485 = vmatprep.subr.bf16.mxu1 %v7452_v55 }
  0x90   :  { %5650 = vmatpush1.bf16.msra.mxu0 %v7465_v56  ;;  %v7498_v56 = vld [vmem:[#allocation8 + $0x330] ss:$24 sps:$4 sm:$0xff]  }
  0x91   :  { %5651 = vmatprep.subr.bf16.mxu0 %v7473_v57 }
  0x92   :  { %5486 = vmatpush1.bf16.msra.mxu1 %v7450_v58  ;;  %v7506_v58 = vld [vmem:[#allocation8 + $0x364] ss:$24 sps:$4 sm:$0xff]  }
  0x93   :  { %5487 = vmatprep.subr.bf16.mxu1 %v7458_v59 }
  0x94   :  { %5652 = vmatpush1.bf16.msra.mxu0 %v7471_v60 }
  0x95   :  { %5653 = vmatprep.subr.bf16.mxu0 %v7479_v61 }
  0x96   :  { %5488 = vmatpush1.bf16.msra.mxu1 %v7456_v62 }
  0x97   :  { %5489 = vmatprep.subr.bf16.mxu1 %v7464_v63  ;;  %v7504_v63 = vld [vmem:[#allocation8 + $0x360] ss:$24 sps:$4 sm:$0xff]  }
  0x98   :  { %5654 = vmatpush1.bf16.msra.mxu0 %v7477_v0  ;;  %v7507_v0 = vld [vmem:[#allocation8 + $0xf00] ss:$24 sps:$4 sm:$0xff]  }
  0x99   :  { %5655 = vmatprep.subr.bf16.mxu0 %v7485_v7 }
  0x9a   :  { %5490 = vmatpush1.bf16.msra.mxu1 %v7462_v1 }
  0x9b   :  { %5491 = vmatprep.subr.bf16.mxu1 %v7470_v2 }
  0x9c   :  { %5656 = vmatpush1.bf16.msra.mxu0 %v7483_v9  ;;  %v7513_v9 = vld [vmem:[#allocation8 + $0xf30] ss:$24 sps:$4 sm:$0xff]  }
  0x9d   :  { %5657 = vmatprep.subr.bf16.mxu0 %v7491_v11  ;;  %v7518_v11 = vld [vmem:[#allocation8 + $0x3c4] ss:$24 sps:$4 sm:$0xff]  }
  0x9e   :  { %5492 = vmatpush1.bf16.msra.mxu1 %v7468_v3 }
  0x9f   :  { %5493 = vmatprep.subr.bf16.mxu1 %v7476_v4 }
  0xa0   :  { %5658 = vmatpush1.bf16.msra.mxu0 %v7489_v13  ;;  %v7516_v13 = vld [vmem:[#allocation8 + $0x3c0] ss:$24 sps:$4 sm:$0xff]  }
  0xa1   :  { %5659 = vmatprep.subr.bf16.mxu0 %v7497_v15  ;;  %v7524_v15 = vld [vmem:[#allocation8 + $0x3f4] ss:$24 sps:$4 sm:$0xff]  }
  0xa2   :  { %5494 = vmatpush1.bf16.msra.mxu1 %v7474_v5  ;;  %v7512_v5 = vld [vmem:[#allocation8 + $0x394] ss:$24 sps:$4 sm:$0xff]  }
  0xa3   :  { %5495 = vmatprep.subr.bf16.mxu1 %v7482_v6  ;;  %v7515_v6 = vld [vmem:[#allocation8 + $0xf34] ss:$24 sps:$4 sm:$0xff]  }
  0xa4   :  { %5660 = vmatpush1.bf16.msra.mxu0 %v7495_v16  ;;  %v7527_v16 = vld [vmem:[#allocation8 + $0xf94] ss:$24 sps:$4 sm:$0xff]  }
  0xa5   :  { %5661 = vmatprep.subr.bf16.mxu0 %v7503_v17  ;;  %v7522_v17 = vld [vmem:[#allocation8 + $0x3f0] ss:$24 sps:$4 sm:$0xff]  }
  0xa6   :  { %5496 = vmatpush1.bf16.msra.mxu1 %v7480_v8  ;;  %v7510_v8 = vld [vmem:[#allocation8 + $0x390] ss:$24 sps:$4 sm:$0xff]  }
  0xa7   :  { %5497 = vmatprep.subr.bf16.mxu1 %v7488_v10 }
  0xa8   :  { %5662 = vmatpush1.bf16.msra.mxu0 %v7501_v18  ;;  %v7525_v18 = vld [vmem:[#allocation8 + $0xf90] ss:$24 sps:$4 sm:$0xff]  }
  0xa9   :  { %5672 = vmatprep.subr.bf16.mxu0 %v7509_v19  ;;  %v7530_v19 = vld [vmem:[#allocation8 + $0x424] ss:$24 sps:$4 sm:$0xff]  }
  0xaa   :  { %5498 = vmatpush1.bf16.msra.mxu1 %v7486_v12  ;;  %v7521_v12 = vld [vmem:[#allocation8 + $0xf64] ss:$24 sps:$4 sm:$0xff]  }
  0xab   :  { %5508 = vmatprep.subr.bf16.mxu1 %v7494_v14  ;;  %v7519_v14 = vld [vmem:[#allocation8 + $0xf60] ss:$24 sps:$4 sm:$0xff]  }
 0x131   :  { %v293_v28 = vpop.f32.mrb[0].mxu0 }
 0x132   :  { %v294_v30 = vadd.f32 %v293_v28, %v97_v25  ;;  %v295_v31 = vpop.f32.mrb[1].mxu0  ;;  %v7528_v25 = vld [vmem:[#allocation8 + $0x420] ss:$24 sps:$4 sm:$0xff]   ;;  %v7536_v28 = vld [vmem:[#allocation8 + $0x454] ss:$24 sps:$4 sm:$0xff]  }
 0x133   :  { %v296_v33 = vadd.f32 %v295_v31, %v101_v27  ;;  %v7531_v27 = vld [vmem:[#allocation8 + $0xfc0] ss:$24 sps:$4 sm:$0xff]  }
 0x134   :  { %v795_v34 = vmax.f32 %v294_v30, 0.0  ;;  %v8849_v35 = vpop.f32.mrb[0].mxu1  ;;  %v7539_v30 = vld [vmem:[#allocation8 + $0xff4] ss:$24 sps:$4 sm:$0xff]  }
 0x135   :  { %v796_v36 = vmax.f32 %v296_v33, 0.0  ;;  %v8851_v37 = vpop.f32.mrb[2].mxu0  ;;  %v366_v39 = vpop.f32.mrb[1].mxu1  ;;  %v7537_v33 = vld [vmem:[#allocation8 + $0xff0] ss:$24 sps:$4 sm:$0xff]  }
 0x136   :  { %v8853_v40 = vpop.f32.mrb[3].mxu0  ;;  %v367_v43 = vadd.f32 %v366_v39, %v109_v32  ;;  %v8861_v46 = vpack.c.bf16 %v795_v34, %v795_v34  ;;  %v7534_v32 = vld [vmem:[#allocation8 + $0x450] ss:$24 sps:$4 sm:$0xff]   ;;  %v7540_v39 = vld [vmem:[#allocation8 + $0x480] ss:$24 sps:$4 sm:$0xff]  }
 0x137   :  { %v8857_v44 = vpack.c.bf16 %v796_v36, %v796_v36  ;;  %v7542_v36 = vld [vmem:[#allocation8 + $0x484] ss:$24 sps:$4 sm:$0xff]  }
 0x138   :  { %v798_v47 = vmax.f32 %v367_v43, 0.0  ;;  %v8863_v48 = vpop.f32.mrb[2].mxu1  ;;  %v7551_v43 = vld [vmem:[#allocation8 + $0x1054] ss:$24 sps:$4 sm:$0xff]  }
 0x139   :  { %v577_v49 = vpop.f32.mrb[4].mxu0  ;;  %5499 = vmatprep.mubr.bf16.mxu1 %v8857_v44  ;;  %v8866_v50 = vpop.f32.mrb[3].mxu1 }
 0x13a   :  { %v578_v51 = vadd.f32 %v577_v49, %v129_v41  ;;  %v579_v52 = vpop.f32.mrb[5].mxu0  ;;  %5500 = vmatmul.mubr.bf16.vlgmr.msra.gmra.mrb[8].mxu1 %v8861_v46  ;;  %v8869_v53 = vpack.c.bf16 %v798_v47, %v798_v47  ;;  %v7543_v41 = vld [vmem:[#allocation8 + $0x1020] ss:$24 sps:$4 sm:$0xff]   ;;  %v7549_v47 = vld [vmem:[#allocation8 + $0x1050] ss:$24 sps:$4 sm:$0xff]  }
 0x13b   :  { %v580_v55 = vadd.f32 %v579_v52, %v133_v45  ;;  %5509 = vmatpush1.bf16.msra.mxu1 %v7492_v38  ;;  %v7545_v38 = vld [vmem:[#allocation8 + $0x1024] ss:$24 sps:$4 sm:$0xff]   ;;  %v7546_v45 = vld [vmem:[#allocation8 + $0x4b0] ss:$24 sps:$4 sm:$0xff]   ;;  %v7552_v52 = vld [vmem:[#allocation8 + $0x4e0] ss:$24 sps:$4 sm:$0xff]  }
 0x13c   :  { %v803_v57 = vmax.f32 %v578_v51, 0.0  ;;  %5510 = vmatprep.subr.bf16.mxu1 %v7500_v42  ;;  %v8873_v59 = vpop.f32.mrb[4].mxu1  ;;  %5540 = vmatprep.mubr.bf16.mxu1 %v8869_v53  ;;  %v7548_v42 = vld [vmem:[#allocation8 + $0x4b4] ss:$24 sps:$4 sm:$0xff]   ;;  %v7554_v49 = vld [vmem:[#allocation8 + $0x4e4] ss:$24 sps:$4 sm:$0xff]  }
 0x13d   :  { %v804_v60 = vmax.f32 %v580_v55, 0.0  ;;  %v650_v61 = vpop.f32.mrb[5].mxu1  ;;  %v8876_v62 = vpop.f32.mrb[6].mxu0  ;;  %v7557_v51 = vld [vmem:[#allocation8 + $0x1084] ss:$24 sps:$4 sm:$0xff]  }
 0x13e   :  { %v651_v1 = vadd.f32 %v650_v61, %v141_v54  ;;  %v8878_v2 = vpop.f32.mrb[7].mxu0  ;;  %v8882_v4 = vpack.c.bf16 %v803_v57, %v803_v57  ;;  %v7555_v54 = vld [vmem:[#allocation8 + $0x1080] ss:$24 sps:$4 sm:$0xff]   ;;  %v7560_v55 = vld [vmem:[#allocation8 + $0x514] ss:$24 sps:$4 sm:$0xff]  }
 0x13f   :  { %v8880_v3 = vpack.c.bf16 %v804_v60, %v804_v60  ;;  %5511 = vmatpush1.bf16.msra.mxu1 %v7498_v56  ;;  %v7563_v56 = vld [vmem:[#allocation8 + $0x10b4] ss:$24 sps:$4 sm:$0xff]   ;;  %v7558_v57 = vld [vmem:[#allocation8 + $0x510] ss:$24 sps:$4 sm:$0xff]   ;;  %v7566_v60 = vld [vmem:[#allocation8 + $0x544] ss:$24 sps:$4 sm:$0xff]  }
 0x140   :  { %5512 = vmatprep.subr.bf16.mxu1 %v7506_v58  ;;  %v806_v7 = vmax.f32 %v651_v1, 0.0  ;;  %v8889_v31 = vpop.f32.mrb[6].mxu1  ;;  %v7561_v58 = vld [vmem:[#allocation8 + $0x10b0] ss:$24 sps:$4 sm:$0xff]   ;;  %v7569_v61 = vld [vmem:[#allocation8 + $0x10e4] ss:$24 sps:$4 sm:$0xff]  }
 0x141   :  { %5663 = vmatprep.mubr.bf16.mxu0 %v8880_v3  ;;  %v8891_v34 = vpop.f32.mrb[7].mxu1  ;;  %v8894_v1 = vsub.s32 2, %v8828_v21 }
 0x142   :  { %5664 = vmatmul.mubr.bf16.vlgmr.msra.gmra.mrb[8].mxu0 %v8882_v4  ;;  %v8886_v10 = vpack.c.bf16 %v806_v7, %v806_v7  ;;  %v8897_v7 = vsub.s32 5, %v8828_v21 }
 0x143   :  { %5513 = vmatpush1.bf16.msra.mxu1 %v7504_v63  ;;  %5673 = vmatpush1.bf16.msra.mxu0 %v7507_v0  ;;  %v7564_v63 = vld [vmem:[#allocation8 + $0x540] ss:$24 sps:$4 sm:$0xff]  }
 0x144   :  { %5514 = vmatprep.subr.bf16.mxu1 %v7512_v5  ;;  %5674 = vmatprep.subr.bf16.mxu0 %v7515_v6  ;;  %v7567_v0 = vld [vmem:[#allocation8 + $0x10e0] ss:$24 sps:$4 sm:$0xff]   ;;  %v7572_v5 = vld [vmem:[#allocation8 + $0x574] ss:$24 sps:$4 sm:$0xff]  }
 0x145   :  { %5704 = vmatprep.mubr.bf16.mxu0 %v8886_v10  ;;  %v7575_v6 = vld [vmem:[#allocation8 + $0x1114] ss:$24 sps:$4 sm:$0xff]  }
 0x147   :  { %5515 = vmatpush1.bf16.msra.mxu1 %v7510_v8  ;;  %5675 = vmatpush1.bf16.msra.mxu0 %v7513_v9  ;;  %v7570_v8 = vld [vmem:[#allocation8 + $0x570] ss:$24 sps:$4 sm:$0xff]  }
 0x148   :  { %5516 = vmatprep.subr.bf16.mxu1 %v7518_v11  ;;  %5676 = vmatprep.subr.bf16.mxu0 %v7521_v12  ;;  %v7573_v9 = vld [vmem:[#allocation8 + $0x1110] ss:$24 sps:$4 sm:$0xff]   ;;  %v105_v11 = vrot.slane %v8830_v22, %v8894_v1  ;;  %v7578_v12 = vld [vmem:[#allocation8 + $0x5a4] ss:$24 sps:$4 sm:$0xff]  }
 0x14b   :  { %5517 = vmatpush1.bf16.msra.mxu1 %v7516_v13  ;;  %5677 = vmatpush1.bf16.msra.mxu0 %v7519_v14  ;;  %v7581_v13 = vld [vmem:[#allocation8 + $0x1144] ss:$24 sps:$4 sm:$0xff]   ;;  %v117_v14 = vrot.slane %v8830_v22, %v8897_v7  ;;  %v137_v22 = vrot.slane %v8845_v29, %v8894_v1 }
 0x14c   :  { %5518 = vmatprep.subr.bf16.mxu1 %v7524_v15  ;;  %5678 = vmatprep.subr.bf16.mxu0 %v7527_v16  ;;  %v7576_v15 = vld [vmem:[#allocation8 + $0x5a0] ss:$24 sps:$4 sm:$0xff]  }
 0x14d   :  { %v7579_v16 = vld [vmem:[#allocation8 + $0x1140] ss:$24 sps:$4 sm:$0xff]  }
 0x14f   :  { %5519 = vmatpush1.bf16.msra.mxu1 %v7522_v17  ;;  %5679 = vmatpush1.bf16.msra.mxu0 %v7525_v18  ;;  %v365_v17 = vadd.f32 %v8849_v35, %v105_v11  ;;  %v7584_v18 = vld [vmem:[#allocation8 + $0x5d4] ss:$24 sps:$4 sm:$0xff]   ;;  %v7593_v35 = vld [vmem:[#allocation8 + $0x11a4] ss:$24 sps:$4 sm:$0xff]  }
 0x150   :  { %5520 = vmatprep.subr.bf16.mxu1 %v7530_v19  ;;  %5680 = vmatprep.subr.bf16.mxu0 %v7533_v20  ;;  %v7587_v19 = vld [vmem:[#allocation8 + $0x1174] ss:$24 sps:$4 sm:$0xff]   ;;  %v438_v20 = vadd.f32 %v8853_v40, %v117_v14  ;;  %v7591_v40 = vld [vmem:[#allocation8 + $0x11a0] ss:$24 sps:$4 sm:$0xff]  }
 0x151   :  { %v7623_v11 = vld [vmem:[#allocation8 + $0x1294] ss:$24 sps:$4 sm:$0xff]   ;;  %v7624_v14 = vld [vmem:[#allocation8 + $0x720] ss:$24 sps:$4 sm:$0xff]  }
 0x153   :  { %5521 = vmatpush1.bf16.msra.mxu1 %v7528_v25  ;;  %5681 = vmatpush1.bf16.msra.mxu0 %v7531_v27  ;;  %v7582_v25 = vld [vmem:[#allocation8 + $0x5d0] ss:$24 sps:$4 sm:$0xff]  }
 0x154   :  { %5522 = vmatprep.subr.bf16.mxu1 %v7536_v28  ;;  %5682 = vmatprep.subr.bf16.mxu0 %v7539_v30  ;;  %v7585_v27 = vld [vmem:[#allocation8 + $0x1170] ss:$24 sps:$4 sm:$0xff]   ;;  %v797_v28 = vmax.f32 %v365_v17, 0.0  ;;  %v7590_v30 = vld [vmem:[#allocation8 + $0x604] ss:$24 sps:$4 sm:$0xff]  }
 0x155   :  { %v7632_v17 = vld [vmem:[#allocation8 + $0x754] ss:$24 sps:$4 sm:$0xff]  }
 0x157   :  { %5523 = vmatpush1.bf16.msra.mxu1 %v7534_v32  ;;  %5683 = vmatpush1.bf16.msra.mxu0 %v7537_v33  ;;  %v800_v32 = vmax.f32 %v438_v20, 0.0  ;;  %v7588_v33 = vld [vmem:[#allocation8 + $0x600] ss:$24 sps:$4 sm:$0xff]   ;;  %v7633_v20 = vld [vmem:[#allocation8 + $0x12f0] ss:$24 sps:$4 sm:$0xff]  }
 0x158   :  { %5524 = vmatprep.subr.bf16.mxu1 %v7542_v36  ;;  %5684 = vmatprep.subr.bf16.mxu0 %v7545_v38  ;;  %v149_v36 = vrot.slane %v8845_v29, %v8897_v7  ;;  %v8909_v38 = vpack.c.bf16 %v797_v28, %v797_v28  ;;  %v7597_v29 = vld [vmem:[#allocation8 + $0x11d0] ss:$24 sps:$4 sm:$0xff]   ;;  %v7641_v28 = vld [vmem:[#allocation8 + $0x1324] ss:$24 sps:$4 sm:$0xff]  }
 0x15b   :  { %5525 = vmatpush1.bf16.msra.mxu1 %v7540_v39  ;;  %5685 = vmatpush1.bf16.msra.mxu0 %v7543_v41  ;;  %v7596_v39 = vld [vmem:[#allocation8 + $0x634] ss:$24 sps:$4 sm:$0xff]   ;;  %v649_v41 = vadd.f32 %v8873_v59, %v137_v22  ;;  %v7600_v59 = vld [vmem:[#allocation8 + $0x660] ss:$24 sps:$4 sm:$0xff]  }
 0x15c   :  { %5526 = vmatprep.subr.bf16.mxu1 %v7548_v42  ;;  %5686 = vmatprep.subr.bf16.mxu0 %v7551_v43  ;;  %v8912_v42 = vpack.c.bf16 %v800_v32, %v800_v32  ;;  %v7599_v43 = vld [vmem:[#allocation8 + $0x11d4] ss:$24 sps:$4 sm:$0xff]   ;;  %v7639_v22 = vld [vmem:[#allocation8 + $0x1320] ss:$24 sps:$4 sm:$0xff]  }
 0x15d   :  { %v7647_v32 = vld [vmem:[#allocation8 + $0x1354] ss:$24 sps:$4 sm:$0xff]  }
 0x15f   :  { %5527 = vmatpush1.bf16.msra.mxu1 %v7546_v45  ;;  %5687 = vmatpush1.bf16.msra.mxu0 %v7549_v47  ;;  %v722_v45 = vadd.f32 %v8878_v2, %v149_v36  ;;  %v7594_v47 = vld [vmem:[#allocation8 + $0x630] ss:$24 sps:$4 sm:$0xff]   ;;  %v7611_v2 = vld [vmem:[#allocation8 + $0x1234] ss:$24 sps:$4 sm:$0xff]   ;;  %v7650_v36 = vld [vmem:[#allocation8 + $0x7e4] ss:$24 sps:$4 sm:$0xff]  }
 0x160   :  { %5528 = vmatprep.subr.bf16.mxu1 %v7554_v49  ;;  %5688 = vmatprep.subr.bf16.mxu0 %v7557_v51  ;;  %v805_v49 = vmax.f32 %v649_v41, 0.0  ;;  %v7602_v51 = vld [vmem:[#allocation8 + $0x664] ss:$24 sps:$4 sm:$0xff]   ;;  %v7651_v41 = vld [vmem:[#allocation8 + $0x1380] ss:$24 sps:$4 sm:$0xff]  }
 0x163   :  { %5529 = vmatpush1.bf16.msra.mxu1 %v7552_v52  ;;  %5689 = vmatpush1.bf16.msra.mxu0 %v7555_v54  ;;  %v7605_v52 = vld [vmem:[#allocation8 + $0x1204] ss:$24 sps:$4 sm:$0xff]   ;;  %v808_v54 = vmax.f32 %v722_v45, 0.0  ;;  %v7654_v45 = vld [vmem:[#allocation8 + $0x810] ss:$24 sps:$4 sm:$0xff]  }
 0x164   :  { %5530 = vmatprep.subr.bf16.mxu1 %v7560_v55  ;;  %5690 = vmatprep.subr.bf16.mxu0 %v7563_v56  ;;  %v7603_v55 = vld [vmem:[#allocation8 + $0x1200] ss:$24 sps:$4 sm:$0xff]   ;;  %v7608_v56 = vld [vmem:[#allocation8 + $0x694] ss:$24 sps:$4 sm:$0xff]  }
 0x167   :  { %5531 = vmatpush1.bf16.msra.mxu1 %v7558_v57  ;;  %5691 = vmatpush1.bf16.msra.mxu0 %v7561_v58  ;;  %v8917_v57 = vpack.c.bf16 %v805_v49, %v805_v49  ;;  %v8919_v58 = vpack.c.bf16 %v808_v54, %v808_v54  ;;  %v7657_v49 = vld [vmem:[#allocation8 + $0x13b0] ss:$24 sps:$4 sm:$0xff]   ;;  %v7663_v54 = vld [vmem:[#allocation8 + $0x13e0] ss:$24 sps:$4 sm:$0xff]  }
 0x168   :  { %5532 = vmatprep.subr.bf16.mxu1 %v7566_v60  ;;  %5692 = vmatprep.subr.bf16.mxu0 %v7569_v61  ;;  %v7606_v60 = vld [vmem:[#allocation8 + $0x690] ss:$24 sps:$4 sm:$0xff]  }
 0x169   :  { %v7609_v61 = vld [vmem:[#allocation8 + $0x1230] ss:$24 sps:$4 sm:$0xff]  }
 0x16b   :  { %5533 = vmatpush1.bf16.msra.mxu1 %v7564_v63  ;;  %5693 = vmatpush1.bf16.msra.mxu0 %v7567_v0  ;;  %v7614_v63 = vld [vmem:[#allocation8 + $0x6c4] ss:$24 sps:$4 sm:$0xff]   ;;  %v7612_v0 = vld [vmem:[#allocation8 + $0x6c0] ss:$24 sps:$4 sm:$0xff]  }
 0x16c   :  { %5534 = vmatprep.subr.bf16.mxu1 %v7572_v5  ;;  %5694 = vmatprep.subr.bf16.mxu0 %v7575_v6  ;;  %v7617_v5 = vld [vmem:[#allocation8 + $0x1264] ss:$24 sps:$4 sm:$0xff]   ;;  %v7615_v6 = vld [vmem:[#allocation8 + $0x1260] ss:$24 sps:$4 sm:$0xff]  }
 0x16f   :  { %5535 = vmatpush1.bf16.msra.mxu1 %v7570_v8  ;;  %5695 = vmatpush1.bf16.msra.mxu0 %v7573_v9  ;;  %v7620_v8 = vld [vmem:[#allocation8 + $0x6f4] ss:$24 sps:$4 sm:$0xff]   ;;  %v7618_v9 = vld [vmem:[#allocation8 + $0x6f0] ss:$24 sps:$4 sm:$0xff]  }
 0x170   :  { %5536 = vmatprep.subr.bf16.mxu1 %v7578_v12  ;;  %5696 = vmatprep.subr.bf16.mxu0 %v7581_v13  ;;  %v7621_v12 = vld [vmem:[#allocation8 + $0x1290] ss:$24 sps:$4 sm:$0xff]   ;;  %v7626_v13 = vld [vmem:[#allocation8 + $0x724] ss:$24 sps:$4 sm:$0xff]  }
 0x173   :  { %5537 = vmatpush1.bf16.msra.mxu1 %v7576_v15  ;;  %5697 = vmatpush1.bf16.msra.mxu0 %v7579_v16  ;;  %v7629_v15 = vld [vmem:[#allocation8 + $0x12c4] ss:$24 sps:$4 sm:$0xff]   ;;  %v7627_v16 = vld [vmem:[#allocation8 + $0x12c0] ss:$24 sps:$4 sm:$0xff]  }
 0x174   :  { %5538 = vmatprep.subr.bf16.mxu1 %v7584_v18  ;;  %5698 = vmatprep.subr.bf16.mxu0 %v7587_v19  ;;  %v7630_v18 = vld [vmem:[#allocation8 + $0x750] ss:$24 sps:$4 sm:$0xff]   ;;  %v7635_v19 = vld [vmem:[#allocation8 + $0x12f4] ss:$24 sps:$4 sm:$0xff]  }
 0x177   :  { %5539 = vmatpush1.bf16.msra.mxu1 %v7582_v25  ;;  %5699 = vmatpush1.bf16.msra.mxu0 %v7585_v27  ;;  %v7638_v25 = vld [vmem:[#allocation8 + $0x784] ss:$24 sps:$4 sm:$0xff]   ;;  %v7636_v27 = vld [vmem:[#allocation8 + $0x780] ss:$24 sps:$4 sm:$0xff]  }
 0x178   :  { %5549 = vmatprep.subr.bf16.mxu1 %v7590_v30  ;;  %5700 = vmatprep.subr.bf16.mxu0 %v7593_v35  ;;  %v7644_v30 = vld [vmem:[#allocation8 + $0x7b4] ss:$24 sps:$4 sm:$0xff]   ;;  %v7642_v35 = vld [vmem:[#allocation8 + $0x7b0] ss:$24 sps:$4 sm:$0xff]  }
 0x17a   :  { %5541 = vmatmul.mubr.bf16.vlgmr.msra.gmra.mrb[8].mxu1 %v8909_v38 }
 0x17b   :  { %5550 = vmatpush1.bf16.msra.mxu1 %v7588_v33  ;;  %5581 = vmatprep.mubr.bf16.mxu1 %v8912_v42  ;;  %v7645_v33 = vld [vmem:[#allocation8 + $0x1350] ss:$24 sps:$4 sm:$0xff]  }
 0x17c   :  { %5701 = vmatpush1.bf16.msra.mxu0 %v7591_v40  ;;  %5551 = vmatprep.subr.bf16.mxu1 %v7596_v39  ;;  %v7648_v40 = vld [vmem:[#allocation8 + $0x7e0] ss:$24 sps:$4 sm:$0xff]   ;;  %v7653_v39 = vld [vmem:[#allocation8 + $0x1384] ss:$24 sps:$4 sm:$0xff]  }
 0x17d   :  { %5702 = vmatprep.subr.bf16.mxu0 %v7599_v43  ;;  %v7656_v43 = vld [vmem:[#allocation8 + $0x814] ss:$24 sps:$4 sm:$0xff]  }
 0x17f   :  { %5552 = vmatpush1.bf16.msra.mxu1 %v7594_v47  ;;  %v7659_v47 = vld [vmem:[#allocation8 + $0x13b4] ss:$24 sps:$4 sm:$0xff]  }
 0x180   :  { %5703 = vmatpush1.bf16.msra.mxu0 %v7597_v29  ;;  %5553 = vmatprep.subr.bf16.mxu1 %v7602_v51  ;;  %v7662_v29 = vld [vmem:[#allocation8 + $0x844] ss:$24 sps:$4 sm:$0xff]   ;;  %v7660_v51 = vld [vmem:[#allocation8 + $0x840] ss:$24 sps:$4 sm:$0xff]  }
 0x181   :  { %5713 = vmatprep.subr.bf16.mxu0 %v7605_v52  ;;  %v8924_v52 = vsub.s32 4, %v8828_v21 }
 0x183   :  { %5705 = vmatmul.mubr.bf16.vlgmr.msra.gmra.mrb[8].mxu0 %v8917_v57  ;;  %5554 = vmatpush1.bf16.msra.mxu1 %v7600_v59  ;;  %v7665_v59 = vld [vmem:[#allocation8 + $0x13e4] ss:$24 sps:$4 sm:$0xff]  }
 0x184   :  { %5714 = vmatpush1.bf16.msra.mxu0 %v7603_v55  ;;  %5555 = vmatprep.subr.bf16.mxu1 %v7608_v56  ;;  %v7668_v55 = vld [vmem:[#allocation8 + $0x874] ss:$24 sps:$4 sm:$0xff]   ;;  %v124_v56 = vsub.s32 7, %v8828_v21 }
 0x185   :  { %5715 = vmatprep.subr.bf16.mxu0 %v7611_v2  ;;  %5745 = vmatprep.mubr.bf16.mxu0 %v8919_v58  ;;  %v7666_v2 = vld [vmem:[#allocation8 + $0x870] ss:$24 sps:$4 sm:$0xff]  }
 0x187   :  { %5556 = vmatpush1.bf16.msra.mxu1 %v7606_v60  ;;  %v7671_v60 = vld [vmem:[#allocation8 + $0x1414] ss:$24 sps:$4 sm:$0xff]  }
 0x188   :  { %5716 = vmatpush1.bf16.msra.mxu0 %v7609_v61  ;;  %5557 = vmatprep.subr.bf16.mxu1 %v7614_v63  ;;  %v8927_v61 = vld [vmem:[#allocation7] sm:$0xff] }
 0x189   :  { %5717 = vmatprep.subr.bf16.mxu0 %v7617_v5  ;;  %v113_v63 = vrot.slane %v8927_v61, %v8924_v52  ;;  %v7674_v5 = vld [vmem:[#allocation8 + $0x8a4] ss:$24 sps:$4 sm:$0xff]  }
 0x18b   :  { %5558 = vmatpush1.bf16.msra.mxu1 %v7612_v0  ;;  %v7669_v0 = vld [vmem:[#allocation8 + $0x1410] ss:$24 sps:$4 sm:$0xff]  }
 0x18c   :  { %5718 = vmatpush1.bf16.msra.mxu0 %v7615_v6  ;;  %5559 = vmatprep.subr.bf16.mxu1 %v7620_v8  ;;  %v125_v6 = vrot.slane %v8927_v61, %v124_v56  ;;  %v7672_v8 = vld [vmem:[#allocation8 + $0x8a0] ss:$24 sps:$4 sm:$0xff]  }
 0x18d   :  { %5719 = vmatprep.subr.bf16.mxu0 %v7623_v11  ;;  %v436_v11 = vadd.f32 %v8851_v37, %v113_v63  ;;  %v7686_v37 = vld [vmem:[#allocation8 + $0x904] ss:$24 sps:$4 sm:$0xff]  }
 0x18e   :  { %v7713_v63 = vld [vmem:[#allocation8 + $0x1564] ss:$24 sps:$4 sm:$0xff]  }
 0x18f   :  { %5560 = vmatpush1.bf16.msra.mxu1 %v7618_v9  ;;  %v7677_v9 = vld [vmem:[#allocation8 + $0x1444] ss:$24 sps:$4 sm:$0xff]  }
 0x190   :  { %5720 = vmatpush1.bf16.msra.mxu0 %v7621_v12  ;;  %5561 = vmatprep.subr.bf16.mxu1 %v7626_v13  ;;  %v7675_v12 = vld [vmem:[#allocation8 + $0x1440] ss:$24 sps:$4 sm:$0xff]   ;;  %v7680_v13 = vld [vmem:[#allocation8 + $0x8d4] ss:$24 sps:$4 sm:$0xff]  }
 0x191   :  { %5721 = vmatprep.subr.bf16.mxu0 %v7629_v15  ;;  %v7678_v15 = vld [vmem:[#allocation8 + $0x8d0] ss:$24 sps:$4 sm:$0xff]  }
 0x193   :  { %5562 = vmatpush1.bf16.msra.mxu1 %v7624_v14  ;;  %v509_v14 = vadd.f32 %v8866_v50, %v125_v6  ;;  %v7714_v6 = vld [vmem:[#allocation8 + $0x9f0] ss:$24 sps:$4 sm:$0xff]  }
 0x194   :  { %5722 = vmatpush1.bf16.msra.mxu0 %v7627_v16  ;;  %5563 = vmatprep.subr.bf16.mxu1 %v7632_v17  ;;  %v7683_v16 = vld [vmem:[#allocation8 + $0x1474] ss:$24 sps:$4 sm:$0xff]   ;;  %v8934_v17 = vld [vmem:[#allocation7 + $0x8] sm:$0xff] }
 0x195   :  { %5723 = vmatprep.subr.bf16.mxu0 %v7635_v19  ;;  %v799_v19 = vmax.f32 %v436_v11, 0.0  ;;  %v157_v50 = vrot.slane %v8934_v17, %v124_v56  ;;  %v7705_v56 = vld [vmem:[#allocation8 + $0x1530] ss:$24 sps:$4 sm:$0xff]   ;;  %v7722_v11 = vld [vmem:[#allocation8 + $0xa24] ss:$24 sps:$4 sm:$0xff]  }
 0x197   :  { %5564 = vmatpush1.bf16.msra.mxu1 %v7630_v18  ;;  %v145_v18 = vrot.slane %v8934_v17, %v8924_v52 }
 0x198   :  { %5724 = vmatpush1.bf16.msra.mxu0 %v7633_v20  ;;  %5565 = vmatprep.subr.bf16.mxu1 %v7638_v25  ;;  %v7681_v20 = vld [vmem:[#allocation8 + $0x1470] ss:$24 sps:$4 sm:$0xff]   ;;  %v802_v25 = vmax.f32 %v509_v14, 0.0  ;;  %v7723_v14 = vld [vmem:[#allocation8 + $0x15c0] ss:$24 sps:$4 sm:$0xff]  }
 0x199   :  { %5725 = vmatprep.subr.bf16.mxu0 %v7641_v28  ;;  %v7689_v28 = vld [vmem:[#allocation8 + $0x14a4] ss:$24 sps:$4 sm:$0xff]  }
 0x19b   :  { %5566 = vmatpush1.bf16.msra.mxu1 %v7636_v27  ;;  %v7684_v27 = vld [vmem:[#allocation8 + $0x900] ss:$24 sps:$4 sm:$0xff]  }
 0x19c   :  { %5726 = vmatpush1.bf16.msra.mxu0 %v7639_v22  ;;  %5567 = vmatprep.subr.bf16.mxu1 %v7644_v30  ;;  %v7687_v22 = vld [vmem:[#allocation8 + $0x14a0] ss:$24 sps:$4 sm:$0xff]   ;;  %v7692_v30 = vld [vmem:[#allocation8 + $0x934] ss:$24 sps:$4 sm:$0xff]  }
 0x19d   :  { %5727 = vmatprep.subr.bf16.mxu0 %v7647_v32  ;;  %v8940_v32 = vpack.c.bf16 %v799_v19, %v799_v19  ;;  %v7729_v19 = vld [vmem:[#allocation8 + $0x15f0] ss:$24 sps:$4 sm:$0xff]  }
 0x19f   :  { %5568 = vmatpush1.bf16.msra.mxu1 %v7642_v35  ;;  %v720_v35 = vadd.f32 %v8876_v62, %v145_v18  ;;  %v7693_v62 = vld [vmem:[#allocation8 + $0x14d0] ss:$24 sps:$4 sm:$0xff]  }
 0x1a0   :  { %5728 = vmatpush1.bf16.msra.mxu0 %v7645_v33  ;;  %5569 = vmatprep.subr.bf16.mxu1 %v7650_v36  ;;  %v8942_v33 = vpack.c.bf16 %v802_v25, %v802_v25  ;;  %v7695_v36 = vld [vmem:[#allocation8 + $0x14d4] ss:$24 sps:$4 sm:$0xff]   ;;  %v7726_v18 = vld [vmem:[#allocation8 + $0xa50] ss:$24 sps:$4 sm:$0xff]   ;;  %v7732_v25 = vld [vmem:[#allocation8 + $0xa80] ss:$24 sps:$4 sm:$0xff]  }
 0x1a1   :  { %5729 = vmatprep.subr.bf16.mxu0 %v7653_v39  ;;  %v7690_v39 = vld [vmem:[#allocation8 + $0x930] ss:$24 sps:$4 sm:$0xff]  }
 0x1a3   :  { %5570 = vmatpush1.bf16.msra.mxu1 %v7648_v40  ;;  %v793_v40 = vadd.f32 %v8891_v34, %v157_v50  ;;  %v7699_v34 = vld [vmem:[#allocation8 + $0x1500] ss:$24 sps:$4 sm:$0xff]   ;;  %v7743_v50 = vld [vmem:[#allocation8 + $0x1654] ss:$24 sps:$4 sm:$0xff]  }
 0x1a4   :  { %5730 = vmatpush1.bf16.msra.mxu0 %v7651_v41  ;;  %5571 = vmatprep.subr.bf16.mxu1 %v7656_v43  ;;  %v807_v41 = vmax.f32 %v720_v35, 0.0  ;;  %v7698_v43 = vld [vmem:[#allocation8 + $0x964] ss:$24 sps:$4 sm:$0xff]  }
 0x1a5   :  { %5731 = vmatprep.subr.bf16.mxu0 %v7659_v47  ;;  %v7701_v47 = vld [vmem:[#allocation8 + $0x1504] ss:$24 sps:$4 sm:$0xff]  }
 0x1a6   :  { %v7746_v35 = vld [vmem:[#allocation8 + $0xae4] ss:$24 sps:$4 sm:$0xff]  }
 0x1a7   :  { %5572 = vmatpush1.bf16.msra.mxu1 %v7654_v45  ;;  %v7696_v45 = vld [vmem:[#allocation8 + $0x960] ss:$24 sps:$4 sm:$0xff]  }
 0x1a8   :  { %5732 = vmatpush1.bf16.msra.mxu0 %v7657_v49  ;;  %5573 = vmatprep.subr.bf16.mxu1 %v7662_v29  ;;  %v810_v49 = vmax.f32 %v793_v40, 0.0  ;;  %v8947_v29 = vpack.c.bf16 %v807_v41, %v807_v41  ;;  %v7744_v40 = vld [vmem:[#allocation8 + $0xae0] ss:$24 sps:$4 sm:$0xff]   ;;  %v7752_v41 = vld [vmem:[#allocation8 + $0xb14] ss:$24 sps:$4 sm:$0xff]  }
 0x1a9   :  { %5733 = vmatprep.subr.bf16.mxu0 %v7665_v59  ;;  %v7707_v59 = vld [vmem:[#allocation8 + $0x1534] ss:$24 sps:$4 sm:$0xff]  }
 0x1ab   :  { %5574 = vmatpush1.bf16.msra.mxu1 %v7660_v51  ;;  %v7704_v51 = vld [vmem:[#allocation8 + $0x994] ss:$24 sps:$4 sm:$0xff]  }
 0x1ac   :  { %5734 = vmatpush1.bf16.msra.mxu0 %v7663_v54  ;;  %5575 = vmatprep.subr.bf16.mxu1 %v7668_v55  ;;  %v8949_v54 = vpack.c.bf16 %v810_v49, %v810_v49  ;;  %v7702_v55 = vld [vmem:[#allocation8 + $0x990] ss:$24 sps:$4 sm:$0xff]   ;;  %v7761_v49 = vld [vmem:[#allocation8 + $0x16e4] ss:$24 sps:$4 sm:$0xff]  }
 0x1ad   :  { %5735 = vmatprep.subr.bf16.mxu0 %v7671_v60  ;;  %v7708_v60 = vld [vmem:[#allocation8 + $0x9c0] ss:$24 sps:$4 sm:$0xff]  }
 0x1af   :  { %5576 = vmatpush1.bf16.msra.mxu1 %v7666_v2  ;;  %v7710_v2 = vld [vmem:[#allocation8 + $0x9c4] ss:$24 sps:$4 sm:$0xff]  }
 0x1b0   :  { %5736 = vmatpush1.bf16.msra.mxu0 %v7669_v0  ;;  %5577 = vmatprep.subr.bf16.mxu1 %v7674_v5  ;;  %v7711_v0 = vld [vmem:[#allocation8 + $0x1560] ss:$24 sps:$4 sm:$0xff]   ;;  %v7716_v5 = vld [vmem:[#allocation8 + $0x9f4] ss:$24 sps:$4 sm:$0xff]  }
 0x1b1   :  { %5737 = vmatprep.subr.bf16.mxu0 %v7677_v9  ;;  %v7717_v9 = vld [vmem:[#allocation8 + $0x1590] ss:$24 sps:$4 sm:$0xff]  }
 0x1b3   :  { %5578 = vmatpush1.bf16.msra.mxu1 %v7672_v8  ;;  %v7719_v8 = vld [vmem:[#allocation8 + $0x1594] ss:$24 sps:$4 sm:$0xff]  }
 0x1b4   :  { %5738 = vmatpush1.bf16.msra.mxu0 %v7675_v12  ;;  %5579 = vmatprep.subr.bf16.mxu1 %v7680_v13  ;;  %v7720_v12 = vld [vmem:[#allocation8 + $0xa20] ss:$24 sps:$4 sm:$0xff]   ;;  %v7725_v13 = vld [vmem:[#allocation8 + $0x15c4] ss:$24 sps:$4 sm:$0xff]  }
 0x1b5   :  { %5739 = vmatprep.subr.bf16.mxu0 %v7683_v16  ;;  %v7731_v16 = vld [vmem:[#allocation8 + $0x15f4] ss:$24 sps:$4 sm:$0xff]  }
 0x1b7   :  { %5580 = vmatpush1.bf16.msra.mxu1 %v7678_v15  ;;  %v7728_v15 = vld [vmem:[#allocation8 + $0xa54] ss:$24 sps:$4 sm:$0xff]  }
 0x1b8   :  { %5740 = vmatpush1.bf16.msra.mxu0 %v7681_v20  ;;  %5590 = vmatprep.subr.bf16.mxu1 %v7686_v37  ;;  %v7734_v20 = vld [vmem:[#allocation8 + $0xa84] ss:$24 sps:$4 sm:$0xff]  }
 0x1b9   :  { %5741 = vmatprep.subr.bf16.mxu0 %v7689_v28  ;;  %v7737_v37 = vld [vmem:[#allocation8 + $0x1624] ss:$24 sps:$4 sm:$0xff]   ;;  %v7740_v28 = vld [vmem:[#allocation8 + $0xab4] ss:$24 sps:$4 sm:$0xff]  }
 0x1ba   :  { %5582 = vmatmul.mubr.bf16.vlgmr.msra.gmra.mrb[8].mxu1 %v8940_v32 }
 0x1bb   :  { %5591 = vmatpush1.bf16.msra.mxu1 %v7684_v27  ;;  %5622 = vmatprep.mubr.bf16.mxu1 %v8942_v33  ;;  %v7735_v27 = vld [vmem:[#allocation8 + $0x1620] ss:$24 sps:$4 sm:$0xff]  }
 0x1bc   :  { %5742 = vmatpush1.bf16.msra.mxu0 %v7687_v22  ;;  %5592 = vmatprep.subr.bf16.mxu1 %v7692_v30  ;;  %v7738_v22 = vld [vmem:[#allocation8 + $0xab0] ss:$24 sps:$4 sm:$0xff]  }
 0x1bd   :  { %5743 = vmatprep.subr.bf16.mxu0 %v7695_v36  ;;  %v7741_v30 = vld [vmem:[#allocation8 + $0x1650] ss:$24 sps:$4 sm:$0xff]   ;;  %v7749_v36 = vld [vmem:[#allocation8 + $0x1684] ss:$24 sps:$4 sm:$0xff]  }
 0x1bf   :  { %5593 = vmatpush1.bf16.msra.mxu1 %v7690_v39  ;;  %v7747_v39 = vld [vmem:[#allocation8 + $0x1680] ss:$24 sps:$4 sm:$0xff]  }
 0x1c0   :  { %5744 = vmatpush1.bf16.msra.mxu0 %v7693_v62  ;;  %5594 = vmatprep.subr.bf16.mxu1 %v7698_v43  ;;  %v7755_v62 = vld [vmem:[#allocation8 + $0x16b4] ss:$24 sps:$4 sm:$0xff]   ;;  %v7750_v43 = vld [vmem:[#allocation8 + $0xb10] ss:$24 sps:$4 sm:$0xff]  }
 0x1c1   :  { %5754 = vmatprep.subr.bf16.mxu0 %v7701_v47  ;;  %v7758_v47 = vld [vmem:[#allocation8 + $0xb44] ss:$24 sps:$4 sm:$0xff]  }
 0x1c3   :  { %5746 = vmatmul.mubr.bf16.vlgmr.msra.gmra.mrb[8].mxu0 %v8947_v29  ;;  %5595 = vmatpush1.bf16.msra.mxu1 %v7696_v45  ;;  %v7753_v45 = vld [vmem:[#allocation8 + $0x16b0] ss:$24 sps:$4 sm:$0xff]  }
 0x1c4   :  { %5755 = vmatpush1.bf16.msra.mxu0 %v7699_v34  ;;  %5596 = vmatprep.subr.bf16.mxu1 %v7704_v51  ;;  %v7756_v34 = vld [vmem:[#allocation8 + $0xb40] ss:$24 sps:$4 sm:$0xff]   ;;  %v120_v51 = vsub.s32 6, %v8828_v21 }
 0x1c5   :  { %5756 = vmatprep.subr.bf16.mxu0 %v7707_v59  ;;  %5786 = vmatprep.mubr.bf16.mxu0 %v8949_v54  ;;  %v7759_v59 = vld [vmem:[#allocation8 + $0x16e0] ss:$24 sps:$4 sm:$0xff]  }
 0x1c7   :  { %5597 = vmatpush1.bf16.msra.mxu1 %v7702_v55  ;;  %v7764_v55 = vld [vmem:[#allocation8 + $0xb74] ss:$24 sps:$4 sm:$0xff]  }
 0x1c8   :  { %5757 = vmatpush1.bf16.msra.mxu0 %v7705_v56  ;;  %5598 = vmatprep.subr.bf16.mxu1 %v7710_v2  ;;  %v7767_v56 = vld [vmem:[#allocation8 + $0x1714] ss:$24 sps:$4 sm:$0xff]   ;;  %v7762_v2 = vld [vmem:[#allocation8 + $0xb70] ss:$24 sps:$4 sm:$0xff]  }
 0x1c9   :  { %5758 = vmatprep.subr.bf16.mxu0 %v7713_v63  ;;  %v7765_v63 = vld [vmem:[#allocation8 + $0x1710] ss:$24 sps:$4 sm:$0xff]  }
 0x1cb   :  { %5599 = vmatpush1.bf16.msra.mxu1 %v7708_v60  ;;  %v121_v60 = vrot.slane %v8927_v61, %v120_v51  ;;  %v7777_v61 = vld [vmem:[#allocation8 + $0x1770] ss:$24 sps:$4 sm:$0xff]  }
 0x1cc   :  { %5759 = vmatpush1.bf16.msra.mxu0 %v7711_v0  ;;  %5600 = vmatprep.subr.bf16.mxu1 %v7716_v5  ;;  %v7770_v0 = vld [vmem:[#allocation8 + $0xba4] ss:$24 sps:$4 sm:$0xff]  }
 0x1cd   :  { %5760 = vmatprep.subr.bf16.mxu0 %v7719_v8  ;;  %v7773_v5 = vld [vmem:[#allocation8 + $0x1744] ss:$24 sps:$4 sm:$0xff]   ;;  %v507_v8 = vadd.f32 %v8863_v48, %v121_v60  ;;  %v7819_v60 = vld [vmem:[#allocation8 + $0xd0] ss:$24 sps:$4 sm:$0xff]  }
 0x1cf   :  { %5601 = vmatpush1.bf16.msra.mxu1 %v7714_v6  ;;  %v7768_v6 = vld [vmem:[#allocation8 + $0xba0] ss:$24 sps:$4 sm:$0xff]  }
 0x1d0   :  { %5761 = vmatpush1.bf16.msra.mxu0 %v7717_v9  ;;  %5602 = vmatprep.subr.bf16.mxu1 %v7722_v11  ;;  %v7771_v9 = vld [vmem:[#allocation8 + $0x1740] ss:$24 sps:$4 sm:$0xff]   ;;  %v7776_v11 = vld [vmem:[#allocation8 + $0xbd4] ss:$24 sps:$4 sm:$0xff]  }
 0x1d1   :  { %5762 = vmatprep.subr.bf16.mxu0 %v7725_v13  ;;  %v7774_v13 = vld [vmem:[#allocation8 + $0xbd0] ss:$24 sps:$4 sm:$0xff]  }
 0x1d3   :  { %5603 = vmatpush1.bf16.msra.mxu1 %v7720_v12  ;;  %v7779_v12 = vld [vmem:[#allocation8 + $0x1774] ss:$24 sps:$4 sm:$0xff]  }
 0x1d4   :  { %5763 = vmatpush1.bf16.msra.mxu0 %v7723_v14  ;;  %5604 = vmatprep.subr.bf16.mxu1 %v7728_v15  ;;  %v801_v14 = vmax.f32 %v507_v8, 0.0  ;;  %v7785_v15 = vld [vmem:[#allocation8 + $0xc] ss:$24 sps:$4 sm:$0xff]  }
 0x1d5   :  { %5764 = vmatprep.subr.bf16.mxu0 %v7731_v16  ;;  %v153_v16 = vrot.slane %v8934_v17, %v120_v51  ;;  %v7789_v17 = vld [vmem:[#allocation8 + $0x38] ss:$24 sps:$4 sm:$0xff]   ;;  %v7815_v51 = vld [vmem:[#allocation8 + $0xa4] ss:$24 sps:$4 sm:$0xff]  }
 0x1d6   :  { %v8957_v48 = vpack.c.bf16 %v801_v14, %v801_v14  ;;  %v7830_v8 = vld [vmem:[#allocation8 + $0x18c] ss:$24 sps:$4 sm:$0xff]  }
 0x1d7   :  { %5605 = vmatpush1.bf16.msra.mxu1 %v7726_v18  ;;  %v7782_v18 = vld [vmem:[#allocation8 + $0x17a4] ss:$24 sps:$4 sm:$0xff]  }
 0x1d8   :  { %5765 = vmatpush1.bf16.msra.mxu0 %v7729_v19  ;;  %5606 = vmatprep.subr.bf16.mxu1 %v7734_v20  ;;  %v7783_v19 = vld [vmem:[#allocation8 + $0x8] ss:$24 sps:$4 sm:$0xff]   ;;  %v7839_v14 = vld [vmem:[#allocation8 + $0x164] ss:$24 sps:$4 sm:$0xff]  }
 0x1d9   :  { %5766 = vmatprep.subr.bf16.mxu0 %v7737_v37  ;;  %v7780_v20 = vld [vmem:[#allocation8 + $0x17a0] ss:$24 sps:$4 sm:$0xff]   ;;  %v7791_v37 = vld [vmem:[#allocation8 + $0x3c] ss:$24 sps:$4 sm:$0xff]  }
 0x1db   :  { %5607 = vmatpush1.bf16.msra.mxu1 %v7732_v25  ;;  %v791_v25 = vadd.f32 %v8889_v31, %v153_v16  ;;  %v7795_v31 = vld [vmem:[#allocation8 + $0x10] ss:$24 sps:$4 sm:$0xff]   ;;  %v7842_v16 = vld [vmem:[#allocation8 + $0x1ec] ss:$24 sps:$4 sm:$0xff]  }
 0x1dc   :  { %5767 = vmatpush1.bf16.msra.mxu0 %v7735_v27  ;;  %5608 = vmatprep.subr.bf16.mxu1 %v7740_v28  ;;  %v7788_v27 = vld [vmem:[#allocation8 + $0x17d4] ss:$24 sps:$4 sm:$0xff]   ;;  %v7786_v28 = vld [vmem:[#allocation8 + $0x17d0] ss:$24 sps:$4 sm:$0xff]  }
 0x1dd   :  { %5768 = vmatprep.subr.bf16.mxu0 %v7743_v50  ;;  %v7794_v50 = vld [vmem:[#allocation8 + $0x6c] ss:$24 sps:$4 sm:$0xff]  }
 0x1df   :  { %5609 = vmatpush1.bf16.msra.mxu1 %v7738_v22  ;;  %v809_v22 = vmax.f32 %v791_v25, 0.0  ;;  %v7851_v25 = vld [vmem:[#allocation8 + $0x1c4] ss:$24 sps:$4 sm:$0xff]  }
 0x1e0   :  { %5769 = vmatpush1.bf16.msra.mxu0 %v7741_v30  ;;  %5610 = vmatprep.subr.bf16.mxu1 %v7746_v35  ;;  %v7797_v30 = vld [vmem:[#allocation8 + $0x14] ss:$24 sps:$4 sm:$0xff]   ;;  %v7792_v35 = vld [vmem:[#allocation8 + $0x68] ss:$24 sps:$4 sm:$0xff]  }
 0x1e1   :  { %5770 = vmatprep.subr.bf16.mxu0 %v7749_v36  ;;  %v8962_v36 = vpack.c.bf16 %v809_v22, %v809_v22  ;;  %v7852_v22 = vld [vmem:[#allocation8 + $0x248] ss:$24 sps:$4 sm:$0xff]  }
 0x1e3   :  { %5611 = vmatpush1.bf16.msra.mxu1 %v7744_v40  ;;  %v7800_v40 = vld [vmem:[#allocation8 + $0x9c] ss:$24 sps:$4 sm:$0xff]  }
 0x1e4   :  { %5771 = vmatpush1.bf16.msra.mxu0 %v7747_v39  ;;  %5612 = vmatprep.subr.bf16.mxu1 %v7752_v41  ;;  %v7803_v39 = vld [vmem:[#allocation8 + $0x44] ss:$24 sps:$4 sm:$0xff]   ;;  %v7798_v41 = vld [vmem:[#allocation8 + $0x98] ss:$24 sps:$4 sm:$0xff]  }
 0x1e5   :  { %5772 = vmatprep.subr.bf16.mxu0 %v7755_v62  ;;  %v7801_v62 = vld [vmem:[#allocation8 + $0x40] ss:$24 sps:$4 sm:$0xff]  }
 0x1e7   :  { %5613 = vmatpush1.bf16.msra.mxu1 %v7750_v43  ;;  %v7806_v43 = vld [vmem:[#allocation8 + $0xcc] ss:$24 sps:$4 sm:$0xff]  }
 0x1e8   :  { %5773 = vmatpush1.bf16.msra.mxu0 %v7753_v45  ;;  %5614 = vmatprep.subr.bf16.mxu1 %v7758_v47  ;;  %v7809_v45 = vld [vmem:[#allocation8 + $0x74] ss:$24 sps:$4 sm:$0xff]   ;;  %v7804_v47 = vld [vmem:[#allocation8 + $0xc8] ss:$24 sps:$4 sm:$0xff]  }
 0x1e9   :  { %5774 = vmatprep.subr.bf16.mxu0 %v7761_v49  ;;  %v7807_v49 = vld [vmem:[#allocation8 + $0x70] ss:$24 sps:$4 sm:$0xff]  }
 0x1eb   :  { %5615 = vmatpush1.bf16.msra.mxu1 %v7756_v34  ;;  %v7812_v34 = vld [vmem:[#allocation8 + $0xfc] ss:$24 sps:$4 sm:$0xff]  }
 0x1ec   :  { %5775 = vmatpush1.bf16.msra.mxu0 %v7759_v59  ;;  %5616 = vmatprep.subr.bf16.mxu1 %v7764_v55  ;;  %v7810_v59 = vld [vmem:[#allocation8 + $0xf8] ss:$24 sps:$4 sm:$0xff]  }
 0x1ed   :  { %5776 = vmatprep.subr.bf16.mxu0 %v7767_v56  ;;  %v7813_v55 = vld [vmem:[#allocation8 + $0xa0] ss:$24 sps:$4 sm:$0xff]   ;;  %v7818_v56 = vld [vmem:[#allocation8 + $0x12c] ss:$24 sps:$4 sm:$0xff]  }
 0x1ef   :  { %5617 = vmatpush1.bf16.msra.mxu1 %v7762_v2  ;;  %v7816_v2 = vld [vmem:[#allocation8 + $0x128] ss:$24 sps:$4 sm:$0xff]  }
 0x1f0   :  { %5777 = vmatpush1.bf16.msra.mxu0 %v7765_v63  ;;  %5618 = vmatprep.subr.bf16.mxu1 %v7770_v0  ;;  %v7824_v63 = vld [vmem:[#allocation8 + $0x15c] ss:$24 sps:$4 sm:$0xff]  }
 0x1f1   :  { %5778 = vmatprep.subr.bf16.mxu0 %v7773_v5  ;;  %v7827_v0 = vld [vmem:[#allocation8 + $0x104] ss:$24 sps:$4 sm:$0xff]   ;;  %v7822_v5 = vld [vmem:[#allocation8 + $0x158] ss:$24 sps:$4 sm:$0xff]  }
 0x1f3   :  { %5619 = vmatpush1.bf16.msra.mxu1 %v7768_v6  ;;  %v7825_v6 = vld [vmem:[#allocation8 + $0x100] ss:$24 sps:$4 sm:$0xff]  }
 0x1f4   :  { %5779 = vmatpush1.bf16.msra.mxu0 %v7771_v9  ;;  %5620 = vmatprep.subr.bf16.mxu1 %v7776_v11  ;;  %v7833_v9 = vld [vmem:[#allocation8 + $0x134] ss:$24 sps:$4 sm:$0xff]   ;;  %v7828_v11 = vld [vmem:[#allocation8 + $0x188] ss:$24 sps:$4 sm:$0xff]  }
 0x1f5   :  { %5780 = vmatprep.subr.bf16.mxu0 %v7779_v12  ;;  %v7831_v12 = vld [vmem:[#allocation8 + $0x130] ss:$24 sps:$4 sm:$0xff]  }
 0x1f7   :  { %5621 = vmatpush1.bf16.msra.mxu1 %v7774_v13  ;;  %v7836_v13 = vld [vmem:[#allocation8 + $0x1bc] ss:$24 sps:$4 sm:$0xff]  }
 0x1f8   :  { %5781 = vmatpush1.bf16.msra.mxu0 %v7777_v61  ;;  %5795 = vmatprep.subr.bf16.mxu1 %v7785_v15  ;;  %v7834_v61 = vld [vmem:[#allocation8 + $0x1b8] ss:$24 sps:$4 sm:$0xff]  }
 0x1f9   :  { %5782 = vmatprep.subr.bf16.mxu0 %v7782_v18  ;;  %v7837_v15 = vld [vmem:[#allocation8 + $0x160] ss:$24 sps:$4 sm:$0xff]   ;;  %v7845_v18 = vld [vmem:[#allocation8 + $0x194] ss:$24 sps:$4 sm:$0xff]  }
 0x1fa   :  { %5623 = vmatmul.mubr.bf16.vlgmr.msra.gmra.mrb[8].mxu1 %v8957_v48 }
 0x1fb   :  { %5796 = vmatpush1.bf16.msra.mxu1 %v7783_v19  ;;  %5827 = vmatprep.mubr.bf16.mxu1 %v8857_v44  ;;  %v7840_v19 = vld [vmem:[#allocation8 + $0x1e8] ss:$24 sps:$4 sm:$0xff]  }
 0x1fc   :  { %5783 = vmatpush1.bf16.msra.mxu0 %v7780_v20  ;;  %5797 = vmatprep.subr.bf16.mxu1 %v7791_v37  ;;  %v7843_v20 = vld [vmem:[#allocation8 + $0x190] ss:$24 sps:$4 sm:$0xff]   ;;  %v7848_v37 = vld [vmem:[#allocation8 + $0x21c] ss:$24 sps:$4 sm:$0xff]  }
 0x1fd   :  { %5784 = vmatprep.subr.bf16.mxu0 %v7788_v27  ;;  %v7846_v27 = vld [vmem:[#allocation8 + $0x218] ss:$24 sps:$4 sm:$0xff]  }
 0x1ff   :  { %5798 = vmatpush1.bf16.msra.mxu1 %v7789_v17  ;;  %v7849_v17 = vld [vmem:[#allocation8 + $0x1c0] ss:$24 sps:$4 sm:$0xff]  }
 0x200   :  { %5785 = vmatpush1.bf16.msra.mxu0 %v7786_v28  ;;  %5799 = vmatprep.subr.bf16.mxu1 %v7794_v50  ;;  %v7854_v28 = vld [vmem:[#allocation8 + $0x24c] ss:$24 sps:$4 sm:$0xff]  }
 0x201   :  { %6123 = vmatprep.subr.bf16.mxu0 %v7797_v30  ;;  %v7857_v50 = vld [vmem:[#allocation8 + $0x1f4] ss:$24 sps:$4 sm:$0xff]   ;;  %v7855_v30 = vld [vmem:[#allocation8 + $0x1f0] ss:$24 sps:$4 sm:$0xff]  }
 0x203   :  { %5787 = vmatmul.mubr.bf16.vlgmr.msra.gmra.mrb[8].mxu0 %v8962_v36  ;;  %5800 = vmatpush1.bf16.msra.mxu1 %v7792_v35  ;;  %v7860_v35 = vld [vmem:[#allocation8 + $0x27c] ss:$24 sps:$4 sm:$0xff]  }
 0x204   :  { %6124 = vmatpush1.bf16.msra.mxu0 %v7795_v31  ;;  %6155 = vmatprep.mubr.bf16.mxu0 %v8857_v44  ;;  %v7821_v44 = vld [vmem:[#allocation8 + $0xd4] ss:$24 sps:$4 sm:$0xff]   ;;  %v7863_v31 = vld [vmem:[#allocation8 + $0x224] ss:$24 sps:$4 sm:$0xff]  }
 0x205   :  { %5801 = vmatprep.subr.bf16.mxu1 %v7800_v40  ;;  %6125 = vmatprep.subr.bf16.mxu0 %v7803_v39  ;;  %v7858_v40 = vld [vmem:[#allocation8 + $0x278] ss:$24 sps:$4 sm:$0xff]  }
 0x206   :  { %v7861_v39 = vld [vmem:[#allocation8 + $0x220] ss:$24 sps:$4 sm:$0xff]  }
 0x207   :  { %5802 = vmatpush1.bf16.msra.mxu1 %v7798_v41  ;;  %v7866_v41 = vld [vmem:[#allocation8 + $0x2ac] ss:$24 sps:$4 sm:$0xff]  }
 0x208   :  { %6126 = vmatpush1.bf16.msra.mxu0 %v7801_v62  ;;  %5803 = vmatprep.subr.bf16.mxu1 %v7806_v43  ;;  %v7869_v62 = vld [vmem:[#allocation8 + $0x254] ss:$24 sps:$4 sm:$0xff]   ;;  %v7864_v43 = vld [vmem:[#allocation8 + $0x2a8] ss:$24 sps:$4 sm:$0xff]  }
 0x209   :  { %6127 = vmatprep.subr.bf16.mxu0 %v7809_v45  ;;  %v7867_v45 = vld [vmem:[#allocation8 + $0x250] ss:$24 sps:$4 sm:$0xff]  }
 0x20b   :  { %5804 = vmatpush1.bf16.msra.mxu1 %v7804_v47  ;;  %v7872_v47 = vld [vmem:[#allocation8 + $0x2dc] ss:$24 sps:$4 sm:$0xff]  }
 0x20c   :  { %6128 = vmatpush1.bf16.msra.mxu0 %v7807_v49  ;;  %5805 = vmatprep.subr.bf16.mxu1 %v7812_v34  ;;  %v7875_v49 = vld [vmem:[#allocation8 + $0x284] ss:$24 sps:$4 sm:$0xff]   ;;  %v7870_v34 = vld [vmem:[#allocation8 + $0x2d8] ss:$24 sps:$4 sm:$0xff]  }
 0x20d   :  { %6129 = vmatprep.subr.bf16.mxu0 %v7815_v51  ;;  %v7873_v51 = vld [vmem:[#allocation8 + $0x280] ss:$24 sps:$4 sm:$0xff]  }
 0x20f   :  { %5806 = vmatpush1.bf16.msra.mxu1 %v7810_v59  ;;  %v7878_v59 = vld [vmem:[#allocation8 + $0x30c] ss:$24 sps:$4 sm:$0xff]  }
 0x210   :  { %6130 = vmatpush1.bf16.msra.mxu0 %v7813_v55  ;;  %5807 = vmatprep.subr.bf16.mxu1 %v7818_v56  ;;  %v7881_v55 = vld [vmem:[#allocation8 + $0x2b4] ss:$24 sps:$4 sm:$0xff]   ;;  %v7876_v56 = vld [vmem:[#allocation8 + $0x308] ss:$24 sps:$4 sm:$0xff]  }
 0x211   :  { %6131 = vmatprep.subr.bf16.mxu0 %v7821_v44  ;;  %v7879_v44 = vld [vmem:[#allocation8 + $0x2b0] ss:$24 sps:$4 sm:$0xff]  }
 0x213   :  { %5808 = vmatpush1.bf16.msra.mxu1 %v7816_v2  ;;  %v7884_v2 = vld [vmem:[#allocation8 + $0x33c] ss:$24 sps:$4 sm:$0xff]  }
 0x214   :  { %6132 = vmatpush1.bf16.msra.mxu0 %v7819_v60  ;;  %5809 = vmatprep.subr.bf16.mxu1 %v7824_v63  ;;  %v7887_v60 = vld [vmem:[#allocation8 + $0x2e4] ss:$24 sps:$4 sm:$0xff]   ;;  %v7882_v63 = vld [vmem:[#allocation8 + $0x338] ss:$24 sps:$4 sm:$0xff]  }
 0x215   :  { %6133 = vmatprep.subr.bf16.mxu0 %v7827_v0  ;;  %v7885_v0 = vld [vmem:[#allocation8 + $0x2e0] ss:$24 sps:$4 sm:$0xff]  }
 0x217   :  { %5810 = vmatpush1.bf16.msra.mxu1 %v7822_v5  ;;  %v7890_v5 = vld [vmem:[#allocation8 + $0x36c] ss:$24 sps:$4 sm:$0xff]  }
 0x218   :  { %6134 = vmatpush1.bf16.msra.mxu0 %v7825_v6  ;;  %5811 = vmatprep.subr.bf16.mxu1 %v7830_v8  ;;  %v7893_v6 = vld [vmem:[#allocation8 + $0x314] ss:$24 sps:$4 sm:$0xff]   ;;  %v7888_v8 = vld [vmem:[#allocation8 + $0x368] ss:$24 sps:$4 sm:$0xff]  }
 0x219   :  { %6135 = vmatprep.subr.bf16.mxu0 %v7833_v9  ;;  %v7891_v9 = vld [vmem:[#allocation8 + $0x310] ss:$24 sps:$4 sm:$0xff]  }
 0x21b   :  { %5812 = vmatpush1.bf16.msra.mxu1 %v7828_v11  ;;  %v7896_v11 = vld [vmem:[#allocation8 + $0x39c] ss:$24 sps:$4 sm:$0xff]  }
 0x21c   :  { %6136 = vmatpush1.bf16.msra.mxu0 %v7831_v12  ;;  %5813 = vmatprep.subr.bf16.mxu1 %v7836_v13  ;;  %v7899_v12 = vld [vmem:[#allocation8 + $0x344] ss:$24 sps:$4 sm:$0xff]   ;;  %v7894_v13 = vld [vmem:[#allocation8 + $0x398] ss:$24 sps:$4 sm:$0xff]  }
 0x21d   :  { %6137 = vmatprep.subr.bf16.mxu0 %v7839_v14  ;;  %v7897_v14 = vld [vmem:[#allocation8 + $0x340] ss:$24 sps:$4 sm:$0xff]  }
 0x21f   :  { %5814 = vmatpush1.bf16.msra.mxu1 %v7834_v61  ;;  %v7902_v61 = vld [vmem:[#allocation8 + $0x3cc] ss:$24 sps:$4 sm:$0xff]  }
 0x220   :  { %6138 = vmatpush1.bf16.msra.mxu0 %v7837_v15  ;;  %5815 = vmatprep.subr.bf16.mxu1 %v7842_v16  ;;  %v7905_v15 = vld [vmem:[#allocation8 + $0x374] ss:$24 sps:$4 sm:$0xff]   ;;  %v7900_v16 = vld [vmem:[#allocation8 + $0x3c8] ss:$24 sps:$4 sm:$0xff]  }
 0x221   :  { %6139 = vmatprep.subr.bf16.mxu0 %v7845_v18  ;;  %v7903_v18 = vld [vmem:[#allocation8 + $0x370] ss:$24 sps:$4 sm:$0xff]  }
 0x223   :  { %5816 = vmatpush1.bf16.msra.mxu1 %v7840_v19  ;;  %v7908_v19 = vld [vmem:[#allocation8 + $0x3fc] ss:$24 sps:$4 sm:$0xff]  }
 0x224   :  { %6140 = vmatpush1.bf16.msra.mxu0 %v7843_v20  ;;  %5817 = vmatprep.subr.bf16.mxu1 %v7848_v37  ;;  %v7911_v20 = vld [vmem:[#allocation8 + $0x3a4] ss:$24 sps:$4 sm:$0xff]   ;;  %v7909_v37 = vld [vmem:[#allocation8 + $0x3a0] ss:$24 sps:$4 sm:$0xff]  }
 0x225   :  { %6141 = vmatprep.subr.bf16.mxu0 %v7851_v25  ;;  %v7914_v25 = vld [vmem:[#allocation8 + $0x42c] ss:$24 sps:$4 sm:$0xff]  }
 0x227   :  { %5818 = vmatpush1.bf16.msra.mxu1 %v7846_v27  ;;  %v7912_v27 = vld [vmem:[#allocation8 + $0x428] ss:$24 sps:$4 sm:$0xff]  }
 0x228   :  { %6142 = vmatpush1.bf16.msra.mxu0 %v7849_v17  ;;  %5819 = vmatprep.subr.bf16.mxu1 %v7854_v28  ;;  %v7915_v17 = vld [vmem:[#allocation8 + $0x3d0] ss:$24 sps:$4 sm:$0xff]   ;;  %v7920_v28 = vld [vmem:[#allocation8 + $0x45c] ss:$24 sps:$4 sm:$0xff]  }
 0x229   :  { %6143 = vmatprep.subr.bf16.mxu0 %v7857_v50  ;;  %v7923_v50 = vld [vmem:[#allocation8 + $0x404] ss:$24 sps:$4 sm:$0xff]  }
 0x22b   :  { %5820 = vmatpush1.bf16.msra.mxu1 %v7852_v22  ;;  %v7918_v22 = vld [vmem:[#allocation8 + $0x458] ss:$24 sps:$4 sm:$0xff]  }
 0x22c   :  { %6144 = vmatpush1.bf16.msra.mxu0 %v7855_v30  ;;  %5821 = vmatprep.subr.bf16.mxu1 %v7860_v35  ;;  %v7921_v30 = vld [vmem:[#allocation8 + $0x400] ss:$24 sps:$4 sm:$0xff]   ;;  %v7926_v35 = vld [vmem:[#allocation8 + $0x48c] ss:$24 sps:$4 sm:$0xff]  }
 0x22d   :  { %6145 = vmatprep.subr.bf16.mxu0 %v7863_v31  ;;  %v7929_v31 = vld [vmem:[#allocation8 + $0x434] ss:$24 sps:$4 sm:$0xff]  }
 0x22f   :  { %5822 = vmatpush1.bf16.msra.mxu1 %v7858_v40  ;;  %v7924_v40 = vld [vmem:[#allocation8 + $0x488] ss:$24 sps:$4 sm:$0xff]  }
 0x230   :  { %6146 = vmatpush1.bf16.msra.mxu0 %v7861_v39  ;;  %5823 = vmatprep.subr.bf16.mxu1 %v7866_v41  ;;  %v7927_v39 = vld [vmem:[#allocation8 + $0x430] ss:$24 sps:$4 sm:$0xff]   ;;  %v7932_v41 = vld [vmem:[#allocation8 + $0x4bc] ss:$24 sps:$4 sm:$0xff]  }
 0x231   :  { %6147 = vmatprep.subr.bf16.mxu0 %v7869_v62  ;;  %v7935_v62 = vld [vmem:[#allocation8 + $0x464] ss:$24 sps:$4 sm:$0xff]  }
 0x233   :  { %5824 = vmatpush1.bf16.msra.mxu1 %v7864_v43  ;;  %v7930_v43 = vld [vmem:[#allocation8 + $0x4b8] ss:$24 sps:$4 sm:$0xff]  }
 0x234   :  { %6148 = vmatpush1.bf16.msra.mxu0 %v7867_v45  ;;  %5825 = vmatprep.subr.bf16.mxu1 %v7872_v47  ;;  %v7933_v45 = vld [vmem:[#allocation8 + $0x460] ss:$24 sps:$4 sm:$0xff]   ;;  %v7938_v47 = vld [vmem:[#allocation8 + $0x4ec] ss:$24 sps:$4 sm:$0xff]  }
 0x235   :  { %6149 = vmatprep.subr.bf16.mxu0 %v7875_v49  ;;  %v7941_v49 = vld [vmem:[#allocation8 + $0x494] ss:$24 sps:$4 sm:$0xff]  }
 0x237   :  { %5826 = vmatpush1.bf16.msra.mxu1 %v7870_v34  ;;  %v7936_v34 = vld [vmem:[#allocation8 + $0x4e8] ss:$24 sps:$4 sm:$0xff]  }
 0x238   :  { %6150 = vmatpush1.bf16.msra.mxu0 %v7873_v51  ;;  %5836 = vmatprep.subr.bf16.mxu1 %v7878_v59  ;;  %v7939_v51 = vld [vmem:[#allocation8 + $0x490] ss:$24 sps:$4 sm:$0xff]   ;;  %v7944_v59 = vld [vmem:[#allocation8 + $0x51c] ss:$24 sps:$4 sm:$0xff]  }
 0x239   :  { %6151 = vmatprep.subr.bf16.mxu0 %v7881_v55  ;;  %v7947_v55 = vld [vmem:[#allocation8 + $0x4c4] ss:$24 sps:$4 sm:$0xff]  }
 0x23a   :  { %5828 = vmatmul.mubr.bf16.vlgmr.msra.gmra.mrb[12].mxu1 %v8861_v46 }
 0x23b   :  { %5837 = vmatpush1.bf16.msra.mxu1 %v7876_v56  ;;  %5868 = vmatprep.mubr.bf16.mxu1 %v8869_v53  ;;  %v7942_v56 = vld [vmem:[#allocation8 + $0x518] ss:$24 sps:$4 sm:$0xff]  }
 0x23c   :  { %6152 = vmatpush1.bf16.msra.mxu0 %v7879_v44  ;;  %5838 = vmatprep.subr.bf16.mxu1 %v7884_v2  ;;  %v7945_v44 = vld [vmem:[#allocation8 + $0x4c0] ss:$24 sps:$4 sm:$0xff]   ;;  %v7950_v2 = vld [vmem:[#allocation8 + $0x54c] ss:$24 sps:$4 sm:$0xff]  }
 0x23d   :  { %6153 = vmatprep.subr.bf16.mxu0 %v7887_v60  ;;  %v7953_v60 = vld [vmem:[#allocation8 + $0x4f4] ss:$24 sps:$4 sm:$0xff]  }
 0x23f   :  { %5839 = vmatpush1.bf16.msra.mxu1 %v7882_v63  ;;  %v7948_v63 = vld [vmem:[#allocation8 + $0x548] ss:$24 sps:$4 sm:$0xff]  }
 0x240   :  { %6154 = vmatpush1.bf16.msra.mxu0 %v7885_v0  ;;  %5840 = vmatprep.subr.bf16.mxu1 %v7890_v5  ;;  %v7951_v0 = vld [vmem:[#allocation8 + $0x4f0] ss:$24 sps:$4 sm:$0xff]   ;;  %v7956_v5 = vld [vmem:[#allocation8 + $0x57c] ss:$24 sps:$4 sm:$0xff]  }
 0x241   :  { %6164 = vmatprep.subr.bf16.mxu0 %v7893_v6  ;;  %v7959_v6 = vld [vmem:[#allocation8 + $0x524] ss:$24 sps:$4 sm:$0xff]  }
 0x243   :  { %6156 = vmatmul.mubr.bf16.vlgmr.msra.gmra.mrb[12].mxu0 %v8861_v46  ;;  %5841 = vmatpush1.bf16.msra.mxu1 %v7888_v8  ;;  %v7906_v46 = vld [vmem:[#allocation8 + $0x3f8] ss:$24 sps:$4 sm:$0xff]  }
 0x244   :  { %6165 = vmatpush1.bf16.msra.mxu0 %v7891_v9  ;;  %6196 = vmatprep.mubr.bf16.mxu0 %v8869_v53  ;;  %v7917_v53 = vld [vmem:[#allocation8 + $0x3d4] ss:$24 sps:$4 sm:$0xff]   ;;  %v7954_v8 = vld [vmem:[#allocation8 + $0x578] ss:$24 sps:$4 sm:$0xff]  }
 0x245   :  { %5842 = vmatprep.subr.bf16.mxu1 %v7896_v11  ;;  %6166 = vmatprep.subr.bf16.mxu0 %v7899_v12  ;;  %v7957_v9 = vld [vmem:[#allocation8 + $0x520] ss:$24 sps:$4 sm:$0xff]   ;;  %v7962_v11 = vld [vmem:[#allocation8 + $0x5ac] ss:$24 sps:$4 sm:$0xff]  }
 0x246   :  { %v7965_v12 = vld [vmem:[#allocation8 + $0x554] ss:$24 sps:$4 sm:$0xff]  }
 0x247   :  { %5843 = vmatpush1.bf16.msra.mxu1 %v7894_v13  ;;  %v7960_v13 = vld [vmem:[#allocation8 + $0x5a8] ss:$24 sps:$4 sm:$0xff]  }
 0x248   :  { %6167 = vmatpush1.bf16.msra.mxu0 %v7897_v14  ;;  %5844 = vmatprep.subr.bf16.mxu1 %v7902_v61  ;;  %v7963_v14 = vld [vmem:[#allocation8 + $0x550] ss:$24 sps:$4 sm:$0xff]   ;;  %v7968_v61 = vld [vmem:[#allocation8 + $0x5dc] ss:$24 sps:$4 sm:$0xff]  }
 0x249   :  { %6168 = vmatprep.subr.bf16.mxu0 %v7905_v15  ;;  %v7971_v15 = vld [vmem:[#allocation8 + $0x584] ss:$24 sps:$4 sm:$0xff]  }
 0x24b   :  { %5845 = vmatpush1.bf16.msra.mxu1 %v7900_v16  ;;  %v7966_v16 = vld [vmem:[#allocation8 + $0x5d8] ss:$24 sps:$4 sm:$0xff]  }
 0x24c   :  { %6169 = vmatpush1.bf16.msra.mxu0 %v7903_v18  ;;  %5846 = vmatprep.subr.bf16.mxu1 %v7908_v19  ;;  %v7969_v18 = vld [vmem:[#allocation8 + $0x580] ss:$24 sps:$4 sm:$0xff]   ;;  %v7974_v19 = vld [vmem:[#allocation8 + $0x60c] ss:$24 sps:$4 sm:$0xff]  }
 0x24d   :  { %6170 = vmatprep.subr.bf16.mxu0 %v7911_v20  ;;  %v7977_v20 = vld [vmem:[#allocation8 + $0x5b4] ss:$24 sps:$4 sm:$0xff]  }
 0x24f   :  { %5847 = vmatpush1.bf16.msra.mxu1 %v7906_v46  ;;  %v7972_v46 = vld [vmem:[#allocation8 + $0x608] ss:$24 sps:$4 sm:$0xff]  }
 0x250   :  { %6171 = vmatpush1.bf16.msra.mxu0 %v7909_v37  ;;  %5848 = vmatprep.subr.bf16.mxu1 %v7914_v25  ;;  %v7975_v37 = vld [vmem:[#allocation8 + $0x5b0] ss:$24 sps:$4 sm:$0xff]   ;;  %v7980_v25 = vld [vmem:[#allocation8 + $0x63c] ss:$24 sps:$4 sm:$0xff]  }
 0x251   :  { %6172 = vmatprep.subr.bf16.mxu0 %v7917_v53  ;;  %v7983_v53 = vld [vmem:[#allocation8 + $0x5e4] ss:$24 sps:$4 sm:$0xff]  }
 0x253   :  { %5849 = vmatpush1.bf16.msra.mxu1 %v7912_v27  ;;  %v7978_v27 = vld [vmem:[#allocation8 + $0x638] ss:$24 sps:$4 sm:$0xff]  }
 0x254   :  { %6173 = vmatpush1.bf16.msra.mxu0 %v7915_v17  ;;  %5850 = vmatprep.subr.bf16.mxu1 %v7920_v28  ;;  %v7981_v17 = vld [vmem:[#allocation8 + $0x5e0] ss:$24 sps:$4 sm:$0xff]   ;;  %v7986_v28 = vld [vmem:[#allocation8 + $0x66c] ss:$24 sps:$4 sm:$0xff]  }
 0x255   :  { %6174 = vmatprep.subr.bf16.mxu0 %v7923_v50  ;;  %v7989_v50 = vld [vmem:[#allocation8 + $0x614] ss:$24 sps:$4 sm:$0xff]  }
 0x257   :  { %5851 = vmatpush1.bf16.msra.mxu1 %v7918_v22  ;;  %v7984_v22 = vld [vmem:[#allocation8 + $0x668] ss:$24 sps:$4 sm:$0xff]  }
 0x258   :  { %6175 = vmatpush1.bf16.msra.mxu0 %v7921_v30  ;;  %5852 = vmatprep.subr.bf16.mxu1 %v7926_v35  ;;  %v7987_v30 = vld [vmem:[#allocation8 + $0x610] ss:$24 sps:$4 sm:$0xff]   ;;  %v7992_v35 = vld [vmem:[#allocation8 + $0x69c] ss:$24 sps:$4 sm:$0xff]  }
 0x259   :  { %6176 = vmatprep.subr.bf16.mxu0 %v7929_v31  ;;  %v7995_v31 = vld [vmem:[#allocation8 + $0x644] ss:$24 sps:$4 sm:$0xff]  }
 0x25b   :  { %5853 = vmatpush1.bf16.msra.mxu1 %v7924_v40  ;;  %v7990_v40 = vld [vmem:[#allocation8 + $0x698] ss:$24 sps:$4 sm:$0xff]  }
 0x25c   :  { %6177 = vmatpush1.bf16.msra.mxu0 %v7927_v39  ;;  %5854 = vmatprep.subr.bf16.mxu1 %v7932_v41  ;;  %v7993_v39 = vld [vmem:[#allocation8 + $0x640] ss:$24 sps:$4 sm:$0xff]   ;;  %v7998_v41 = vld [vmem:[#allocation8 + $0x6cc] ss:$24 sps:$4 sm:$0xff]  }
 0x25d   :  { %6178 = vmatprep.subr.bf16.mxu0 %v7935_v62  ;;  %v8001_v62 = vld [vmem:[#allocation8 + $0x674] ss:$24 sps:$4 sm:$0xff]  }
 0x25f   :  { %5855 = vmatpush1.bf16.msra.mxu1 %v7930_v43  ;;  %v7996_v43 = vld [vmem:[#allocation8 + $0x6c8] ss:$24 sps:$4 sm:$0xff]  }
 0x260   :  { %6179 = vmatpush1.bf16.msra.mxu0 %v7933_v45  ;;  %5856 = vmatprep.subr.bf16.mxu1 %v7938_v47  ;;  %v7999_v45 = vld [vmem:[#allocation8 + $0x670] ss:$24 sps:$4 sm:$0xff]   ;;  %v8004_v47 = vld [vmem:[#allocation8 + $0x6fc] ss:$24 sps:$4 sm:$0xff]  }
 0x261   :  { %6180 = vmatprep.subr.bf16.mxu0 %v7941_v49  ;;  %v8007_v49 = vld [vmem:[#allocation8 + $0x6a4] ss:$24 sps:$4 sm:$0xff]  }
 0x263   :  { %5857 = vmatpush1.bf16.msra.mxu1 %v7936_v34  ;;  %v8005_v34 = vld [vmem:[#allocation8 + $0x6a0] ss:$24 sps:$4 sm:$0xff]  }
 0x264   :  { %6181 = vmatpush1.bf16.msra.mxu0 %v7939_v51  ;;  %5858 = vmatprep.subr.bf16.mxu1 %v7944_v59  ;;  %v8010_v51 = vld [vmem:[#allocation8 + $0x72c] ss:$24 sps:$4 sm:$0xff]   ;;  %v8008_v59 = vld [vmem:[#allocation8 + $0x728] ss:$24 sps:$4 sm:$0xff]  }
 0x265   :  { %6182 = vmatprep.subr.bf16.mxu0 %v7947_v55  ;;  %v8011_v55 = vld [vmem:[#allocation8 + $0x6d0] ss:$24 sps:$4 sm:$0xff]  }
 0x267   :  { %5859 = vmatpush1.bf16.msra.mxu1 %v7942_v56  ;;  %v8016_v56 = vld [vmem:[#allocation8 + $0x75c] ss:$24 sps:$4 sm:$0xff]  }
 0x268   :  { %6183 = vmatpush1.bf16.msra.mxu0 %v7945_v44  ;;  %5860 = vmatprep.subr.bf16.mxu1 %v7950_v2  ;;  %v8019_v44 = vld [vmem:[#allocation8 + $0x704] ss:$24 sps:$4 sm:$0xff]   ;;  %v8014_v2 = vld [vmem:[#allocation8 + $0x758] ss:$24 sps:$4 sm:$0xff]  }
 0x269   :  { %6184 = vmatprep.subr.bf16.mxu0 %v7953_v60  ;;  %v8017_v60 = vld [vmem:[#allocation8 + $0x700] ss:$24 sps:$4 sm:$0xff]  }
 0x26b   :  { %5861 = vmatpush1.bf16.msra.mxu1 %v7948_v63  ;;  %v8022_v63 = vld [vmem:[#allocation8 + $0x78c] ss:$24 sps:$4 sm:$0xff]  }
 0x26c   :  { %6185 = vmatpush1.bf16.msra.mxu0 %v7951_v0  ;;  %5862 = vmatprep.subr.bf16.mxu1 %v7956_v5  ;;  %v8025_v0 = vld [vmem:[#allocation8 + $0x734] ss:$24 sps:$4 sm:$0xff]   ;;  %v8020_v5 = vld [vmem:[#allocation8 + $0x788] ss:$24 sps:$4 sm:$0xff]  }
 0x26d   :  { %6186 = vmatprep.subr.bf16.mxu0 %v7959_v6  ;;  %v8023_v6 = vld [vmem:[#allocation8 + $0x730] ss:$24 sps:$4 sm:$0xff]  }
 0x26f   :  { %5863 = vmatpush1.bf16.msra.mxu1 %v7954_v8  ;;  %v8028_v8 = vld [vmem:[#allocation8 + $0x7bc] ss:$24 sps:$4 sm:$0xff]  }
 0x270   :  { %6187 = vmatpush1.bf16.msra.mxu0 %v7957_v9  ;;  %5864 = vmatprep.subr.bf16.mxu1 %v7962_v11  ;;  %v8031_v9 = vld [vmem:[#allocation8 + $0x764] ss:$24 sps:$4 sm:$0xff]   ;;  %v8026_v11 = vld [vmem:[#allocation8 + $0x7b8] ss:$24 sps:$4 sm:$0xff]  }
 0x271   :  { %6188 = vmatprep.subr.bf16.mxu0 %v7965_v12  ;;  %v8029_v12 = vld [vmem:[#allocation8 + $0x760] ss:$24 sps:$4 sm:$0xff]  }
 0x273   :  { %5865 = vmatpush1.bf16.msra.mxu1 %v7960_v13  ;;  %v8034_v13 = vld [vmem:[#allocation8 + $0x7ec] ss:$24 sps:$4 sm:$0xff]  }
 0x274   :  { %6189 = vmatpush1.bf16.msra.mxu0 %v7963_v14  ;;  %5866 = vmatprep.subr.bf16.mxu1 %v7968_v61  ;;  %v8037_v14 = vld [vmem:[#allocation8 + $0x794] ss:$24 sps:$4 sm:$0xff]   ;;  %v8032_v61 = vld [vmem:[#allocation8 + $0x7e8] ss:$24 sps:$4 sm:$0xff]  }
 0x275   :  { %6190 = vmatprep.subr.bf16.mxu0 %v7971_v15  ;;  %v8035_v15 = vld [vmem:[#allocation8 + $0x790] ss:$24 sps:$4 sm:$0xff]  }
 0x277   :  { %5867 = vmatpush1.bf16.msra.mxu1 %v7966_v16  ;;  %v8040_v16 = vld [vmem:[#allocation8 + $0x81c] ss:$24 sps:$4 sm:$0xff]  }
 0x278   :  { %6191 = vmatpush1.bf16.msra.mxu0 %v7969_v18  ;;  %5877 = vmatprep.subr.bf16.mxu1 %v7974_v19  ;;  %v8043_v18 = vld [vmem:[#allocation8 + $0x7c4] ss:$24 sps:$4 sm:$0xff]   ;;  %v8038_v19 = vld [vmem:[#allocation8 + $0x818] ss:$24 sps:$4 sm:$0xff]  }
 0x279   :  { %6192 = vmatprep.subr.bf16.mxu0 %v7977_v20  ;;  %v8041_v20 = vld [vmem:[#allocation8 + $0x7c0] ss:$24 sps:$4 sm:$0xff]  }
 0x27a   :  { %5869 = vmatmul.mubr.bf16.vlgmr.msra.gmra.mrb[12].mxu1 %v8909_v38 }
 0x27b   :  { %5878 = vmatpush1.bf16.msra.mxu1 %v7972_v46  ;;  %5909 = vmatprep.mubr.bf16.mxu1 %v8912_v42  ;;  %v8046_v46 = vld [vmem:[#allocation8 + $0x84c] ss:$24 sps:$4 sm:$0xff]  }
 0x27c   :  { %6193 = vmatpush1.bf16.msra.mxu0 %v7975_v37  ;;  %5879 = vmatprep.subr.bf16.mxu1 %v7980_v25  ;;  %v8049_v37 = vld [vmem:[#allocation8 + $0x7f4] ss:$24 sps:$4 sm:$0xff]   ;;  %v8044_v25 = vld [vmem:[#allocation8 + $0x848] ss:$24 sps:$4 sm:$0xff]  }
 0x27d   :  { %6194 = vmatprep.subr.bf16.mxu0 %v7983_v53  ;;  %v8047_v53 = vld [vmem:[#allocation8 + $0x7f0] ss:$24 sps:$4 sm:$0xff]  }
 0x27f   :  { %5880 = vmatpush1.bf16.msra.mxu1 %v7978_v27  ;;  %v8052_v27 = vld [vmem:[#allocation8 + $0x87c] ss:$24 sps:$4 sm:$0xff]  }
 0x280   :  { %6195 = vmatpush1.bf16.msra.mxu0 %v7981_v17  ;;  %5881 = vmatprep.subr.bf16.mxu1 %v7986_v28  ;;  %v8055_v17 = vld [vmem:[#allocation8 + $0x824] ss:$24 sps:$4 sm:$0xff]   ;;  %v8050_v28 = vld [vmem:[#allocation8 + $0x878] ss:$24 sps:$4 sm:$0xff]  }
 0x281   :  { %6205 = vmatprep.subr.bf16.mxu0 %v7989_v50  ;;  %v8053_v50 = vld [vmem:[#allocation8 + $0x820] ss:$24 sps:$4 sm:$0xff]  }
 0x283   :  { %6197 = vmatmul.mubr.bf16.vlgmr.msra.gmra.mrb[12].mxu0 %v8909_v38  ;;  %5882 = vmatpush1.bf16.msra.mxu1 %v7984_v22  ;;  %v8002_v38 = vld [vmem:[#allocation8 + $0x6f8] ss:$24 sps:$4 sm:$0xff]   ;;  %v8058_v22 = vld [vmem:[#allocation8 + $0x8ac] ss:$24 sps:$4 sm:$0xff]  }
 0x284   :  { %6206 = vmatpush1.bf16.msra.mxu0 %v7987_v30  ;;  %6237 = vmatprep.mubr.bf16.mxu0 %v8912_v42  ;;  %v8013_v42 = vld [vmem:[#allocation8 + $0x6d4] ss:$24 sps:$4 sm:$0xff]  }
 0x285   :  { %5883 = vmatprep.subr.bf16.mxu1 %v7992_v35  ;;  %6207 = vmatprep.subr.bf16.mxu0 %v7995_v31  ;;  %v8061_v30 = vld [vmem:[#allocation8 + $0x854] ss:$24 sps:$4 sm:$0xff]   ;;  %v8056_v35 = vld [vmem:[#allocation8 + $0x8a8] ss:$24 sps:$4 sm:$0xff]  }
 0x286   :  { %v8059_v31 = vld [vmem:[#allocation8 + $0x850] ss:$24 sps:$4 sm:$0xff]  }
 0x287   :  { %5884 = vmatpush1.bf16.msra.mxu1 %v7990_v40  ;;  %v8064_v40 = vld [vmem:[#allocation8 + $0x8dc] ss:$24 sps:$4 sm:$0xff]  }
 0x288   :  { %6208 = vmatpush1.bf16.msra.mxu0 %v7993_v39  ;;  %5885 = vmatprep.subr.bf16.mxu1 %v7998_v41  ;;  %v8067_v39 = vld [vmem:[#allocation8 + $0x884] ss:$24 sps:$4 sm:$0xff]   ;;  %v8062_v41 = vld [vmem:[#allocation8 + $0x8d8] ss:$24 sps:$4 sm:$0xff]  }
 0x289   :  { %6209 = vmatprep.subr.bf16.mxu0 %v8001_v62  ;;  %v8065_v62 = vld [vmem:[#allocation8 + $0x880] ss:$24 sps:$4 sm:$0xff]  }
 0x28b   :  { %5886 = vmatpush1.bf16.msra.mxu1 %v7996_v43  ;;  %v8070_v43 = vld [vmem:[#allocation8 + $0x90c] ss:$24 sps:$4 sm:$0xff]  }
 0x28c   :  { %6210 = vmatpush1.bf16.msra.mxu0 %v7999_v45  ;;  %5887 = vmatprep.subr.bf16.mxu1 %v8004_v47  ;;  %v8073_v45 = vld [vmem:[#allocation8 + $0x8b4] ss:$24 sps:$4 sm:$0xff]   ;;  %v8068_v47 = vld [vmem:[#allocation8 + $0x908] ss:$24 sps:$4 sm:$0xff]  }
 0x28d   :  { %6211 = vmatprep.subr.bf16.mxu0 %v8007_v49  ;;  %v8071_v49 = vld [vmem:[#allocation8 + $0x8b0] ss:$24 sps:$4 sm:$0xff]  }
 0x28f   :  { %5888 = vmatpush1.bf16.msra.mxu1 %v8002_v38  ;;  %v8076_v38 = vld [vmem:[#allocation8 + $0x93c] ss:$24 sps:$4 sm:$0xff]  }
 0x290   :  { %6212 = vmatpush1.bf16.msra.mxu0 %v8005_v34  ;;  %5889 = vmatprep.subr.bf16.mxu1 %v8010_v51  ;;  %v8079_v34 = vld [vmem:[#allocation8 + $0x8e4] ss:$24 sps:$4 sm:$0xff]   ;;  %v8074_v51 = vld [vmem:[#allocation8 + $0x938] ss:$24 sps:$4 sm:$0xff]  }
 0x291   :  { %6213 = vmatprep.subr.bf16.mxu0 %v8013_v42  ;;  %v8077_v42 = vld [vmem:[#allocation8 + $0x8e0] ss:$24 sps:$4 sm:$0xff]  }
 0x293   :  { %5890 = vmatpush1.bf16.msra.mxu1 %v8008_v59  ;;  %v8082_v59 = vld [vmem:[#allocation8 + $0x96c] ss:$24 sps:$4 sm:$0xff]  }
 0x294   :  { %6214 = vmatpush1.bf16.msra.mxu0 %v8011_v55  ;;  %5891 = vmatprep.subr.bf16.mxu1 %v8016_v56  ;;  %v8085_v55 = vld [vmem:[#allocation8 + $0x914] ss:$24 sps:$4 sm:$0xff]   ;;  %v8080_v56 = vld [vmem:[#allocation8 + $0x968] ss:$24 sps:$4 sm:$0xff]  }
 0x295   :  { %6215 = vmatprep.subr.bf16.mxu0 %v8019_v44  ;;  %v8083_v44 = vld [vmem:[#allocation8 + $0x910] ss:$24 sps:$4 sm:$0xff]  }
 0x297   :  { %5892 = vmatpush1.bf16.msra.mxu1 %v8014_v2  ;;  %v8088_v2 = vld [vmem:[#allocation8 + $0x99c] ss:$24 sps:$4 sm:$0xff]  }
 0x298   :  { %6216 = vmatpush1.bf16.msra.mxu0 %v8017_v60  ;;  %5893 = vmatprep.subr.bf16.mxu1 %v8022_v63  ;;  %v8091_v60 = vld [vmem:[#allocation8 + $0x944] ss:$24 sps:$4 sm:$0xff]   ;;  %v8086_v63 = vld [vmem:[#allocation8 + $0x998] ss:$24 sps:$4 sm:$0xff]  }
 0x299   :  { %6217 = vmatprep.subr.bf16.mxu0 %v8025_v0  ;;  %v8089_v0 = vld [vmem:[#allocation8 + $0x940] ss:$24 sps:$4 sm:$0xff]  }
 0x29b   :  { %5894 = vmatpush1.bf16.msra.mxu1 %v8020_v5  ;;  %v8094_v5 = vld [vmem:[#allocation8 + $0x9cc] ss:$24 sps:$4 sm:$0xff]  }
 0x29c   :  { %6218 = vmatpush1.bf16.msra.mxu0 %v8023_v6  ;;  %5895 = vmatprep.subr.bf16.mxu1 %v8028_v8  ;;  %v8097_v6 = vld [vmem:[#allocation8 + $0x974] ss:$24 sps:$4 sm:$0xff]   ;;  %v8092_v8 = vld [vmem:[#allocation8 + $0x9c8] ss:$24 sps:$4 sm:$0xff]  }
 0x29d   :  { %6219 = vmatprep.subr.bf16.mxu0 %v8031_v9  ;;  %v8095_v9 = vld [vmem:[#allocation8 + $0x970] ss:$24 sps:$4 sm:$0xff]  }
 0x29f   :  { %5896 = vmatpush1.bf16.msra.mxu1 %v8026_v11  ;;  %v8100_v11 = vld [vmem:[#allocation8 + $0x9fc] ss:$24 sps:$4 sm:$0xff]  }
 0x2a0   :  { %6220 = vmatpush1.bf16.msra.mxu0 %v8029_v12  ;;  %5897 = vmatprep.subr.bf16.mxu1 %v8034_v13  ;;  %v8103_v12 = vld [vmem:[#allocation8 + $0x9a4] ss:$24 sps:$4 sm:$0xff]   ;;  %v8101_v13 = vld [vmem:[#allocation8 + $0x9a0] ss:$24 sps:$4 sm:$0xff]  }
 0x2a1   :  { %6221 = vmatprep.subr.bf16.mxu0 %v8037_v14  ;;  %v8106_v14 = vld [vmem:[#allocation8 + $0xa2c] ss:$24 sps:$4 sm:$0xff]  }
 0x2a3   :  { %5898 = vmatpush1.bf16.msra.mxu1 %v8032_v61  ;;  %v8109_v61 = vld [vmem:[#allocation8 + $0x9d4] ss:$24 sps:$4 sm:$0xff]  }
 0x2a4   :  { %6222 = vmatpush1.bf16.msra.mxu0 %v8035_v15  ;;  %5899 = vmatprep.subr.bf16.mxu1 %v8040_v16  ;;  %v1595_v15 = vld [vmem:[#allocation10] sm:$0x3f] }
 0x2a5   :  { %6223 = vmatprep.subr.bf16.mxu0 %v8043_v18 }
 0x2a7   :  { %5900 = vmatpush1.bf16.msra.mxu1 %v8038_v19  ;;  %v8104_v19 = vld [vmem:[#allocation8 + $0xa28] ss:$24 sps:$4 sm:$0xff]  }
 0x2a8   :  { %6224 = vmatpush1.bf16.msra.mxu0 %v8041_v20  ;;  %5901 = vmatprep.subr.bf16.mxu1 %v8046_v46  ;;  %v8107_v46 = vld [vmem:[#allocation8 + $0x9d0] ss:$24 sps:$4 sm:$0xff]  }
 0x2a9   :  { %6225 = vmatprep.subr.bf16.mxu0 %v8049_v37  ;;  %v8112_v37 = vld [vmem:[#allocation8 + $0xa5c] ss:$24 sps:$4 sm:$0xff]  }
 0x2ab   :  { %5902 = vmatpush1.bf16.msra.mxu1 %v8044_v25  ;;  %v1600_v25 = vrot.slane %v1595_v15, %v8833_v23  ;;  %v8116_v23 = vld [vmem:[#allocation8 + $0xa88] ss:$24 sps:$4 sm:$0xff]  }
 0x2ac   :  { %6226 = vmatpush1.bf16.msra.mxu0 %v8047_v53  ;;  %5903 = vmatprep.subr.bf16.mxu1 %v8052_v27  ;;  %v8115_v53 = vld [vmem:[#allocation8 + $0xa04] ss:$24 sps:$4 sm:$0xff]   ;;  %v1604_v27 = vrot.slane %v1595_v15, %v8836_v24  ;;  %v8119_v24 = vld [vmem:[#allocation8 + $0xa30] ss:$24 sps:$4 sm:$0xff]  }
 0x2ad   :  { %6227 = vmatprep.subr.bf16.mxu0 %v8055_v17  ;;  %v8110_v17 = vld [vmem:[#allocation8 + $0xa58] ss:$24 sps:$4 sm:$0xff]   ;;  %v8163_v15 = vld [vmem:[#allocation8 + $0xb84] ss:$24 sps:$4 sm:$0xff]  }
 0x2af   :  { %5904 = vmatpush1.bf16.msra.mxu1 %v8050_v28  ;;  %v8113_v28 = vld [vmem:[#allocation8 + $0xa00] ss:$24 sps:$4 sm:$0xff]  }
 0x2b0   :  { %6228 = vmatpush1.bf16.msra.mxu0 %v8053_v50  ;;  %5905 = vmatprep.subr.bf16.mxu1 %v8058_v22  ;;  %v8118_v50 = vld [vmem:[#allocation8 + $0xa8c] ss:$24 sps:$4 sm:$0xff]  }
 0x2b1   :  { %6229 = vmatprep.subr.bf16.mxu0 %v8061_v30  ;;  %v8121_v30 = vld [vmem:[#allocation8 + $0xa34] ss:$24 sps:$4 sm:$0xff]  }
 0x2b3   :  { %5906 = vmatpush1.bf16.msra.mxu1 %v8056_v35 }
 0x2b4   :  { %6230 = vmatpush1.bf16.msra.mxu0 %v8059_v31  ;;  %5907 = vmatprep.subr.bf16.mxu1 %v8064_v40 }
 0x2b5   :  { %6231 = vmatprep.subr.bf16.mxu0 %v8067_v39 }
 0x2b7   :  { %5908 = vmatpush1.bf16.msra.mxu1 %v8062_v41 }
 0x2b8   :  { %6232 = vmatpush1.bf16.msra.mxu0 %v8065_v62  ;;  %5918 = vmatprep.subr.bf16.mxu1 %v8070_v43  ;;  %v8124_v43 = vld [vmem:[#allocation8 + $0xabc] ss:$24 sps:$4 sm:$0xff]  }
 0x2b9   :  { %6233 = vmatprep.subr.bf16.mxu0 %v8073_v45 }
 0x2ba   :  { %5910 = vmatmul.mubr.bf16.vlgmr.msra.gmra.mrb[12].mxu1 %v8940_v32 }
 0x2bb   :  { %5919 = vmatpush1.bf16.msra.mxu1 %v8068_v47  ;;  %5950 = vmatprep.mubr.bf16.mxu1 %v8942_v33  ;;  %v8127_v47 = vld [vmem:[#allocation8 + $0xa64] ss:$24 sps:$4 sm:$0xff]  }
 0x2bc   :  { %6234 = vmatpush1.bf16.msra.mxu0 %v8071_v49  ;;  %5920 = vmatprep.subr.bf16.mxu1 %v8076_v38  ;;  %v8122_v38 = vld [vmem:[#allocation8 + $0xab8] ss:$24 sps:$4 sm:$0xff]  }
 0x2bd   :  { %6235 = vmatprep.subr.bf16.mxu0 %v8079_v34  ;;  %v8125_v34 = vld [vmem:[#allocation8 + $0xa60] ss:$24 sps:$4 sm:$0xff]  }
 0x2bf   :  { %5921 = vmatpush1.bf16.msra.mxu1 %v8074_v51  ;;  %v8130_v51 = vld [vmem:[#allocation8 + $0xaec] ss:$24 sps:$4 sm:$0xff]  }
 0x2c0   :  { %6236 = vmatpush1.bf16.msra.mxu0 %v8077_v42  ;;  %5922 = vmatprep.subr.bf16.mxu1 %v8082_v59  ;;  %v8133_v42 = vld [vmem:[#allocation8 + $0xa94] ss:$24 sps:$4 sm:$0xff]   ;;  %v8128_v59 = vld [vmem:[#allocation8 + $0xae8] ss:$24 sps:$4 sm:$0xff]  }
 0x2c1   :  { %6246 = vmatprep.subr.bf16.mxu0 %v8085_v55  ;;  %v8131_v55 = vld [vmem:[#allocation8 + $0xa90] ss:$24 sps:$4 sm:$0xff]  }
 0x2c3   :  { %6238 = vmatmul.mubr.bf16.vlgmr.msra.gmra.mrb[12].mxu0 %v8940_v32  ;;  %5923 = vmatpush1.bf16.msra.mxu1 %v8080_v56  ;;  %v8098_v32 = vld [vmem:[#allocation8 + $0x9f8] ss:$24 sps:$4 sm:$0xff]   ;;  %v8136_v56 = vld [vmem:[#allocation8 + $0xb1c] ss:$24 sps:$4 sm:$0xff]  }
 0x2c4   :  { %6247 = vmatpush1.bf16.msra.mxu0 %v8083_v44  ;;  %6278 = vmatprep.mubr.bf16.mxu0 %v8942_v33  ;;  %v8139_v44 = vld [vmem:[#allocation8 + $0xac4] ss:$24 sps:$4 sm:$0xff]  }
 0x2c5   :  { %5924 = vmatprep.subr.bf16.mxu1 %v8088_v2  ;;  %6248 = vmatprep.subr.bf16.mxu0 %v8091_v60  ;;  %v8134_v2 = vld [vmem:[#allocation8 + $0xb18] ss:$24 sps:$4 sm:$0xff]  }
 0x2c6   :  { %v8137_v60 = vld [vmem:[#allocation8 + $0xac0] ss:$24 sps:$4 sm:$0xff]  }
 0x2c7   :  { %5925 = vmatpush1.bf16.msra.mxu1 %v8086_v63  ;;  %v8142_v63 = vld [vmem:[#allocation8 + $0xb4c] ss:$24 sps:$4 sm:$0xff]  }
 0x2c8   :  { %6249 = vmatpush1.bf16.msra.mxu0 %v8089_v0  ;;  %5926 = vmatprep.subr.bf16.mxu1 %v8094_v5  ;;  %v8145_v0 = vld [vmem:[#allocation8 + $0xaf4] ss:$24 sps:$4 sm:$0xff]   ;;  %v8140_v5 = vld [vmem:[#allocation8 + $0xb48] ss:$24 sps:$4 sm:$0xff]  }
 0x2c9   :  { %6250 = vmatprep.subr.bf16.mxu0 %v8097_v6  ;;  %v8143_v6 = vld [vmem:[#allocation8 + $0xaf0] ss:$24 sps:$4 sm:$0xff]  }
 0x2cb   :  { %5927 = vmatpush1.bf16.msra.mxu1 %v8092_v8  ;;  %v8148_v8 = vld [vmem:[#allocation8 + $0xb7c] ss:$24 sps:$4 sm:$0xff]  }
 0x2cc   :  { %6251 = vmatpush1.bf16.msra.mxu0 %v8095_v9  ;;  %5928 = vmatprep.subr.bf16.mxu1 %v8100_v11  ;;  %v8151_v9 = vld [vmem:[#allocation8 + $0xb24] ss:$24 sps:$4 sm:$0xff]   ;;  %v8146_v11 = vld [vmem:[#allocation8 + $0xb78] ss:$24 sps:$4 sm:$0xff]  }
 0x2cd   :  { %v5624_v33 = vpop.f32.mrb[8].mxu1  ;;  %6252 = vmatprep.subr.bf16.mxu0 %v8103_v12  ;;  %v8149_v12 = vld [vmem:[#allocation8 + $0xb20] ss:$24 sps:$4 sm:$0xff]  }
 0x2ce   :  { %v5626_v16 = vpop.f32.mrb[9].mxu1  ;;  %v7296_v22 = vadd.f32 %v5624_v33, %v1600_v25  ;;  %v8155_v33 = vld [vmem:[#allocation8 + $0xb50] ss:$24 sps:$4 sm:$0xff]   ;;  %v8172_v25 = vld [vmem:[#allocation8 + $0xc3c] ss:$24 sps:$4 sm:$0xff]  }
 0x2cf   :  { %v5628_v18 = vpop.f32.mrb[10].mxu1  ;;  %5929 = vmatpush1.bf16.msra.mxu1 %v8098_v32  ;;  %v7298_v35 = vadd.f32 %v5626_v16, %v1604_v27  ;;  %v8154_v32 = vld [vmem:[#allocation8 + $0xbac] ss:$24 sps:$4 sm:$0xff]   ;;  %v8158_v16 = vld [vmem:[#allocation8 + $0xbd8] ss:$24 sps:$4 sm:$0xff]  }
 0x2d0   :  { %6253 = vmatpush1.bf16.msra.mxu0 %v8101_v13  ;;  %v5629_v20 = vpop.f32.mrb[11].mxu1  ;;  %5930 = vmatprep.subr.bf16.mxu1 %v8106_v14  ;;  %v8157_v13 = vld [vmem:[#allocation8 + $0xb54] ss:$24 sps:$4 sm:$0xff]   ;;  %v8152_v14 = vld [vmem:[#allocation8 + $0xba8] ss:$24 sps:$4 sm:$0xff]  }
 0x2d1   :  { %6254 = vmatprep.subr.bf16.mxu0 %v8109_v61  ;;  %v8160_v61 = vld [vmem:[#allocation8 + $0xbdc] ss:$24 sps:$4 sm:$0xff]   ;;  %v8161_v18 = vld [vmem:[#allocation8 + $0xb80] ss:$24 sps:$4 sm:$0xff]  }
 0x2d2   :  { %v8169_v20 = vld [vmem:[#allocation8 + $0xbb4] ss:$24 sps:$4 sm:$0xff]   ;;  %v8170_v27 = vld [vmem:[#allocation8 + $0xc38] ss:$24 sps:$4 sm:$0xff]  }
 0x2d3   :  { %5931 = vmatpush1.bf16.msra.mxu1 %v8104_v19  ;;  %v8166_v19 = vld [vmem:[#allocation8 + $0xc0c] ss:$24 sps:$4 sm:$0xff]  }
 0x2d4   :  { %6255 = vmatpush1.bf16.msra.mxu0 %v8107_v46  ;;  %5932 = vmatprep.subr.bf16.mxu1 %v8112_v37  ;;  %v8164_v46 = vld [vmem:[#allocation8 + $0xc08] ss:$24 sps:$4 sm:$0xff]  }
 0x2d5   :  { %6256 = vmatprep.subr.bf16.mxu0 %v8115_v53  ;;  %v8167_v37 = vld [vmem:[#allocation8 + $0xbb0] ss:$24 sps:$4 sm:$0xff]   ;;  %v8175_v53 = vld [vmem:[#allocation8 + $0xbe4] ss:$24 sps:$4 sm:$0xff]  }
 0x2d6   :  { %v5788_v31 = vpop.f32.mrb[8].mxu0 }
 0x2d7   :  { %v8980_v40 = vadd.f32 %v7296_v22, %v5788_v31  ;;  %v5790_v39 = vpop.f32.mrb[9].mxu0  ;;  %5933 = vmatpush1.bf16.msra.mxu1 %v8110_v17  ;;  %v8173_v17 = vld [vmem:[#allocation8 + $0xbe0] ss:$24 sps:$4 sm:$0xff]   ;;  %v8187_v31 = vld [vmem:[#allocation8 + $0xc44] ss:$24 sps:$4 sm:$0xff]  }
 0x2d8   :  { %v8982_v41 = vadd.f32 %v7298_v35, %v5790_v39  ;;  %v5792_v62 = vpop.f32.mrb[10].mxu0  ;;  %6257 = vmatpush1.bf16.msra.mxu0 %v8113_v28  ;;  %5934 = vmatprep.subr.bf16.mxu1 %v8118_v50  ;;  %v8178_v28 = vld [vmem:[#allocation8 + $0xc6c] ss:$24 sps:$4 sm:$0xff]   ;;  %v8176_v22 = vld [vmem:[#allocation8 + $0xc68] ss:$24 sps:$4 sm:$0xff]  }
 0x2d9   :  { %v5793_v45 = vpop.f32.mrb[11].mxu0  ;;  %6258 = vmatprep.subr.bf16.mxu0 %v8121_v30  ;;  %v8181_v50 = vld [vmem:[#allocation8 + $0xc14] ss:$24 sps:$4 sm:$0xff]   ;;  %v8179_v30 = vld [vmem:[#allocation8 + $0xc10] ss:$24 sps:$4 sm:$0xff]  }
 0x2da   :  { %v6457_v49 = vcombine.low %v8980_v40, %v8982_v41  ;;  %v8184_v35 = vld [vmem:[#allocation8 + $0xc9c] ss:$24 sps:$4 sm:$0xff]   ;;  %v8182_v39 = vld [vmem:[#allocation8 + $0xc98] ss:$24 sps:$4 sm:$0xff]   ;;  %v8190_v62 = vld [vmem:[#allocation8 + $0xccc] ss:$24 sps:$4 sm:$0xff]  }
 0x2db   :  { %5935 = vmatpush1.bf16.msra.mxu1 %v8116_v23  ;;  %v8185_v23 = vld [vmem:[#allocation8 + $0xc40] ss:$24 sps:$4 sm:$0xff]   ;;  %v8191_v45 = vld [vmem:[#allocation8 + $0xc70] ss:$24 sps:$4 sm:$0xff]  }
 0x2dc   :  { %6259 = vmatpush1.bf16.msra.mxu0 %v8119_v24  ;;  %5936 = vmatprep.subr.bf16.mxu1 %v8124_v43  ;;  %v8193_v24 = vld [vmem:[#allocation8 + $0xc74] ss:$24 sps:$4 sm:$0xff]   ;;  %v8188_v43 = vld [vmem:[#allocation8 + $0xcc8] ss:$24 sps:$4 sm:$0xff]  }
 0x2dd   :  { %6260 = vmatprep.subr.bf16.mxu0 %v8127_v47  ;;  %v8196_v47 = vld [vmem:[#allocation8 + $0xcfc] ss:$24 sps:$4 sm:$0xff]  }
 0x2df   :  { %5937 = vmatpush1.bf16.msra.mxu1 %v8122_v38  ;;  %v8199_v38 = vld [vmem:[#allocation8 + $0xca4] ss:$24 sps:$4 sm:$0xff]  }
 0x2e0   :  { %6261 = vmatpush1.bf16.msra.mxu0 %v8125_v34  ;;  %5938 = vmatprep.subr.bf16.mxu1 %v8130_v51  ;;  %v8197_v34 = vld [vmem:[#allocation8 + $0xca0] ss:$24 sps:$4 sm:$0xff]   ;;  %v8202_v51 = vld [vmem:[#allocation8 + $0xd2c] ss:$24 sps:$4 sm:$0xff]  }
 0x2e1   :  { %6262 = vmatprep.subr.bf16.mxu0 %v8133_v42  ;;  %v8200_v42 = vld [vmem:[#allocation8 + $0xd28] ss:$24 sps:$4 sm:$0xff]  }
 0x2e3   :  { %5939 = vmatpush1.bf16.msra.mxu1 %v8128_v59  ;;  %v8203_v59 = vld [vmem:[#allocation8 + $0xcd0] ss:$24 sps:$4 sm:$0xff]  }
 0x2e4   :  { %6263 = vmatpush1.bf16.msra.mxu0 %v8131_v55  ;;  %5940 = vmatprep.subr.bf16.mxu1 %v8136_v56  ;;  %v8208_v55 = vld [vmem:[#allocation8 + $0xd5c] ss:$24 sps:$4 sm:$0xff]  }
 0x2e5   :  { %6264 = vmatprep.subr.bf16.mxu0 %v8139_v44  ;;  %v8211_v56 = vld [vmem:[#allocation8 + $0xd04] ss:$24 sps:$4 sm:$0xff]   ;;  %v8206_v44 = vld [vmem:[#allocation8 + $0xd58] ss:$24 sps:$4 sm:$0xff]  }
 0x2e7   :  { %5941 = vmatpush1.bf16.msra.mxu1 %v8134_v2  ;;  %v8209_v2 = vld [vmem:[#allocation8 + $0xd00] ss:$24 sps:$4 sm:$0xff]  }
 0x2e8   :  { %6265 = vmatpush1.bf16.msra.mxu0 %v8137_v60  ;;  %5942 = vmatprep.subr.bf16.mxu1 %v8142_v63  ;;  %v8214_v60 = vld [vmem:[#allocation8 + $0xd8c] ss:$24 sps:$4 sm:$0xff]  }
 0x2e9   :  { %6266 = vmatprep.subr.bf16.mxu0 %v8145_v0  ;;  %v8217_v63 = vld [vmem:[#allocation8 + $0xd34] ss:$24 sps:$4 sm:$0xff]   ;;  %v8212_v0 = vld [vmem:[#allocation8 + $0xd88] ss:$24 sps:$4 sm:$0xff]  }
 0x2eb   :  { %5943 = vmatpush1.bf16.msra.mxu1 %v8140_v5  ;;  %v8215_v5 = vld [vmem:[#allocation8 + $0xd30] ss:$24 sps:$4 sm:$0xff]  }
 0x2ec   :  { %6267 = vmatpush1.bf16.msra.mxu0 %v8143_v6  ;;  %5944 = vmatprep.subr.bf16.mxu1 %v8148_v8  ;;  %v8220_v6 = vld [vmem:[#allocation8 + $0xdbc] ss:$24 sps:$4 sm:$0xff]  }
 0x2ed   :  { %6268 = vmatprep.subr.bf16.mxu0 %v8151_v9  ;;  %v8223_v8 = vld [vmem:[#allocation8 + $0xd64] ss:$24 sps:$4 sm:$0xff]   ;;  %v8218_v9 = vld [vmem:[#allocation8 + $0xdb8] ss:$24 sps:$4 sm:$0xff]  }
 0x2ef   :  { %5945 = vmatpush1.bf16.msra.mxu1 %v8146_v11  ;;  %v8221_v11 = vld [vmem:[#allocation8 + $0xd60] ss:$24 sps:$4 sm:$0xff]  }
 0x2f0   :  { %6269 = vmatpush1.bf16.msra.mxu0 %v8149_v12  ;;  %5946 = vmatprep.subr.bf16.mxu1 %v8154_v32  ;;  %v8226_v12 = vld [vmem:[#allocation8 + $0xdec] ss:$24 sps:$4 sm:$0xff]  }
 0x2f1   :  { %6270 = vmatprep.subr.bf16.mxu0 %v8157_v13  ;;  %v8229_v32 = vld [vmem:[#allocation8 + $0xd94] ss:$24 sps:$4 sm:$0xff]   ;;  %v8224_v13 = vld [vmem:[#allocation8 + $0xde8] ss:$24 sps:$4 sm:$0xff]  }
 0x2f3   :  { %5947 = vmatpush1.bf16.msra.mxu1 %v8152_v14  ;;  %v8227_v14 = vld [vmem:[#allocation8 + $0xd90] ss:$24 sps:$4 sm:$0xff]  }
 0x2f4   :  { %6271 = vmatpush1.bf16.msra.mxu0 %v8155_v33  ;;  %5948 = vmatprep.subr.bf16.mxu1 %v8160_v61  ;;  %v8232_v33 = vld [vmem:[#allocation8 + $0xe1c] ss:$24 sps:$4 sm:$0xff]  }
 0x2f5   :  { %6272 = vmatprep.subr.bf16.mxu0 %v8163_v15  ;;  %v8235_v61 = vld [vmem:[#allocation8 + $0xdc4] ss:$24 sps:$4 sm:$0xff]   ;;  %v8230_v15 = vld [vmem:[#allocation8 + $0xe18] ss:$24 sps:$4 sm:$0xff]  }
 0x2f7   :  { %5949 = vmatpush1.bf16.msra.mxu1 %v8158_v16  ;;  %v8233_v16 = vld [vmem:[#allocation8 + $0xdc0] ss:$24 sps:$4 sm:$0xff]  }
 0x2f8   :  { %6273 = vmatpush1.bf16.msra.mxu0 %v8161_v18  ;;  %5959 = vmatprep.subr.bf16.mxu1 %v8166_v19  ;;  %v8238_v18 = vld [vmem:[#allocation8 + $0xe4c] ss:$24 sps:$4 sm:$0xff]  }
 0x2f9   :  { %6274 = vmatprep.subr.bf16.mxu0 %v8169_v20  ;;  %v8241_v19 = vld [vmem:[#allocation8 + $0xdf4] ss:$24 sps:$4 sm:$0xff]   ;;  %v8236_v20 = vld [vmem:[#allocation8 + $0xe48] ss:$24 sps:$4 sm:$0xff]  }
 0x2fa   :  { %5951 = vmatmul.mubr.bf16.vlgmr.msra.gmra.mrb[12].mxu1 %v8957_v48 }
 0x2fb   :  { %5960 = vmatpush1.bf16.msra.mxu1 %v8164_v46  ;;  %5991 = vmatprep.mubr.bf16.mxu1 %v8880_v3  ;;  %v8239_v46 = vld [vmem:[#allocation8 + $0xdf0] ss:$24 sps:$4 sm:$0xff]  }
 0x2fc   :  { %6275 = vmatpush1.bf16.msra.mxu0 %v8167_v37  ;;  %5961 = vmatprep.subr.bf16.mxu1 %v8172_v25  ;;  %v8244_v37 = vld [vmem:[#allocation8 + $0xe7c] ss:$24 sps:$4 sm:$0xff]  }
 0x2fd   :  { %6276 = vmatprep.subr.bf16.mxu0 %v8175_v53  ;;  %v8247_v25 = vld [vmem:[#allocation8 + $0xe24] ss:$24 sps:$4 sm:$0xff]   ;;  %v8242_v53 = vld [vmem:[#allocation8 + $0xe78] ss:$24 sps:$4 sm:$0xff]  }
 0x2ff   :  { %5962 = vmatpush1.bf16.msra.mxu1 %v8170_v27  ;;  %v8245_v27 = vld [vmem:[#allocation8 + $0xe20] ss:$24 sps:$4 sm:$0xff]  }
 0x300   :  { %6277 = vmatpush1.bf16.msra.mxu0 %v8173_v17  ;;  %5963 = vmatprep.subr.bf16.mxu1 %v8178_v28  ;;  %v8250_v17 = vld [vmem:[#allocation8 + $0xeac] ss:$24 sps:$4 sm:$0xff]  }
 0x301   :  { %6287 = vmatprep.subr.bf16.mxu0 %v8181_v50  ;;  %v8253_v28 = vld [vmem:[#allocation8 + $0xe54] ss:$24 sps:$4 sm:$0xff]   ;;  %v8248_v50 = vld [vmem:[#allocation8 + $0xea8] ss:$24 sps:$4 sm:$0xff]  }
 0x303   :  { %6279 = vmatmul.mubr.bf16.vlgmr.msra.gmra.mrb[12].mxu0 %v8957_v48  ;;  %5964 = vmatpush1.bf16.msra.mxu1 %v8176_v22  ;;  %v8194_v48 = vld [vmem:[#allocation8 + $0xcf8] ss:$24 sps:$4 sm:$0xff]  }
 0x304   :  { %6288 = vmatpush1.bf16.msra.mxu0 %v8179_v30  ;;  %6319 = vmatprep.mubr.bf16.mxu0 %v8880_v3  ;;  %v8205_v3 = vld [vmem:[#allocation8 + $0xcd4] ss:$24 sps:$4 sm:$0xff]   ;;  %v8251_v22 = vld [vmem:[#allocation8 + $0xe50] ss:$24 sps:$4 sm:$0xff]  }
 0x305   :  { %5965 = vmatprep.subr.bf16.mxu1 %v8184_v35  ;;  %6289 = vmatprep.subr.bf16.mxu0 %v8187_v31  ;;  %v8256_v30 = vld [vmem:[#allocation8 + $0xedc] ss:$24 sps:$4 sm:$0xff]   ;;  %v8254_v31 = vld [vmem:[#allocation8 + $0xed8] ss:$24 sps:$4 sm:$0xff]  }
 0x306   :  { %v8259_v35 = vld [vmem:[#allocation8 + $0xe84] ss:$24 sps:$4 sm:$0xff]  }
 0x307   :  { %5966 = vmatpush1.bf16.msra.mxu1 %v8182_v39  ;;  %v8257_v39 = vld [vmem:[#allocation8 + $0xe80] ss:$24 sps:$4 sm:$0xff]  }
 0x308   :  { %6290 = vmatpush1.bf16.msra.mxu0 %v8185_v23  ;;  %5967 = vmatprep.subr.bf16.mxu1 %v8190_v62  ;;  %v8262_v23 = vld [vmem:[#allocation8 + $0xf0c] ss:$24 sps:$4 sm:$0xff]  }
 0x309   :  { %6291 = vmatprep.subr.bf16.mxu0 %v8193_v24  ;;  %v8265_v62 = vld [vmem:[#allocation8 + $0xeb4] ss:$24 sps:$4 sm:$0xff]   ;;  %v8260_v24 = vld [vmem:[#allocation8 + $0xf08] ss:$24 sps:$4 sm:$0xff]  }
 0x30b   :  { %5968 = vmatpush1.bf16.msra.mxu1 %v8188_v43  ;;  %v8263_v43 = vld [vmem:[#allocation8 + $0xeb0] ss:$24 sps:$4 sm:$0xff]  }
 0x30c   :  { %6292 = vmatpush1.bf16.msra.mxu0 %v8191_v45  ;;  %5969 = vmatprep.subr.bf16.mxu1 %v8196_v47  ;;  %v8268_v45 = vld [vmem:[#allocation8 + $0xf3c] ss:$24 sps:$4 sm:$0xff]  }
 0x30d   :  { %6293 = vmatprep.subr.bf16.mxu0 %v8199_v38  ;;  %v8271_v47 = vld [vmem:[#allocation8 + $0xee4] ss:$24 sps:$4 sm:$0xff]   ;;  %v8266_v38 = vld [vmem:[#allocation8 + $0xf38] ss:$24 sps:$4 sm:$0xff]  }
 0x30f   :  { %5970 = vmatpush1.bf16.msra.mxu1 %v8194_v48  ;;  %v8269_v48 = vld [vmem:[#allocation8 + $0xee0] ss:$24 sps:$4 sm:$0xff]  }
 0x310   :  { %6294 = vmatpush1.bf16.msra.mxu0 %v8197_v34  ;;  %5971 = vmatprep.subr.bf16.mxu1 %v8202_v51  ;;  %v8274_v34 = vld [vmem:[#allocation8 + $0xf6c] ss:$24 sps:$4 sm:$0xff]  }
 0x311   :  { %6295 = vmatprep.subr.bf16.mxu0 %v8205_v3  ;;  %v8277_v51 = vld [vmem:[#allocation8 + $0xf14] ss:$24 sps:$4 sm:$0xff]   ;;  %v8272_v3 = vld [vmem:[#allocation8 + $0xf68] ss:$24 sps:$4 sm:$0xff]  }
 0x313   :  { %5972 = vmatpush1.bf16.msra.mxu1 %v8200_v42  ;;  %v8275_v42 = vld [vmem:[#allocation8 + $0xf10] ss:$24 sps:$4 sm:$0xff]  }
 0x314   :  { %6296 = vmatpush1.bf16.msra.mxu0 %v8203_v59  ;;  %5973 = vmatprep.subr.bf16.mxu1 %v8208_v55  ;;  %v8280_v59 = vld [vmem:[#allocation8 + $0xf9c] ss:$24 sps:$4 sm:$0xff]  }
 0x315   :  { %6297 = vmatprep.subr.bf16.mxu0 %v8211_v56  ;;  %v8283_v55 = vld [vmem:[#allocation8 + $0xf44] ss:$24 sps:$4 sm:$0xff]   ;;  %v8278_v56 = vld [vmem:[#allocation8 + $0xf98] ss:$24 sps:$4 sm:$0xff]  }
 0x317   :  { %5974 = vmatpush1.bf16.msra.mxu1 %v8206_v44  ;;  %v8281_v44 = vld [vmem:[#allocation8 + $0xf40] ss:$24 sps:$4 sm:$0xff]  }
 0x318   :  { %6298 = vmatpush1.bf16.msra.mxu0 %v8209_v2  ;;  %5975 = vmatprep.subr.bf16.mxu1 %v8214_v60  ;;  %v8286_v2 = vld [vmem:[#allocation8 + $0xfcc] ss:$24 sps:$4 sm:$0xff]  }
 0x319   :  { %6299 = vmatprep.subr.bf16.mxu0 %v8217_v63  ;;  %v8289_v60 = vld [vmem:[#allocation8 + $0xf74] ss:$24 sps:$4 sm:$0xff]   ;;  %v8284_v63 = vld [vmem:[#allocation8 + $0xfc8] ss:$24 sps:$4 sm:$0xff]  }
 0x31b   :  { %5976 = vmatpush1.bf16.msra.mxu1 %v8212_v0  ;;  %v8287_v0 = vld [vmem:[#allocation8 + $0xf70] ss:$24 sps:$4 sm:$0xff]  }
 0x31c   :  { %6300 = vmatpush1.bf16.msra.mxu0 %v8215_v5  ;;  %5977 = vmatprep.subr.bf16.mxu1 %v8220_v6  ;;  %v8292_v5 = vld [vmem:[#allocation8 + $0xffc] ss:$24 sps:$4 sm:$0xff]  }
 0x31d   :  { %6301 = vmatprep.subr.bf16.mxu0 %v8223_v8  ;;  %v8295_v6 = vld [vmem:[#allocation8 + $0xfa4] ss:$24 sps:$4 sm:$0xff]   ;;  %v8293_v8 = vld [vmem:[#allocation8 + $0xfa0] ss:$24 sps:$4 sm:$0xff]  }
 0x31f   :  { %5978 = vmatpush1.bf16.msra.mxu1 %v8218_v9  ;;  %v8298_v9 = vld [vmem:[#allocation8 + $0x102c] ss:$24 sps:$4 sm:$0xff]  }
 0x320   :  { %6302 = vmatpush1.bf16.msra.mxu0 %v8221_v11  ;;  %5979 = vmatprep.subr.bf16.mxu1 %v8226_v12  ;;  %v8296_v11 = vld [vmem:[#allocation8 + $0x1028] ss:$24 sps:$4 sm:$0xff]  }
 0x321   :  { %6303 = vmatprep.subr.bf16.mxu0 %v8229_v32  ;;  %v8299_v12 = vld [vmem:[#allocation8 + $0xfd0] ss:$24 sps:$4 sm:$0xff]   ;;  %v8304_v32 = vld [vmem:[#allocation8 + $0x105c] ss:$24 sps:$4 sm:$0xff]  }
 0x323   :  { %5980 = vmatpush1.bf16.msra.mxu1 %v8224_v13  ;;  %v8307_v13 = vld [vmem:[#allocation8 + $0x1004] ss:$24 sps:$4 sm:$0xff]  }
 0x324   :  { %6304 = vmatpush1.bf16.msra.mxu0 %v8227_v14  ;;  %5981 = vmatprep.subr.bf16.mxu1 %v8232_v33  ;;  %v8302_v14 = vld [vmem:[#allocation8 + $0x1058] ss:$24 sps:$4 sm:$0xff]  }
 0x325   :  { %6305 = vmatprep.subr.bf16.mxu0 %v8235_v61  ;;  %v8305_v33 = vld [vmem:[#allocation8 + $0x1000] ss:$24 sps:$4 sm:$0xff]   ;;  %v8310_v61 = vld [vmem:[#allocation8 + $0x108c] ss:$24 sps:$4 sm:$0xff]  }
 0x327   :  { %5982 = vmatpush1.bf16.msra.mxu1 %v8230_v15  ;;  %v8313_v15 = vld [vmem:[#allocation8 + $0x1034] ss:$24 sps:$4 sm:$0xff]  }
 0x328   :  { %6306 = vmatpush1.bf16.msra.mxu0 %v8233_v16  ;;  %5983 = vmatprep.subr.bf16.mxu1 %v8238_v18  ;;  %v8308_v16 = vld [vmem:[#allocation8 + $0x1088] ss:$24 sps:$4 sm:$0xff]  }
 0x329   :  { %6307 = vmatprep.subr.bf16.mxu0 %v8241_v19  ;;  %v8311_v18 = vld [vmem:[#allocation8 + $0x1030] ss:$24 sps:$4 sm:$0xff]   ;;  %v8316_v19 = vld [vmem:[#allocation8 + $0x10bc] ss:$24 sps:$4 sm:$0xff]  }
 0x32b   :  { %5984 = vmatpush1.bf16.msra.mxu1 %v8236_v20  ;;  %v8319_v20 = vld [vmem:[#allocation8 + $0x1064] ss:$24 sps:$4 sm:$0xff]  }
 0x32c   :  { %6308 = vmatpush1.bf16.msra.mxu0 %v8239_v46  ;;  %5985 = vmatprep.subr.bf16.mxu1 %v8244_v37  ;;  %v8314_v46 = vld [vmem:[#allocation8 + $0x10b8] ss:$24 sps:$4 sm:$0xff]  }
 0x32d   :  { %6309 = vmatprep.subr.bf16.mxu0 %v8247_v25  ;;  %v8317_v37 = vld [vmem:[#allocation8 + $0x1060] ss:$24 sps:$4 sm:$0xff]   ;;  %v8322_v25 = vld [vmem:[#allocation8 + $0x10ec] ss:$24 sps:$4 sm:$0xff]  }
 0x32f   :  { %5986 = vmatpush1.bf16.msra.mxu1 %v8242_v53  ;;  %v8325_v53 = vld [vmem:[#allocation8 + $0x1094] ss:$24 sps:$4 sm:$0xff]  }
 0x330   :  { %6310 = vmatpush1.bf16.msra.mxu0 %v8245_v27  ;;  %5987 = vmatprep.subr.bf16.mxu1 %v8250_v17  ;;  %v8320_v27 = vld [vmem:[#allocation8 + $0x10e8] ss:$24 sps:$4 sm:$0xff]  }
 0x331   :  { %6311 = vmatprep.subr.bf16.mxu0 %v8253_v28  ;;  %v8323_v17 = vld [vmem:[#allocation8 + $0x1090] ss:$24 sps:$4 sm:$0xff]   ;;  %v8328_v28 = vld [vmem:[#allocation8 + $0x111c] ss:$24 sps:$4 sm:$0xff]  }
 0x333   :  { %5988 = vmatpush1.bf16.msra.mxu1 %v8248_v50  ;;  %v8331_v50 = vld [vmem:[#allocation8 + $0x10c4] ss:$24 sps:$4 sm:$0xff]  }
 0x334   :  { %6312 = vmatpush1.bf16.msra.mxu0 %v8251_v22  ;;  %5989 = vmatprep.subr.bf16.mxu1 %v8256_v30  ;;  %v8326_v22 = vld [vmem:[#allocation8 + $0x1118] ss:$24 sps:$4 sm:$0xff]  }
 0x335   :  { %6313 = vmatprep.subr.bf16.mxu0 %v8259_v35  ;;  %v8329_v30 = vld [vmem:[#allocation8 + $0x10c0] ss:$24 sps:$4 sm:$0xff]   ;;  %v8334_v35 = vld [vmem:[#allocation8 + $0x114c] ss:$24 sps:$4 sm:$0xff]  }
 0x337   :  { %5990 = vmatpush1.bf16.msra.mxu1 %v8254_v31  ;;  %v8337_v31 = vld [vmem:[#allocation8 + $0x10f4] ss:$24 sps:$4 sm:$0xff]  }
 0x338   :  { %6314 = vmatpush1.bf16.msra.mxu0 %v8257_v39  ;;  %6000 = vmatprep.subr.bf16.mxu1 %v8262_v23  ;;  %v8332_v39 = vld [vmem:[#allocation8 + $0x1148] ss:$24 sps:$4 sm:$0xff]  }
 0x339   :  { %6315 = vmatprep.subr.bf16.mxu0 %v8265_v62  ;;  %v8335_v23 = vld [vmem:[#allocation8 + $0x10f0] ss:$24 sps:$4 sm:$0xff]   ;;  %v8340_v62 = vld [vmem:[#allocation8 + $0x117c] ss:$24 sps:$4 sm:$0xff]  }
 0x33a   :  { %5992 = vmatmul.mubr.bf16.vlgmr.msra.gmra.mrb[12].mxu1 %v8882_v4 }
 0x33b   :  { %6001 = vmatpush1.bf16.msra.mxu1 %v8260_v24  ;;  %6032 = vmatprep.mubr.bf16.mxu1 %v8886_v10  ;;  %v8343_v24 = vld [vmem:[#allocation8 + $0x1124] ss:$24 sps:$4 sm:$0xff]  }
 0x33c   :  { %6316 = vmatpush1.bf16.msra.mxu0 %v8263_v43  ;;  %6002 = vmatprep.subr.bf16.mxu1 %v8268_v45  ;;  %v8338_v43 = vld [vmem:[#allocation8 + $0x1178] ss:$24 sps:$4 sm:$0xff]  }
 0x33d   :  { %6317 = vmatprep.subr.bf16.mxu0 %v8271_v47  ;;  %v8341_v45 = vld [vmem:[#allocation8 + $0x1120] ss:$24 sps:$4 sm:$0xff]   ;;  %v8346_v47 = vld [vmem:[#allocation8 + $0x11ac] ss:$24 sps:$4 sm:$0xff]  }
 0x33f   :  { %6003 = vmatpush1.bf16.msra.mxu1 %v8266_v38  ;;  %v8349_v38 = vld [vmem:[#allocation8 + $0x1154] ss:$24 sps:$4 sm:$0xff]  }
 0x340   :  { %6318 = vmatpush1.bf16.msra.mxu0 %v8269_v48  ;;  %6004 = vmatprep.subr.bf16.mxu1 %v8274_v34  ;;  %v8344_v48 = vld [vmem:[#allocation8 + $0x11a8] ss:$24 sps:$4 sm:$0xff]  }
 0x341   :  { %6328 = vmatprep.subr.bf16.mxu0 %v8277_v51  ;;  %v8347_v34 = vld [vmem:[#allocation8 + $0x1150] ss:$24 sps:$4 sm:$0xff]   ;;  %v8352_v51 = vld [vmem:[#allocation8 + $0x11dc] ss:$24 sps:$4 sm:$0xff]  }
 0x343   :  { %6320 = vmatmul.mubr.bf16.vlgmr.msra.gmra.mrb[12].mxu0 %v8882_v4  ;;  %6005 = vmatpush1.bf16.msra.mxu1 %v8272_v3  ;;  %v8290_v4 = vld [vmem:[#allocation8 + $0xff8] ss:$24 sps:$4 sm:$0xff]   ;;  %v8355_v3 = vld [vmem:[#allocation8 + $0x1184] ss:$24 sps:$4 sm:$0xff]  }
 0x344   :  { %6329 = vmatpush1.bf16.msra.mxu0 %v8275_v42  ;;  %6360 = vmatprep.mubr.bf16.mxu0 %v8886_v10  ;;  %v8301_v10 = vld [vmem:[#allocation8 + $0xfd4] ss:$24 sps:$4 sm:$0xff]   ;;  %v8350_v42 = vld [vmem:[#allocation8 + $0x11d8] ss:$24 sps:$4 sm:$0xff]  }
 0x345   :  { %6006 = vmatprep.subr.bf16.mxu1 %v8280_v59  ;;  %6330 = vmatprep.subr.bf16.mxu0 %v8283_v55  ;;  %v8353_v59 = vld [vmem:[#allocation8 + $0x1180] ss:$24 sps:$4 sm:$0xff]   ;;  %v8358_v55 = vld [vmem:[#allocation8 + $0x120c] ss:$24 sps:$4 sm:$0xff]  }
 0x347   :  { %6007 = vmatpush1.bf16.msra.mxu1 %v8278_v56  ;;  %v8361_v56 = vld [vmem:[#allocation8 + $0x11b4] ss:$24 sps:$4 sm:$0xff]  }
 0x348   :  { %6331 = vmatpush1.bf16.msra.mxu0 %v8281_v44  ;;  %6008 = vmatprep.subr.bf16.mxu1 %v8286_v2  ;;  %v8356_v44 = vld [vmem:[#allocation8 + $0x1208] ss:$24 sps:$4 sm:$0xff]  }
 0x349   :  { %6332 = vmatprep.subr.bf16.mxu0 %v8289_v60  ;;  %v8359_v2 = vld [vmem:[#allocation8 + $0x11b0] ss:$24 sps:$4 sm:$0xff]   ;;  %v8364_v60 = vld [vmem:[#allocation8 + $0x123c] ss:$24 sps:$4 sm:$0xff]  }
 0x34b   :  { %6009 = vmatpush1.bf16.msra.mxu1 %v8284_v63  ;;  %v8367_v63 = vld [vmem:[#allocation8 + $0x11e4] ss:$24 sps:$4 sm:$0xff]  }
 0x34c   :  { %6333 = vmatpush1.bf16.msra.mxu0 %v8287_v0  ;;  %6010 = vmatprep.subr.bf16.mxu1 %v8292_v5  ;;  %v8362_v0 = vld [vmem:[#allocation8 + $0x1238] ss:$24 sps:$4 sm:$0xff]  }
 0x34d   :  { %6334 = vmatprep.subr.bf16.mxu0 %v8295_v6  ;;  %v8365_v5 = vld [vmem:[#allocation8 + $0x11e0] ss:$24 sps:$4 sm:$0xff]   ;;  %v8370_v6 = vld [vmem:[#allocation8 + $0x126c] ss:$24 sps:$4 sm:$0xff]  }
 0x34f   :  { %6011 = vmatpush1.bf16.msra.mxu1 %v8290_v4  ;;  %v8373_v4 = vld [vmem:[#allocation8 + $0x1214] ss:$24 sps:$4 sm:$0xff]  }
 0x350   :  { %6335 = vmatpush1.bf16.msra.mxu0 %v8293_v8  ;;  %6012 = vmatprep.subr.bf16.mxu1 %v8298_v9  ;;  %v8368_v8 = vld [vmem:[#allocation8 + $0x1268] ss:$24 sps:$4 sm:$0xff]  }
 0x351   :  { %6336 = vmatprep.subr.bf16.mxu0 %v8301_v10  ;;  %v8371_v9 = vld [vmem:[#allocation8 + $0x1210] ss:$24 sps:$4 sm:$0xff]   ;;  %v8376_v10 = vld [vmem:[#allocation8 + $0x129c] ss:$24 sps:$4 sm:$0xff]  }
 0x353   :  { %6013 = vmatpush1.bf16.msra.mxu1 %v8296_v11  ;;  %v8379_v11 = vld [vmem:[#allocation8 + $0x1244] ss:$24 sps:$4 sm:$0xff]  }
 0x354   :  { %6337 = vmatpush1.bf16.msra.mxu0 %v8299_v12  ;;  %6014 = vmatprep.subr.bf16.mxu1 %v8304_v32  ;;  %v8374_v12 = vld [vmem:[#allocation8 + $0x1298] ss:$24 sps:$4 sm:$0xff]  }
 0x355   :  { %6338 = vmatprep.subr.bf16.mxu0 %v8307_v13  ;;  %v8377_v32 = vld [vmem:[#allocation8 + $0x1240] ss:$24 sps:$4 sm:$0xff]   ;;  %v8382_v13 = vld [vmem:[#allocation8 + $0x12cc] ss:$24 sps:$4 sm:$0xff]  }
 0x357   :  { %6015 = vmatpush1.bf16.msra.mxu1 %v8302_v14  ;;  %v8385_v14 = vld [vmem:[#allocation8 + $0x1274] ss:$24 sps:$4 sm:$0xff]  }
 0x358   :  { %6339 = vmatpush1.bf16.msra.mxu0 %v8305_v33  ;;  %6016 = vmatprep.subr.bf16.mxu1 %v8310_v61  ;;  %v8380_v33 = vld [vmem:[#allocation8 + $0x12c8] ss:$24 sps:$4 sm:$0xff]  }
 0x359   :  { %6340 = vmatprep.subr.bf16.mxu0 %v8313_v15  ;;  %v8383_v61 = vld [vmem:[#allocation8 + $0x1270] ss:$24 sps:$4 sm:$0xff]   ;;  %v8388_v15 = vld [vmem:[#allocation8 + $0x12fc] ss:$24 sps:$4 sm:$0xff]  }
 0x35b   :  { %6017 = vmatpush1.bf16.msra.mxu1 %v8308_v16  ;;  %v8391_v16 = vld [vmem:[#allocation8 + $0x12a4] ss:$24 sps:$4 sm:$0xff]  }
 0x35c   :  { %6341 = vmatpush1.bf16.msra.mxu0 %v8311_v18  ;;  %6018 = vmatprep.subr.bf16.mxu1 %v8316_v19  ;;  %v8389_v18 = vld [vmem:[#allocation8 + $0x12a0] ss:$24 sps:$4 sm:$0xff]   ;;  %v8394_v19 = vld [vmem:[#allocation8 + $0x132c] ss:$24 sps:$4 sm:$0xff]  }
 0x35d   :  { %6342 = vmatprep.subr.bf16.mxu0 %v8319_v20  ;;  %v8392_v20 = vld [vmem:[#allocation8 + $0x1328] ss:$24 sps:$4 sm:$0xff]  }
 0x35f   :  { %6019 = vmatpush1.bf16.msra.mxu1 %v8314_v46  ;;  %v8395_v46 = vld [vmem:[#allocation8 + $0x12d0] ss:$24 sps:$4 sm:$0xff]  }
 0x360   :  { %6343 = vmatpush1.bf16.msra.mxu0 %v8317_v37  ;;  %6020 = vmatprep.subr.bf16.mxu1 %v8322_v25  ;;  %v8400_v37 = vld [vmem:[#allocation8 + $0x135c] ss:$24 sps:$4 sm:$0xff]  }
 0x361   :  { %6344 = vmatprep.subr.bf16.mxu0 %v8325_v53  ;;  %v8403_v25 = vld [vmem:[#allocation8 + $0x1304] ss:$24 sps:$4 sm:$0xff]   ;;  %v8398_v53 = vld [vmem:[#allocation8 + $0x1358] ss:$24 sps:$4 sm:$0xff]  }
 0x363   :  { %6021 = vmatpush1.bf16.msra.mxu1 %v8320_v27  ;;  %v8401_v27 = vld [vmem:[#allocation8 + $0x1300] ss:$24 sps:$4 sm:$0xff]  }
 0x364   :  { %6345 = vmatpush1.bf16.msra.mxu0 %v8323_v17  ;;  %6022 = vmatprep.subr.bf16.mxu1 %v8328_v28  ;;  %v8406_v17 = vld [vmem:[#allocation8 + $0x138c] ss:$24 sps:$4 sm:$0xff]  }
 0x365   :  { %6346 = vmatprep.subr.bf16.mxu0 %v8331_v50  ;;  %v8409_v28 = vld [vmem:[#allocation8 + $0x1334] ss:$24 sps:$4 sm:$0xff]   ;;  %v8404_v50 = vld [vmem:[#allocation8 + $0x1388] ss:$24 sps:$4 sm:$0xff]  }
 0x367   :  { %6023 = vmatpush1.bf16.msra.mxu1 %v8326_v22  ;;  %v8407_v22 = vld [vmem:[#allocation8 + $0x1330] ss:$24 sps:$4 sm:$0xff]  }
 0x368   :  { %6347 = vmatpush1.bf16.msra.mxu0 %v8329_v30  ;;  %6024 = vmatprep.subr.bf16.mxu1 %v8334_v35  ;;  %v8412_v30 = vld [vmem:[#allocation8 + $0x13bc] ss:$24 sps:$4 sm:$0xff]  }
 0x369   :  { %6348 = vmatprep.subr.bf16.mxu0 %v8337_v31  ;;  %v8415_v35 = vld [vmem:[#allocation8 + $0x1364] ss:$24 sps:$4 sm:$0xff]   ;;  %v8410_v31 = vld [vmem:[#allocation8 + $0x13b8] ss:$24 sps:$4 sm:$0xff]  }
 0x36b   :  { %6025 = vmatpush1.bf16.msra.mxu1 %v8332_v39  ;;  %v8413_v39 = vld [vmem:[#allocation8 + $0x1360] ss:$24 sps:$4 sm:$0xff]  }
 0x36c   :  { %6349 = vmatpush1.bf16.msra.mxu0 %v8335_v23  ;;  %6026 = vmatprep.subr.bf16.mxu1 %v8340_v62  ;;  %v8418_v23 = vld [vmem:[#allocation8 + $0x13ec] ss:$24 sps:$4 sm:$0xff]  }
 0x36d   :  { %6350 = vmatprep.subr.bf16.mxu0 %v8343_v24  ;;  %v8421_v62 = vld [vmem:[#allocation8 + $0x1394] ss:$24 sps:$4 sm:$0xff]   ;;  %v8416_v24 = vld [vmem:[#allocation8 + $0x13e8] ss:$24 sps:$4 sm:$0xff]  }
 0x36f   :  { %6027 = vmatpush1.bf16.msra.mxu1 %v8338_v43  ;;  %v8419_v43 = vld [vmem:[#allocation8 + $0x1390] ss:$24 sps:$4 sm:$0xff]  }
 0x370   :  { %6351 = vmatpush1.bf16.msra.mxu0 %v8341_v45  ;;  %6028 = vmatprep.subr.bf16.mxu1 %v8346_v47  ;;  %v8424_v45 = vld [vmem:[#allocation8 + $0x141c] ss:$24 sps:$4 sm:$0xff]  }
 0x371   :  { %6352 = vmatprep.subr.bf16.mxu0 %v8349_v38  ;;  %v8427_v47 = vld [vmem:[#allocation8 + $0x13c4] ss:$24 sps:$4 sm:$0xff]   ;;  %v8422_v38 = vld [vmem:[#allocation8 + $0x1418] ss:$24 sps:$4 sm:$0xff]  }
 0x373   :  { %6029 = vmatpush1.bf16.msra.mxu1 %v8344_v48  ;;  %v8425_v48 = vld [vmem:[#allocation8 + $0x13c0] ss:$24 sps:$4 sm:$0xff]  }
 0x374   :  { %6353 = vmatpush1.bf16.msra.mxu0 %v8347_v34  ;;  %6030 = vmatprep.subr.bf16.mxu1 %v8352_v51  ;;  %v8430_v34 = vld [vmem:[#allocation8 + $0x144c] ss:$24 sps:$4 sm:$0xff]  }
 0x375   :  { %6354 = vmatprep.subr.bf16.mxu0 %v8355_v3  ;;  %v8433_v51 = vld [vmem:[#allocation8 + $0x13f4] ss:$24 sps:$4 sm:$0xff]   ;;  %v8428_v3 = vld [vmem:[#allocation8 + $0x1448] ss:$24 sps:$4 sm:$0xff]  }
 0x377   :  { %6031 = vmatpush1.bf16.msra.mxu1 %v8350_v42  ;;  %v8431_v42 = vld [vmem:[#allocation8 + $0x13f0] ss:$24 sps:$4 sm:$0xff]  }
 0x378   :  { %6355 = vmatpush1.bf16.msra.mxu0 %v8353_v59  ;;  %6041 = vmatprep.subr.bf16.mxu1 %v8358_v55  ;;  %v8436_v59 = vld [vmem:[#allocation8 + $0x147c] ss:$24 sps:$4 sm:$0xff]  }
 0x379   :  { %6356 = vmatprep.subr.bf16.mxu0 %v8361_v56  ;;  %v8439_v55 = vld [vmem:[#allocation8 + $0x1424] ss:$24 sps:$4 sm:$0xff]   ;;  %v8434_v56 = vld [vmem:[#allocation8 + $0x1478] ss:$24 sps:$4 sm:$0xff]  }
 0x37a   :  { %6033 = vmatmul.mubr.bf16.vlgmr.msra.gmra.mrb[12].mxu1 %v8917_v57 }
 0x37b   :  { %6042 = vmatpush1.bf16.msra.mxu1 %v8356_v44  ;;  %6073 = vmatprep.mubr.bf16.mxu1 %v8919_v58  ;;  %v8437_v44 = vld [vmem:[#allocation8 + $0x1420] ss:$24 sps:$4 sm:$0xff]  }
 0x37c   :  { %6357 = vmatpush1.bf16.msra.mxu0 %v8359_v2  ;;  %6043 = vmatprep.subr.bf16.mxu1 %v8364_v60  ;;  %v8442_v2 = vld [vmem:[#allocation8 + $0x14ac] ss:$24 sps:$4 sm:$0xff]  }
 0x37d   :  { %6358 = vmatprep.subr.bf16.mxu0 %v8367_v63  ;;  %v8445_v60 = vld [vmem:[#allocation8 + $0x1454] ss:$24 sps:$4 sm:$0xff]   ;;  %v8440_v63 = vld [vmem:[#allocation8 + $0x14a8] ss:$24 sps:$4 sm:$0xff]  }
 0x37f   :  { %6044 = vmatpush1.bf16.msra.mxu1 %v8362_v0  ;;  %v8443_v0 = vld [vmem:[#allocation8 + $0x1450] ss:$24 sps:$4 sm:$0xff]  }
 0x380   :  { %6359 = vmatpush1.bf16.msra.mxu0 %v8365_v5  ;;  %6045 = vmatprep.subr.bf16.mxu1 %v8370_v6  ;;  %v8448_v5 = vld [vmem:[#allocation8 + $0x14dc] ss:$24 sps:$4 sm:$0xff]  }
 0x381   :  { %6369 = vmatprep.subr.bf16.mxu0 %v8373_v4  ;;  %v8451_v6 = vld [vmem:[#allocation8 + $0x1484] ss:$24 sps:$4 sm:$0xff]   ;;  %v8446_v4 = vld [vmem:[#allocation8 + $0x14d8] ss:$24 sps:$4 sm:$0xff]  }
 0x383   :  { %6361 = vmatmul.mubr.bf16.vlgmr.msra.gmra.mrb[12].mxu0 %v8917_v57  ;;  %6046 = vmatpush1.bf16.msra.mxu1 %v8368_v8  ;;  %v8386_v57 = vld [vmem:[#allocation8 + $0x12f8] ss:$24 sps:$4 sm:$0xff]  }
 0x384   :  { %6370 = vmatpush1.bf16.msra.mxu0 %v8371_v9  ;;  %6401 = vmatprep.mubr.bf16.mxu0 %v8919_v58  ;;  %v8397_v58 = vld [vmem:[#allocation8 + $0x12d4] ss:$24 sps:$4 sm:$0xff]   ;;  %v8449_v8 = vld [vmem:[#allocation8 + $0x1480] ss:$24 sps:$4 sm:$0xff]  }
 0x385   :  { %6047 = vmatprep.subr.bf16.mxu1 %v8376_v10  ;;  %6371 = vmatprep.subr.bf16.mxu0 %v8379_v11  ;;  %v8454_v9 = vld [vmem:[#allocation8 + $0x150c] ss:$24 sps:$4 sm:$0xff]   ;;  %v8452_v11 = vld [vmem:[#allocation8 + $0x1508] ss:$24 sps:$4 sm:$0xff]  }
 0x386   :  { %v8457_v10 = vld [vmem:[#allocation8 + $0x14b4] ss:$24 sps:$4 sm:$0xff]  }
 0x387   :  { %6048 = vmatpush1.bf16.msra.mxu1 %v8374_v12  ;;  %v8455_v12 = vld [vmem:[#allocation8 + $0x14b0] ss:$24 sps:$4 sm:$0xff]  }
 0x388   :  { %6372 = vmatpush1.bf16.msra.mxu0 %v8377_v32  ;;  %6049 = vmatprep.subr.bf16.mxu1 %v8382_v13  ;;  %v8460_v32 = vld [vmem:[#allocation8 + $0x153c] ss:$24 sps:$4 sm:$0xff]  }
 0x389   :  { %6373 = vmatprep.subr.bf16.mxu0 %v8385_v14  ;;  %v8463_v13 = vld [vmem:[#allocation8 + $0x14e4] ss:$24 sps:$4 sm:$0xff]   ;;  %v8458_v14 = vld [vmem:[#allocation8 + $0x1538] ss:$24 sps:$4 sm:$0xff]  }
 0x38b   :  { %6050 = vmatpush1.bf16.msra.mxu1 %v8380_v33  ;;  %v8461_v33 = vld [vmem:[#allocation8 + $0x14e0] ss:$24 sps:$4 sm:$0xff]  }
 0x38c   :  { %6374 = vmatpush1.bf16.msra.mxu0 %v8383_v61  ;;  %6051 = vmatprep.subr.bf16.mxu1 %v8388_v15  ;;  %v8466_v61 = vld [vmem:[#allocation8 + $0x156c] ss:$24 sps:$4 sm:$0xff]  }
 0x38d   :  { %6375 = vmatprep.subr.bf16.mxu0 %v8391_v16  ;;  %v8469_v15 = vld [vmem:[#allocation8 + $0x1514] ss:$24 sps:$4 sm:$0xff]   ;;  %v8464_v16 = vld [vmem:[#allocation8 + $0x1568] ss:$24 sps:$4 sm:$0xff]  }
 0x38f   :  { %6052 = vmatpush1.bf16.msra.mxu1 %v8386_v57  ;;  %v8467_v57 = vld [vmem:[#allocation8 + $0x1510] ss:$24 sps:$4 sm:$0xff]  }
 0x390   :  { %6376 = vmatpush1.bf16.msra.mxu0 %v8389_v18  ;;  %6053 = vmatprep.subr.bf16.mxu1 %v8394_v19  ;;  %v8472_v18 = vld [vmem:[#allocation8 + $0x159c] ss:$24 sps:$4 sm:$0xff]  }
 0x391   :  { %6377 = vmatprep.subr.bf16.mxu0 %v8397_v58  ;;  %v8475_v19 = vld [vmem:[#allocation8 + $0x1544] ss:$24 sps:$4 sm:$0xff]   ;;  %v8470_v58 = vld [vmem:[#allocation8 + $0x1598] ss:$24 sps:$4 sm:$0xff]  }
 0x393   :  { %6054 = vmatpush1.bf16.msra.mxu1 %v8392_v20  ;;  %v8473_v20 = vld [vmem:[#allocation8 + $0x1540] ss:$24 sps:$4 sm:$0xff]  }
 0x394   :  { %6378 = vmatpush1.bf16.msra.mxu0 %v8395_v46  ;;  %6055 = vmatprep.subr.bf16.mxu1 %v8400_v37  ;;  %v8478_v46 = vld [vmem:[#allocation8 + $0x15cc] ss:$24 sps:$4 sm:$0xff]  }
 0x395   :  { %6379 = vmatprep.subr.bf16.mxu0 %v8403_v25  ;;  %v8481_v37 = vld [vmem:[#allocation8 + $0x1574] ss:$24 sps:$4 sm:$0xff]   ;;  %v8476_v25 = vld [vmem:[#allocation8 + $0x15c8] ss:$24 sps:$4 sm:$0xff]  }
 0x397   :  { %6056 = vmatpush1.bf16.msra.mxu1 %v8398_v53  ;;  %v8479_v53 = vld [vmem:[#allocation8 + $0x1570] ss:$24 sps:$4 sm:$0xff]  }
 0x398   :  { %6380 = vmatpush1.bf16.msra.mxu0 %v8401_v27  ;;  %6057 = vmatprep.subr.bf16.mxu1 %v8406_v17  ;;  %v8484_v27 = vld [vmem:[#allocation8 + $0x15fc] ss:$24 sps:$4 sm:$0xff]  }
 0x399   :  { %6381 = vmatprep.subr.bf16.mxu0 %v8409_v28  ;;  %v8487_v17 = vld [vmem:[#allocation8 + $0x15a4] ss:$24 sps:$4 sm:$0xff]   ;;  %v8485_v28 = vld [vmem:[#allocation8 + $0x15a0] ss:$24 sps:$4 sm:$0xff]  }
 0x39b   :  { %6058 = vmatpush1.bf16.msra.mxu1 %v8404_v50  ;;  %v8490_v50 = vld [vmem:[#allocation8 + $0x162c] ss:$24 sps:$4 sm:$0xff]  }
 0x39c   :  { %6382 = vmatpush1.bf16.msra.mxu0 %v8407_v22  ;;  %6059 = vmatprep.subr.bf16.mxu1 %v8412_v30  ;;  %v8488_v22 = vld [vmem:[#allocation8 + $0x1628] ss:$24 sps:$4 sm:$0xff]  }
 0x39d   :  { %6383 = vmatprep.subr.bf16.mxu0 %v8415_v35  ;;  %v8491_v30 = vld [vmem:[#allocation8 + $0x15d0] ss:$24 sps:$4 sm:$0xff]   ;;  %v8496_v35 = vld [vmem:[#allocation8 + $0x165c] ss:$24 sps:$4 sm:$0xff]  }
 0x39f   :  { %6060 = vmatpush1.bf16.msra.mxu1 %v8410_v31  ;;  %v8499_v31 = vld [vmem:[#allocation8 + $0x1604] ss:$24 sps:$4 sm:$0xff]  }
 0x3a0   :  { %6384 = vmatpush1.bf16.msra.mxu0 %v8413_v39  ;;  %6061 = vmatprep.subr.bf16.mxu1 %v8418_v23  ;;  %v8494_v39 = vld [vmem:[#allocation8 + $0x1658] ss:$24 sps:$4 sm:$0xff]  }
 0x3a1   :  { %6385 = vmatprep.subr.bf16.mxu0 %v8421_v62  ;;  %v8497_v23 = vld [vmem:[#allocation8 + $0x1600] ss:$24 sps:$4 sm:$0xff]   ;;  %v8502_v62 = vld [vmem:[#allocation8 + $0x168c] ss:$24 sps:$4 sm:$0xff]  }
 0x3a3   :  { %6062 = vmatpush1.bf16.msra.mxu1 %v8416_v24  ;;  %v8505_v24 = vld [vmem:[#allocation8 + $0x1634] ss:$24 sps:$4 sm:$0xff]  }
 0x3a4   :  { %6386 = vmatpush1.bf16.msra.mxu0 %v8419_v43  ;;  %6063 = vmatprep.subr.bf16.mxu1 %v8424_v45  ;;  %v8500_v43 = vld [vmem:[#allocation8 + $0x1688] ss:$24 sps:$4 sm:$0xff]  }
 0x3a5   :  { %6387 = vmatprep.subr.bf16.mxu0 %v8427_v47  ;;  %v8503_v45 = vld [vmem:[#allocation8 + $0x1630] ss:$24 sps:$4 sm:$0xff]   ;;  %v8508_v47 = vld [vmem:[#allocation8 + $0x16bc] ss:$24 sps:$4 sm:$0xff]  }
 0x3a7   :  { %6064 = vmatpush1.bf16.msra.mxu1 %v8422_v38  ;;  %v8511_v38 = vld [vmem:[#allocation8 + $0x1664] ss:$24 sps:$4 sm:$0xff]  }
 0x3a8   :  { %6388 = vmatpush1.bf16.msra.mxu0 %v8425_v48  ;;  %6065 = vmatprep.subr.bf16.mxu1 %v8430_v34  ;;  %v8506_v48 = vld [vmem:[#allocation8 + $0x16b8] ss:$24 sps:$4 sm:$0xff]  }
 0x3a9   :  { %6389 = vmatprep.subr.bf16.mxu0 %v8433_v51  ;;  %v8509_v34 = vld [vmem:[#allocation8 + $0x1660] ss:$24 sps:$4 sm:$0xff]   ;;  %v8514_v51 = vld [vmem:[#allocation8 + $0x16ec] ss:$24 sps:$4 sm:$0xff]  }
 0x3ab   :  { %6066 = vmatpush1.bf16.msra.mxu1 %v8428_v3  ;;  %v8517_v3 = vld [vmem:[#allocation8 + $0x1694] ss:$24 sps:$4 sm:$0xff]  }
 0x3ac   :  { %6390 = vmatpush1.bf16.msra.mxu0 %v8431_v42  ;;  %6067 = vmatprep.subr.bf16.mxu1 %v8436_v59  ;;  %v8512_v42 = vld [vmem:[#allocation8 + $0x16e8] ss:$24 sps:$4 sm:$0xff]  }
 0x3ad   :  { %6391 = vmatprep.subr.bf16.mxu0 %v8439_v55  ;;  %v8515_v59 = vld [vmem:[#allocation8 + $0x1690] ss:$24 sps:$4 sm:$0xff]   ;;  %v8520_v55 = vld [vmem:[#allocation8 + $0x171c] ss:$24 sps:$4 sm:$0xff]  }
 0x3af   :  { %6068 = vmatpush1.bf16.msra.mxu1 %v8434_v56  ;;  %v8523_v56 = vld [vmem:[#allocation8 + $0x16c4] ss:$24 sps:$4 sm:$0xff]  }
 0x3b0   :  { %6392 = vmatpush1.bf16.msra.mxu0 %v8437_v44  ;;  %6069 = vmatprep.subr.bf16.mxu1 %v8442_v2  ;;  %v8518_v44 = vld [vmem:[#allocation8 + $0x1718] ss:$24 sps:$4 sm:$0xff]  }
 0x3b1   :  { %6393 = vmatprep.subr.bf16.mxu0 %v8445_v60  ;;  %v8521_v2 = vld [vmem:[#allocation8 + $0x16c0] ss:$24 sps:$4 sm:$0xff]   ;;  %v8526_v60 = vld [vmem:[#allocation8 + $0x174c] ss:$24 sps:$4 sm:$0xff]  }
 0x3b3   :  { %6070 = vmatpush1.bf16.msra.mxu1 %v8440_v63  ;;  %v8529_v63 = vld [vmem:[#allocation8 + $0x16f4] ss:$24 sps:$4 sm:$0xff]  }
 0x3b4   :  { %6394 = vmatpush1.bf16.msra.mxu0 %v8443_v0  ;;  %6071 = vmatprep.subr.bf16.mxu1 %v8448_v5  ;;  %v8524_v0 = vld [vmem:[#allocation8 + $0x1748] ss:$24 sps:$4 sm:$0xff]  }
 0x3b5   :  { %6395 = vmatprep.subr.bf16.mxu0 %v8451_v6  ;;  %v8527_v5 = vld [vmem:[#allocation8 + $0x16f0] ss:$24 sps:$4 sm:$0xff]   ;;  %v8532_v6 = vld [vmem:[#allocation8 + $0x177c] ss:$24 sps:$4 sm:$0xff]  }
 0x3b7   :  { %6072 = vmatpush1.bf16.msra.mxu1 %v8446_v4  ;;  %v8535_v4 = vld [vmem:[#allocation8 + $0x1724] ss:$24 sps:$4 sm:$0xff]  }
 0x3b8   :  { %6396 = vmatpush1.bf16.msra.mxu0 %v8449_v8  ;;  %6082 = vmatprep.subr.bf16.mxu1 %v8454_v9  ;;  %v8530_v8 = vld [vmem:[#allocation8 + $0x1778] ss:$24 sps:$4 sm:$0xff]  }
 0x3b9   :  { %6397 = vmatprep.subr.bf16.mxu0 %v8457_v10  ;;  %v8533_v9 = vld [vmem:[#allocation8 + $0x1720] ss:$24 sps:$4 sm:$0xff]   ;;  %v8538_v10 = vld [vmem:[#allocation8 + $0x17ac] ss:$24 sps:$4 sm:$0xff]  }
 0x3ba   :  { %6074 = vmatmul.mubr.bf16.vlgmr.msra.gmra.mrb[12].mxu1 %v8947_v29 }
 0x3bb   :  { %6083 = vmatpush1.bf16.msra.mxu1 %v8452_v11  ;;  %6114 = vmatprep.mubr.bf16.mxu1 %v8949_v54  ;;  %v8541_v11 = vld [vmem:[#allocation8 + $0x1754] ss:$24 sps:$4 sm:$0xff]  }
 0x3bc   :  { %6398 = vmatpush1.bf16.msra.mxu0 %v8455_v12  ;;  %6084 = vmatprep.subr.bf16.mxu1 %v8460_v32  ;;  %v8536_v12 = vld [vmem:[#allocation8 + $0x17a8] ss:$24 sps:$4 sm:$0xff]  }
 0x3bd   :  { %6399 = vmatprep.subr.bf16.mxu0 %v8463_v13  ;;  %v8539_v32 = vld [vmem:[#allocation8 + $0x1750] ss:$24 sps:$4 sm:$0xff]   ;;  %v8544_v13 = vld [vmem:[#allocation8 + $0x17dc] ss:$24 sps:$4 sm:$0xff]  }
 0x3bf   :  { %6085 = vmatpush1.bf16.msra.mxu1 %v8458_v14  ;;  %v8547_v14 = vld [vmem:[#allocation8 + $0x1784] ss:$24 sps:$4 sm:$0xff]  }
 0x3c0   :  { %6400 = vmatpush1.bf16.msra.mxu0 %v8461_v33  ;;  %6086 = vmatprep.subr.bf16.mxu1 %v8466_v61  ;;  %v8542_v33 = vld [vmem:[#allocation8 + $0x17d8] ss:$24 sps:$4 sm:$0xff]  }
 0x3c1   :  { %6410 = vmatprep.subr.bf16.mxu0 %v8469_v15  ;;  %v8545_v61 = vld [vmem:[#allocation8 + $0x1780] ss:$24 sps:$4 sm:$0xff]   ;;  %v8550_v15 = vld [vmem:[#allocation8 + $0x17b4] ss:$24 sps:$4 sm:$0xff]  }
 0x3c3   :  { %6402 = vmatmul.mubr.bf16.vlgmr.msra.gmra.mrb[12].mxu0 %v8947_v29  ;;  %6087 = vmatpush1.bf16.msra.mxu1 %v8464_v16  ;;  %v8482_v29 = vld [vmem:[#allocation8 + $0x15f8] ss:$24 sps:$4 sm:$0xff]  }
 0x3c4   :  { %6411 = vmatpush1.bf16.msra.mxu0 %v8467_v57  ;;  %6442 = vmatprep.mubr.bf16.mxu0 %v8949_v54  ;;  %v8493_v54 = vld [vmem:[#allocation8 + $0x15d4] ss:$24 sps:$4 sm:$0xff]   ;;  %v8548_v16 = vld [vmem:[#allocation8 + $0x17b0] ss:$24 sps:$4 sm:$0xff]   ;;  %v8553_v57 = vld [vmem:[#allocation8 + $0x17e4] ss:$24 sps:$4 sm:$0xff]  }
 0x3c5   :  { %6088 = vmatprep.subr.bf16.mxu1 %v8472_v18  ;;  %6412 = vmatprep.subr.bf16.mxu0 %v8475_v19  ;;  %v8551_v18 = vld [vmem:[#allocation8 + $0x17e0] ss:$24 sps:$4 sm:$0xff]   ;;  %v8705_v19 = vmov 1983009808  }
 0x3c7   :  { %6089 = vmatpush1.bf16.msra.mxu1 %v8470_v58  ;;  %v6460_v58 = vunpack.c.l.s4 %v8705_v19 }
 0x3c8   :  { %6413 = vmatpush1.bf16.msra.mxu0 %v8473_v20  ;;  %6090 = vmatprep.subr.bf16.mxu1 %v8478_v46  ;;  %v8556_v20 = vld [vmem:[#allocation10] sm:$0x3f] }
 0x3c9   :  { %6414 = vmatprep.subr.bf16.mxu0 %v8481_v37  ;;  %v1608_v46 = vrot.slane %v8556_v20, %v8894_v1  ;;  %v6461_v37 = vunpack.c.0.s8 %v6460_v58  ;;  %v1620_v1 = vrot.slane %v8556_v20, %v8897_v7 }
 0x3cb   :  { %6091 = vmatpush1.bf16.msra.mxu1 %v8476_v25  ;;  %v1612_v25 = vrot.slane %v8556_v20, %v8841_v26 }
 0x3cc   :  { %6415 = vmatpush1.bf16.msra.mxu0 %v8479_v53  ;;  %6092 = vmatprep.subr.bf16.mxu1 %v8484_v27 }
 0x3cd   :  { %6416 = vmatprep.subr.bf16.mxu0 %v8487_v17 }
 0x3cf   :  { %6093 = vmatpush1.bf16.msra.mxu1 %v8482_v29  ;;  %v6464_v29 = vsub.s32 %v6461_v37, %v8828_v21 }
 0x3d0   :  { %6417 = vmatpush1.bf16.msra.mxu0 %v8485_v28  ;;  %6094 = vmatprep.subr.bf16.mxu1 %v8490_v50 }
 0x3d1   :  { %6418 = vmatprep.subr.bf16.mxu0 %v8493_v54 }
 0x3d3   :  { %6095 = vmatpush1.bf16.msra.mxu1 %v8488_v22 }
 0x3d4   :  { %6419 = vmatpush1.bf16.msra.mxu0 %v8491_v30  ;;  %6096 = vmatprep.subr.bf16.mxu1 %v8496_v35  ;;  %v1616_v35 = vrot.slane %v8556_v20, %v8924_v52 }
 0x3d5   :  { %6420 = vmatprep.subr.bf16.mxu0 %v8499_v31 }
 0x3d7   :  { %6097 = vmatpush1.bf16.msra.mxu1 %v8494_v39 }
 0x3d8   :  { %6421 = vmatpush1.bf16.msra.mxu0 %v8497_v23  ;;  %6098 = vmatprep.subr.bf16.mxu1 %v8502_v62 }
 0x3d9   :  { %6422 = vmatprep.subr.bf16.mxu0 %v8505_v24 }
 0x3db   :  { %6099 = vmatpush1.bf16.msra.mxu1 %v8500_v43 }
 0x3dc   :  { %6423 = vmatpush1.bf16.msra.mxu0 %v8503_v45  ;;  %6100 = vmatprep.subr.bf16.mxu1 %v8508_v47 }
 0x3dd   :  { %6424 = vmatprep.subr.bf16.mxu0 %v8511_v38 }
 0x3df   :  { %6101 = vmatpush1.bf16.msra.mxu1 %v8506_v48 }
 0x3e0   :  { %6425 = vmatpush1.bf16.msra.mxu0 %v8509_v34  ;;  %6102 = vmatprep.subr.bf16.mxu1 %v8514_v51 }
 0x3e1   :  { %6426 = vmatprep.subr.bf16.mxu0 %v8517_v3 }
 0x3e3   :  { %6103 = vmatpush1.bf16.msra.mxu1 %v8512_v42 }
 0x3e4   :  { %6427 = vmatpush1.bf16.msra.mxu0 %v8515_v59  ;;  %6104 = vmatprep.subr.bf16.mxu1 %v8520_v55 }
 0x3e5   :  { %6428 = vmatprep.subr.bf16.mxu0 %v8523_v56 }
 0x3e7   :  { %6105 = vmatpush1.bf16.msra.mxu1 %v8518_v44 }
 0x3e8   :  { %6429 = vmatpush1.bf16.msra.mxu0 %v8521_v2  ;;  %6106 = vmatprep.subr.bf16.mxu1 %v8526_v60 }
 0x3e9   :  { %6430 = vmatprep.subr.bf16.mxu0 %v8529_v63 }
 0x3eb   :  { %6107 = vmatpush1.bf16.msra.mxu1 %v8524_v0 }
 0x3ec   :  { %6431 = vmatpush1.bf16.msra.mxu0 %v8527_v5  ;;  %6108 = vmatprep.subr.bf16.mxu1 %v8532_v6 }
 0x3ed   :  { %6432 = vmatprep.subr.bf16.mxu0 %v8535_v4 }
 0x3ef   :  { %6109 = vmatpush1.bf16.msra.mxu1 %v8530_v8 }
 0x3f0   :  { %6433 = vmatpush1.bf16.msra.mxu0 %v8533_v9  ;;  %6110 = vmatprep.subr.bf16.mxu1 %v8538_v10 }
 0x3f1   :  { %6434 = vmatprep.subr.bf16.mxu0 %v8541_v11 }
 0x3f3   :  { %6111 = vmatpush1.bf16.msra.mxu1 %v8536_v12 }
 0x3f4   :  { %6435 = vmatpush1.bf16.msra.mxu0 %v8539_v32  ;;  %6112 = vmatprep.subr.bf16.mxu1 %v8544_v13 }
 0x3f5   :  { %6436 = vmatprep.subr.bf16.mxu0 %v8547_v14 }
 0x3f7   :  { %6113 = vmatpush1.bf16.msra.mxu1 %v8542_v33 }
 0x3f8   :  { %6437 = vmatpush1.bf16.msra.mxu0 %v8545_v61 }
 0x3f9   :  { %6438 = vmatprep.subr.bf16.mxu0 %v8550_v15 }
 0x3fa   :  { %6115 = vmatmul.mubr.bf16.vlgmr.msra.gmra.mrb[12].mxu1 %v8962_v36 }
 0x3fc   :  { %6439 = vmatpush1.bf16.msra.mxu0 %v8548_v16 }
 0x3fd   :  { %6440 = vmatprep.subr.bf16.mxu0 %v8553_v57 }
 0x400   :  { %6441 = vmatpush1.bf16.msra.mxu0 %v8551_v18 }
 0x403   :  { %6443 = vmatmul.mubr.bf16.vlgmr.msra.gmra.mrb[12].mxu0 %v8962_v36  ;;  %v6465_v36 = vrot.slane %v6457_v49, %v6464_v29 }
 0x4cd   :  { %v6116_v53 = vpop.f32.mrb[12].mxu1 }
 0x4ce   :  { %v7300_v27 = vadd.f32 %v6116_v53, %v1608_v46  ;;  %v6118_v17 = vpop.f32.mrb[13].mxu1 }
 0x4cf   :  { %v7301_v28 = vadd.f32 %v6118_v17, %v1612_v25  ;;  %v6120_v50 = vpop.f32.mrb[14].mxu1 }
 0x4d0   :  { %v6121_v54 = vpop.f32.mrb[15].mxu1 }
 0x4d1   :  { %v6458_v22 = vcombine.low %v7300_v27, %v7301_v28 }
 0x4d3   :  { %v6472_v30 = vrot.slane %v6458_v22, %v6464_v29 }
 0x4d5   :  { %v6473_v31 = vcombine.low %v6465_v36, %v6472_v30 }
 0x4d6   :  { %v6444_v26 = vpop.f32.mrb[12].mxu0 }
 0x4d7   :  { %v7302_v39 = vadd.f32 %v6444_v26, %v1616_v35  ;;  %v6446_v23 = vpop.f32.mrb[13].mxu0  ;;  %6484 = vst [vmem:[#allocation11] sm:$0xff] %v6473_v31 }
 0x4d8   :  { %v7303_v21 = vadd.f32 %v6446_v23, %v1620_v1  ;;  %v6448_v62 = vpop.f32.mrb[14].mxu0 }
 0x4d9   :  { %v6449_v24 = vpop.f32.mrb[15].mxu0 }
 0x4da   :  { %v6474_v43 = vcombine.low %v7302_v39, %v7303_v21 }
 0x4dc   :  { %7295 = vst.sshfl [vmem:[#allocation11 + $0x8] sm:$0x33 pattern:$0x76325410] %v6474_v43 }
 0x4dd   :  { %8678 = shalt.err (!%p8675_p2)
}
 0x4de   :  { %s8679_s3 = scalar_lea.hbm %s9029_s5, 192 }
 0x4df   :  { %p8680_p3 = scmp.ne.s32.totalorder %s9029_s5, %s8679_s3  ;;  %p8683_p4 = scmp.lt.u32.totalorder %s8679_s3, %s9029_s5 }
 0x4e1   :  { %p8685_p5 = pnand %p8683_p4, %p8680_p3 }
 0x4e3   :  { %8688 = shalt.err (!%p8685_p5)
}
 0x4e4   :  { %6495 = dma.vmem_to_hbm [thread:$0]  %s6493_s26, 192, %s9029_s5, [#allocation4]  }
 0x4e5   :  { %8695 = dma.done.wait [#allocation4], 192  }
 0x4e6   :  { %8696 = vsyncadd [#allocation4], 4294967104 }
 0x4e7   :  { %6499 = vsyncpa [#allocation3], 1 }
 0x4e8   :  { %6500 = vsyncpa [#allocation6], 1 }
 0x4e9   :  { %6501 = vsyncpa [#allocation9], 1 }
 0x4ea   :  { %6502 = vsyncpa [#allocation4], 1 }

</bundles_post_ra>
